<compile_context>
chip_gen: v7x
topology: tpu7x:2x2x1
jax: 0.10.0
libtpu: 0.0.40
codegen_flags: <defaults>
</compile_context>

<pallas_src>
import numpy as np
import jax
import jax.numpy as jnp
from jax.experimental import pallas as pl
from jax.experimental.pallas import tpu as pltpu

R = 2  # PixelShuffle / upsample factor (module default)


def _gelu(x):
    # exact (erf-based) GELU, matching torch.nn.GELU() default
    return 0.5 * x * (1.0 + jax.lax.erf(x * 0.7071067811865476))


def _phase_decompose(i_or_j, k):
    """High-res tap offset a = i + k - 1  ->  (low-res input phase, low-res shift)."""
    a = i_or_j + k - 1
    ph = a % 2
    sh = (a - ph) // 2
    return ph, sh


def residual_block_upsample(x_nchw, params):
    """Forward pass.  x_nchw: (B, Cin, H, W) f32.

    params (PyTorch layouts):
      W1, b1        subpel_conv 3x3 : (Cout*4, Cin, 3, 3), (Cout*4,)
      W3, b3        conv3x3         : (Cout, Cout, 3, 3), (Cout,)
      gamma, beta   inverse GDN     : (Cout, Cout), (Cout,)   (already >= 0)
      W2, b2        upsample conv   : (Cout*4, Cin, 3, 3), (Cout*4,)
    Returns (B, Cout, 2H, 2W) f32.
    """
    W1, b1, W3, b3, gamma, beta, W2, b2 = params
    B, Cin, H, Wsp = x_nchw.shape
    Cout = W3.shape[0]
    C4 = Cout * R * R                        # pre-shuffle channels of one subpel conv
    OC = 2 * C4                              # both subpel convs stacked
    HW = H * Wsp
    PAD = ((Wsp + 1 + 127) // 128) * 128     # lane-aligned zero guard, >= Wsp + 1
    CMAX = max(Cin, C4)                      # staging slab holds either x (Cin) or g (C4)

    # ---------------- host-side parameter re-layout (layout plumbing) ----------------
    # Phase-major reordering of the subpel conv output channels:
    #   new row p*Cout + c  <-  old row c*4 + p   (p = 2*i + j  ==  PixelShuffle phase)
    perm = np.array([(n % Cout) * (R * R) + n // Cout for n in range(C4)])
    W1r, b1r = np.asarray(W1)[perm], np.asarray(b1)[perm]
    W2r, b2r = np.asarray(W2)[perm], np.asarray(b2)[perm]
    w12 = np.concatenate([W1r, W2r], axis=0)                      # (OC, Cin, 3, 3)
    w12 = np.transpose(w12, (2, 3, 0, 1)).reshape(9, OC, Cin).astype(np.float32)
    b12 = np.concatenate([b1r, b2r]).astype(np.float32)[:, None]  # (OC, 1)

    # Polyphase fold of the 3x3 conv at the *upsampled* resolution.  Only the 16
    # (phase, shift) combined-weight slices the kernel actually uses are built,
    # and the 4 shift slots of each phase are pre-concatenated along K so one
    # MXU matmul per phase covers all 4 taps.
    W3n = np.asarray(W3)
    cw3 = np.zeros((4, Cout, 4 * C4), np.float32)
    for i in range(2):
        for j in range(2):
            p = 2 * i + j
            dh_list = (-1, 0) if i == 0 else (0, 1)
            dw_list = (-1, 0) if j == 0 else (0, 1)
            for ky in range(3):
                i2, dh = _phase_decompose(i, ky)
                for kx in range(3):
                    j2, dw = _phase_decompose(j, kx)
                    s = dh_list.index(dh) * 2 + dw_list.index(dw)
                    q = 2 * i2 + j2
                    col = s * C4 + q * Cout
                    cw3[p, :, col:col + Cout] += W3n[:, :, ky, kx]

    b3c = np.asarray(b3).astype(np.float32)[:, None]
    betac = np.asarray(beta).astype(np.float32)[:, None]
    gammac = np.asarray(gamma).astype(np.float32)

    x_flat = x_nchw.reshape(B, Cin, HW)      # channels on sublanes, H*W on lanes

    # --------------------------------- kernel ---------------------------------------
    def kernel(x_ref, w12_ref, b12_ref, cw3_ref, b3_ref, gam_ref, bet_ref,
               o_ref, pad_ref):
        # Zero only the lane-aligned guard bands (interior is always fully
        # rewritten).  Must run every step: under megacore "parallel" each core
        # has its own scratch and may never execute program_id == 0.
        pad_ref[:, 0:PAD] = jnp.zeros((CMAX, PAD), jnp.float32)
        pad_ref[:, PAD + HW:PAD + HW + PAD] = jnp.zeros((CMAX, PAD), jnp.float32)

        lane = jax.lax.broadcasted_iota(jnp.int32, (1, HW), 1)
        ww = lane % Wsp
        m_wpos = ww < (Wsp - 1)    # lanes valid for dw = +1
        m_wneg = ww >= 1           # lanes valid for dw = -1

        def stage(t):              # store into the lane-aligned interior
            pad_ref[0:t.shape[0], PAD:PAD + HW] = t

        def shifted(rows, dh, dw):
            # Flattened read of t[:, h+dh, w+dw]; zeros outside the image
            # (guard bands handle the h boundary, a 1-lane mask handles w).
            off = PAD + dh * Wsp + dw
            v = pad_ref[0:rows, off:off + HW]
            if dw > 0:
                return jnp.where(m_wpos, v, 0.0)
            if dw < 0:
                return jnp.where(m_wneg, v, 0.0)
            return v

        # --- both subpel 3x3 convs as one stacked 9-tap matmul accumulation ---------
        stage(x_ref[0])                                   # (Cin, HW)
        s12 = None
        for ky in range(3):
            for kx in range(3):
                xs = shifted(Cin, ky - 1, kx - 1)
                c = jnp.dot(w12_ref[ky * 3 + kx], xs,
                            preferred_element_type=jnp.float32)
                s12 = c if s12 is None else s12 + c
        s12 = s12 + b12_ref[...]                          # (OC, HW)
        g = _gelu(s12[:C4])      # main branch, phase-major, pre-shuffle
        s2 = s12[C4:]            # identity branch, phase-major, pre-shuffle

        # --- high-res conv3x3: one fused-K MXU matmul per output phase --------------
        stage(g)                                          # (C4, HW)
        vs = []
        for i in (0, 1):
            for j in (0, 1):
                p = 2 * i + j
                dh_list = (-1, 0) if i == 0 else (0, 1)
                dw_list = (-1, 0) if j == 0 else (0, 1)
                ops = [shifted(C4, dh, dw) for dh in dh_list for dw in dw_list]
                gcat = jnp.concatenate(ops, axis=0)       # (4*C4, HW)
                vs.append(jnp.dot(cw3_ref[p], gcat,
                                  preferred_element_type=jnp.float32)
                          + b3_ref[...])                  # (Cout, HW)

        # --- inverse GDN batched across phases + residual add -----------------------
        vcat = jnp.concatenate(vs, axis=1)                # (Cout, 4*HW)
        nrm = jnp.dot(gam_ref[...], vcat * vcat,
                      preferred_element_type=jnp.float32)
        ycat = vcat * jnp.sqrt(nrm + bet_ref[...])        # (Cout, 4*HW)
        for p in range(4):
            o_ref[0, p] = (ycat[:, p * HW:(p + 1) * HW]
                           + s2[p * Cout:(p + 1) * Cout])

    # ---------------------------- VMEM budget / specs -------------------------------
    F32 = 4
    w_bytes = (w12.size + b12.size + cw3.size + b3c.size +
               gammac.size + betac.size) * F32
    io_bytes = (Cin * HW + 4 * Cout * HW) * F32 * 2       # double-buffered in/out blocks
    scratch_bytes = CMAX * (2 * PAD + HW) * F32
    vmem_limit = int(min(64 * 2 ** 20,
                         max(2 * (2 * w_bytes + io_bytes + scratch_bytes),
                             32 * 2 ** 20)))

    def build_call(single_buffer_weights):
        buffered = getattr(pl, "Buffered", None)
        use_pm = single_buffer_weights and buffered is not None

        def const_spec(shape):
            nd = len(shape)
            idx = lambda b, _nd=nd: (0,) * _nd
            if use_pm:
                # constant index_map across the grid -> single buffer is enough
                return pl.BlockSpec(shape, idx, pipeline_mode=buffered(1))
            return pl.BlockSpec(shape, idx)

        grid_spec = pltpu.PrefetchScalarGridSpec(
            num_scalar_prefetch=0,
            grid=(B,),
            in_specs=[pl.BlockSpec((1, Cin, HW), lambda b: (b, 0, 0)),
                      const_spec((9, OC, Cin)), const_spec((OC, 1)),
                      const_spec((4, Cout, 4 * C4)), const_spec((Cout, 1)),
                      const_spec((Cout, Cout)), const_spec((Cout, 1))],
            out_specs=pl.BlockSpec((1, 4, Cout, HW), lambda b: (b, 0, 0, 0)),
            scratch_shapes=[pltpu.VMEM((CMAX, PAD + HW + PAD), jnp.float32)],
        )
        return pl.pallas_call(
            kernel,
            out_shape=jax.ShapeDtypeStruct((B, 4, Cout, HW), jnp.float32),
            grid_spec=grid_spec,
            compiler_params=pltpu.CompilerParams(
                dimension_semantics=("parallel",),
                vmem_limit_bytes=vmem_limit),
        )

    args = (x_flat, jnp.asarray(w12), jnp.asarray(b12), jnp.asarray(cw3),
            jnp.asarray(b3c), jnp.asarray(gammac), jnp.asarray(betac))
    try:
        out = build_call(True)(*args)
    except Exception:
        # pl.Buffered(1) not supported by this JAX build -> default buffering.
        out = build_call(False)(*args)

    # Final PixelShuffle interleave of the polyphase output: pure layout, done in
    # the wrapper.  When this block feeds another kernel, keep the polyphase
    # (B, 4, Cout, H*W) layout and fold the interleave into the consumer instead.
    out = out.reshape(B, 2, 2, Cout, H, Wsp)
    out = jnp.transpose(out, (0, 3, 4, 1, 5, 2))
    return out.reshape(B, Cout, 2 * H, 2 * Wsp)


def init_params(key, in_ch, out_ch):
    C4 = out_ch * R * R
    ks = jax.random.split(key, 8)
    s = 0.2
    W1 = s * jax.random.normal(ks[0], (C4, in_ch, 3, 3), jnp.float32)
    b1 = s * jax.random.normal(ks[1], (C4,), jnp.float32)
    W3 = s * jax.random.normal(ks[2], (out_ch, out_ch, 3, 3), jnp.float32)
    b3 = s * jax.random.normal(ks[3], (out_ch,), jnp.float32)
    # GDN params are constrained non-negative by NonNegativeParametrizer in the
    # PyTorch module (a training-time reparam); supply already-non-negative values.
    gamma = 0.05 * jax.random.uniform(ks[4], (out_ch, out_ch), jnp.float32) \
        + 0.1 * jnp.eye(out_ch, dtype=jnp.float32)
    beta = 1.0 + 0.1 * jax.random.uniform(ks[5], (out_ch,), jnp.float32)
    W2 = s * jax.random.normal(ks[6], (C4, in_ch, 3, 3), jnp.float32)
    b2 = s * jax.random.normal(ks[7], (C4,), jnp.float32)
    return (W1, b1, W3, b3, gamma, beta, W2, b2)


def reference(x, params):
    # Pure-JAX reference mirroring the PyTorch forward (no Pallas).
    W1, b1, W3, b3, gamma, beta, W2, b2 = params
    prec = jax.lax.Precision.HIGHEST

    def conv3x3(t, w, b):
        y = jax.lax.conv_general_dilated(
            t, w, window_strides=(1, 1), padding=((1, 1), (1, 1)),
            dimension_numbers=('NCHW', 'OIHW', 'NCHW'), precision=prec)
        return y + b[None, :, None, None]

    def pixel_shuffle(t):
        Bs, C, Hs, Ws = t.shape
        Co = C // (R * R)
        t = t.reshape(Bs, Co, R, R, Hs, Ws)
        t = jnp.transpose(t, (0, 1, 4, 2, 5, 3))
        return t.reshape(Bs, Co, Hs * R, Ws * R)

    out = pixel_shuffle(conv3x3(x, W1, b1))
    out = _gelu(out)
    out = conv3x3(out, W3, b3)
    nrm = jnp.einsum('oc,bchw->bohw', gamma, out * out, precision=prec)
    out = out * jnp.sqrt(nrm + beta[None, :, None, None])
    identity = pixel_shuffle(conv3x3(x, W2, b2))
    return out + identity


if __name__ == "__main__":
    B, Cin, Cout, H, W = 2, 4, 4, 16, 16
    key = jax.random.PRNGKey(0)
    kx, kp = jax.random.split(key)
    x = jax.random.normal(kx, (B, Cin, H, W), dtype=jnp.float32)
    params = init_params(kp, Cin, Cout)

    out = residual_block_upsample(x, params)
    jax.block_until_ready(out)
    assert out.shape == (B, Cout, 2 * H, 2 * W), out.shape

    ref = reference(x, params)
    err = float(jnp.max(jnp.abs(out - ref)))
    assert jnp.allclose(out, ref, atol=2e-3, rtol=2e-3), \
        f"mismatch vs reference (max abs err {err})"
    print("KERNEL_OK")
</pallas_src>

<mosaic_0001>
module attributes {stable_mosaic.version = 11 : i64} {
  func.func @kernel(%arg0: i32, %arg1: memref<1x4x256xf32, #tpu.memory_space<vmem>>, %arg2: memref<9x32x4xf32, #tpu.memory_space<vmem>>, %arg3: memref<32x1xf32, #tpu.memory_space<vmem>>, %arg4: memref<4x4x64xf32, #tpu.memory_space<vmem>>, %arg5: memref<4x1xf32, #tpu.memory_space<vmem>>, %arg6: memref<4x4xf32, #tpu.memory_space<vmem>>, %arg7: memref<4x1xf32, #tpu.memory_space<vmem>>, %arg8: memref<1x4x4x256xf32, #tpu.memory_space<vmem>>, %arg9: memref<16x512xf32, #tpu.memory_space<vmem>>) attributes {dimension_semantics = [#tpu.dimension_semantics<parallel>], iteration_bounds = array<i64: 2>, scalar_prefetch = 0 : i64, scratch_operands = 1 : i64, tpu.core_type = #tpu.core_type<tc>, window_params = [{transform_indices = @transform_0, window_bounds = array<i64: 1, 4, 256>}, {pipeline_mode = #tpu.pipeline_mode<synchronous>, transform_indices = @transform_1, window_bounds = array<i64: 9, 32, 4>}, {pipeline_mode = #tpu.pipeline_mode<synchronous>, transform_indices = @transform_2, window_bounds = array<i64: 32, 1>}, {pipeline_mode = #tpu.pipeline_mode<synchronous>, transform_indices = @transform_3, window_bounds = array<i64: 4, 4, 64>}, {pipeline_mode = #tpu.pipeline_mode<synchronous>, transform_indices = @transform_4, window_bounds = array<i64: 4, 1>}, {pipeline_mode = #tpu.pipeline_mode<synchronous>, transform_indices = @transform_5, window_bounds = array<i64: 4, 4>}, {pipeline_mode = #tpu.pipeline_mode<synchronous>, transform_indices = @transform_6, window_bounds = array<i64: 4, 1>}, {transform_indices = @transform_7, window_bounds = array<i64: 1, 4, 4, 256>}]} {
    %cst = arith.constant 0.000000e+00 : f32
    %0 = vector.broadcast %cst : f32 to vector<16x128xf32>
    %c0 = arith.constant 0 : index
    %c0_0 = arith.constant 0 : index
    %1 = vector.load %arg9[%c0, %c0_0] : memref<16x512xf32, #tpu.memory_space<vmem>>, vector<16x128xf32>
    tpu.vector_store %arg9[%c0, %c0_0], %0 {strides = array<i32>} : memref<16x512xf32, #tpu.memory_space<vmem>>, vector<16x128xf32>,
    %cst_1 = arith.constant 0.000000e+00 : f32
    %2 = vector.broadcast %cst_1 : f32 to vector<16x128xf32>
    %c0_2 = arith.constant 0 : index
    %c384 = arith.constant 384 : index
    %3 = vector.load %arg9[%c0_2, %c384] : memref<16x512xf32, #tpu.memory_space<vmem>>, vector<16x128xf32>
    tpu.vector_store %arg9[%c0_2, %c384], %2 {strides = array<i32>} : memref<16x512xf32, #tpu.memory_space<vmem>>, vector<16x128xf32>,
    %4 = tpu.iota {dimensions = array<i32: 1>} : vector<1x256xi32>
    %c16_i32 = arith.constant 16 : i32
    %c0_i32 = arith.constant 0 : i32
    %5 = arith.cmpi eq, %c16_i32, %c0_i32 : i32
    %c1_i32 = arith.constant 1 : i32
    %6 = arith.select %5, %c1_i32, %c16_i32 : i32
    %7 = vector.broadcast %6 : i32 to vector<1x256xi32>
    %8 = arith.remsi %4, %7 : vector<1x256xi32>
    %c0_i32_3 = arith.constant 0 : i32
    %9 = vector.broadcast %c0_i32_3 : i32 to vector<1x256xi32>
    %10 = arith.cmpi ne, %8, %9 : vector<1x256xi32>
    %c0_i32_4 = arith.constant 0 : i32
    %11 = vector.broadcast %c0_i32_4 : i32 to vector<1x256xi32>
    %12 = arith.cmpi slt, %8, %11 : vector<1x256xi32>
    %c0_i32_5 = arith.constant 0 : i32
    %13 = arith.cmpi slt, %6, %c0_i32_5 : i32
    %14 = vector.broadcast %13 : i1 to vector<1x256xi1>
    %15 = vector.broadcast %14 : vector<1x256xi1> to vector<1x256xi1>
    %16 = arith.xori %12, %15 : vector<1x256xi1>
    %17 = arith.andi %16, %10 : vector<1x256xi1>
    %18 = vector.broadcast %6 : i32 to vector<1x256xi32>
    %19 = arith.addi %8, %18 : vector<1x256xi32>
    %20 = arith.select %17, %19, %8 : vector<1x256xi1>, vector<1x256xi32>
    %c15_i32 = arith.constant 15 : i32
    %21 = vector.broadcast %c15_i32 : i32 to vector<1x256xi32>
    %22 = arith.cmpi slt, %20, %21 : vector<1x256xi32>
    %c1_i32_6 = arith.constant 1 : i32
    %23 = vector.broadcast %c1_i32_6 : i32 to vector<1x256xi32>
    %24 = arith.cmpi sge, %20, %23 : vector<1x256xi32>
    %c0_7 = arith.constant 0 : index
    %c0_8 = arith.constant 0 : index
    %c0_9 = arith.constant 0 : index
    %25 = vector.load %arg1[%c0_7, %c0_8, %c0_9] : memref<1x4x256xf32, #tpu.memory_space<vmem>>, vector<1x4x256xf32>
    %26 = vector.shape_cast %25 : vector<1x4x256xf32> to vector<4x256xf32>
    %c0_10 = arith.constant 0 : index
    %c128 = arith.constant 128 : index
    %27 = vector.load %arg9[%c0_10, %c128] : memref<16x512xf32, #tpu.memory_space<vmem>>, vector<4x256xf32>
    tpu.vector_store %arg9[%c0_10, %c128], %26 {strides = array<i32>} : memref<16x512xf32, #tpu.memory_space<vmem>>, vector<4x256xf32>,
    %c0_11 = arith.constant 0 : index
    %c111 = arith.constant 111 : index
    %28 = vector.load %arg9[%c0_11, %c111] : memref<16x512xf32, #tpu.memory_space<vmem>>, vector<4x256xf32>
    %cst_12 = arith.constant 0.000000e+00 : f32
    %29 = vector.shape_cast %24 : vector<1x256xi1> to vector<1x256xi1>
    %30 = vector.broadcast %29 : vector<1x256xi1> to vector<4x256xi1>
    %31 = vector.broadcast %cst_12 : f32 to vector<4x256xf32>
    %32 = arith.select %30, %28, %31 : vector<4x256xi1>, vector<4x256xf32>
    %c0_13 = arith.constant 0 : index
    %c0_14 = arith.constant 0 : index
    %c0_15 = arith.constant 0 : index
    %33 = vector.load %arg2[%c0_13, %c0_14, %c0_15] : memref<9x32x4xf32, #tpu.memory_space<vmem>>, vector<1x32x4xf32>
    %34 = vector.shape_cast %33 : vector<1x32x4xf32> to vector<32x4xf32>
    %cst_16 = arith.constant dense<0.000000e+00> : vector<32x256xf32>
    %35 = tpu.matmul %34, %32, %cst_16 {dimension_numbers = #tpu.dot_dimension_numbers<[1], [0], [0], [1], [0, 0, 1, 1], [], []>} : vector<32x4xf32>, vector<4x256xf32>, vector<32x256xf32> -> vector<32x256xf32>
    %c0_17 = arith.constant 0 : index
    %c112 = arith.constant 112 : index
    %36 = vector.load %arg9[%c0_17, %c112] : memref<16x512xf32, #tpu.memory_space<vmem>>, vector<4x256xf32>
    %c1 = arith.constant 1 : index
    %c0_18 = arith.constant 0 : index
    %c0_19 = arith.constant 0 : index
    %37 = vector.load %arg2[%c1, %c0_18, %c0_19] : memref<9x32x4xf32, #tpu.memory_space<vmem>>, vector<1x32x4xf32>
    %38 = vector.shape_cast %37 : vector<1x32x4xf32> to vector<32x4xf32>
    %cst_20 = arith.constant dense<0.000000e+00> : vector<32x256xf32>
    %39 = tpu.matmul %38, %36, %cst_20 {dimension_numbers = #tpu.dot_dimension_numbers<[1], [0], [0], [1], [0, 0, 1, 1], [], []>} : vector<32x4xf32>, vector<4x256xf32>, vector<32x256xf32> -> vector<32x256xf32>
    %40 = arith.addf %35, %39 : vector<32x256xf32>
    %c0_21 = arith.constant 0 : index
    %c113 = arith.constant 113 : index
    %41 = vector.load %arg9[%c0_21, %c113] : memref<16x512xf32, #tpu.memory_space<vmem>>, vector<4x256xf32>
    %cst_22 = arith.constant 0.000000e+00 : f32
    %42 = vector.shape_cast %22 : vector<1x256xi1> to vector<1x256xi1>
    %43 = vector.broadcast %42 : vector<1x256xi1> to vector<4x256xi1>
    %44 = vector.broadcast %cst_22 : f32 to vector<4x256xf32>
    %45 = arith.select %43, %41, %44 : vector<4x256xi1>, vector<4x256xf32>
    %c2 = arith.constant 2 : index
    %c0_23 = arith.constant 0 : index
    %c0_24 = arith.constant 0 : index
    %46 = vector.load %arg2[%c2, %c0_23, %c0_24] : memref<9x32x4xf32, #tpu.memory_space<vmem>>, vector<1x32x4xf32>
    %47 = vector.shape_cast %46 : vector<1x32x4xf32> to vector<32x4xf32>
    %cst_25 = arith.constant dense<0.000000e+00> : vector<32x256xf32>
    %48 = tpu.matmul %47, %45, %cst_25 {dimension_numbers = #tpu.dot_dimension_numbers<[1], [0], [0], [1], [0, 0, 1, 1], [], []>} : vector<32x4xf32>, vector<4x256xf32>, vector<32x256xf32> -> vector<32x256xf32>
    %49 = arith.addf %40, %48 : vector<32x256xf32>
    %c0_26 = arith.constant 0 : index
    %c127 = arith.constant 127 : index
    %50 = vector.load %arg9[%c0_26, %c127] : memref<16x512xf32, #tpu.memory_space<vmem>>, vector<4x256xf32>
    %cst_27 = arith.constant 0.000000e+00 : f32
    %51 = vector.shape_cast %24 : vector<1x256xi1> to vector<1x256xi1>
    %52 = vector.broadcast %51 : vector<1x256xi1> to vector<4x256xi1>
    %53 = vector.broadcast %cst_27 : f32 to vector<4x256xf32>
    %54 = arith.select %52, %50, %53 : vector<4x256xi1>, vector<4x256xf32>
    %c3 = arith.constant 3 : index
    %c0_28 = arith.constant 0 : index
    %c0_29 = arith.constant 0 : index
    %55 = vector.load %arg2[%c3, %c0_28, %c0_29] : memref<9x32x4xf32, #tpu.memory_space<vmem>>, vector<1x32x4xf32>
    %56 = vector.shape_cast %55 : vector<1x32x4xf32> to vector<32x4xf32>
    %cst_30 = arith.constant dense<0.000000e+00> : vector<32x256xf32>
    %57 = tpu.matmul %56, %54, %cst_30 {dimension_numbers = #tpu.dot_dimension_numbers<[1], [0], [0], [1], [0, 0, 1, 1], [], []>} : vector<32x4xf32>, vector<4x256xf32>, vector<32x256xf32> -> vector<32x256xf32>
    %58 = arith.addf %49, %57 : vector<32x256xf32>
    %c0_31 = arith.constant 0 : index
    %c128_32 = arith.constant 128 : index
    %59 = vector.load %arg9[%c0_31, %c128_32] : memref<16x512xf32, #tpu.memory_space<vmem>>, vector<4x256xf32>
    %c4 = arith.constant 4 : index
    %c0_33 = arith.constant 0 : index
    %c0_34 = arith.constant 0 : index
    %60 = vector.load %arg2[%c4, %c0_33, %c0_34] : memref<9x32x4xf32, #tpu.memory_space<vmem>>, vector<1x32x4xf32>
    %61 = vector.shape_cast %60 : vector<1x32x4xf32> to vector<32x4xf32>
    %cst_35 = arith.constant dense<0.000000e+00> : vector<32x256xf32>
    %62 = tpu.matmul %61, %59, %cst_35 {dimension_numbers = #tpu.dot_dimension_numbers<[1], [0], [0], [1], [0, 0, 1, 1], [], []>} : vector<32x4xf32>, vector<4x256xf32>, vector<32x256xf32> -> vector<32x256xf32>
    %63 = arith.addf %58, %62 : vector<32x256xf32>
    %c0_36 = arith.constant 0 : index
    %c129 = arith.constant 129 : index
    %64 = vector.load %arg9[%c0_36, %c129] : memref<16x512xf32, #tpu.memory_space<vmem>>, vector<4x256xf32>
    %cst_37 = arith.constant 0.000000e+00 : f32
    %65 = vector.shape_cast %22 : vector<1x256xi1> to vector<1x256xi1>
    %66 = vector.broadcast %65 : vector<1x256xi1> to vector<4x256xi1>
    %67 = vector.broadcast %cst_37 : f32 to vector<4x256xf32>
    %68 = arith.select %66, %64, %67 : vector<4x256xi1>, vector<4x256xf32>
    %c5 = arith.constant 5 : index
    %c0_38 = arith.constant 0 : index
    %c0_39 = arith.constant 0 : index
    %69 = vector.load %arg2[%c5, %c0_38, %c0_39] : memref<9x32x4xf32, #tpu.memory_space<vmem>>, vector<1x32x4xf32>
    %70 = vector.shape_cast %69 : vector<1x32x4xf32> to vector<32x4xf32>
    %cst_40 = arith.constant dense<0.000000e+00> : vector<32x256xf32>
    %71 = tpu.matmul %70, %68, %cst_40 {dimension_numbers = #tpu.dot_dimension_numbers<[1], [0], [0], [1], [0, 0, 1, 1], [], []>} : vector<32x4xf32>, vector<4x256xf32>, vector<32x256xf32> -> vector<32x256xf32>
    %72 = arith.addf %63, %71 : vector<32x256xf32>
    %c0_41 = arith.constant 0 : index
    %c143 = arith.constant 143 : index
    %73 = vector.load %arg9[%c0_41, %c143] : memref<16x512xf32, #tpu.memory_space<vmem>>, vector<4x256xf32>
    %cst_42 = arith.constant 0.000000e+00 : f32
    %74 = vector.shape_cast %24 : vector<1x256xi1> to vector<1x256xi1>
    %75 = vector.broadcast %74 : vector<1x256xi1> to vector<4x256xi1>
    %76 = vector.broadcast %cst_42 : f32 to vector<4x256xf32>
    %77 = arith.select %75, %73, %76 : vector<4x256xi1>, vector<4x256xf32>
    %c6 = arith.constant 6 : index
    %c0_43 = arith.constant 0 : index
    %c0_44 = arith.constant 0 : index
    %78 = vector.load %arg2[%c6, %c0_43, %c0_44] : memref<9x32x4xf32, #tpu.memory_space<vmem>>, vector<1x32x4xf32>
    %79 = vector.shape_cast %78 : vector<1x32x4xf32> to vector<32x4xf32>
    %cst_45 = arith.constant dense<0.000000e+00> : vector<32x256xf32>
    %80 = tpu.matmul %79, %77, %cst_45 {dimension_numbers = #tpu.dot_dimension_numbers<[1], [0], [0], [1], [0, 0, 1, 1], [], []>} : vector<32x4xf32>, vector<4x256xf32>, vector<32x256xf32> -> vector<32x256xf32>
    %81 = arith.addf %72, %80 : vector<32x256xf32>
    %c0_46 = arith.constant 0 : index
    %c144 = arith.constant 144 : index
    %82 = vector.load %arg9[%c0_46, %c144] : memref<16x512xf32, #tpu.memory_space<vmem>>, vector<4x256xf32>
    %c7 = arith.constant 7 : index
    %c0_47 = arith.constant 0 : index
    %c0_48 = arith.constant 0 : index
    %83 = vector.load %arg2[%c7, %c0_47, %c0_48] : memref<9x32x4xf32, #tpu.memory_space<vmem>>, vector<1x32x4xf32>
    %84 = vector.shape_cast %83 : vector<1x32x4xf32> to vector<32x4xf32>
    %cst_49 = arith.constant dense<0.000000e+00> : vector<32x256xf32>
    %85 = tpu.matmul %84, %82, %cst_49 {dimension_numbers = #tpu.dot_dimension_numbers<[1], [0], [0], [1], [0, 0, 1, 1], [], []>} : vector<32x4xf32>, vector<4x256xf32>, vector<32x256xf32> -> vector<32x256xf32>
    %86 = arith.addf %81, %85 : vector<32x256xf32>
    %c0_50 = arith.constant 0 : index
    %c145 = arith.constant 145 : index
    %87 = vector.load %arg9[%c0_50, %c145] : memref<16x512xf32, #tpu.memory_space<vmem>>, vector<4x256xf32>
    %cst_51 = arith.constant 0.000000e+00 : f32
    %88 = vector.shape_cast %22 : vector<1x256xi1> to vector<1x256xi1>
    %89 = vector.broadcast %88 : vector<1x256xi1> to vector<4x256xi1>
    %90 = vector.broadcast %cst_51 : f32 to vector<4x256xf32>
    %91 = arith.select %89, %87, %90 : vector<4x256xi1>, vector<4x256xf32>
    %c8 = arith.constant 8 : index
    %c0_52 = arith.constant 0 : index
    %c0_53 = arith.constant 0 : index
    %92 = vector.load %arg2[%c8, %c0_52, %c0_53] : memref<9x32x4xf32, #tpu.memory_space<vmem>>, vector<1x32x4xf32>
    %93 = vector.shape_cast %92 : vector<1x32x4xf32> to vector<32x4xf32>
    %cst_54 = arith.constant dense<0.000000e+00> : vector<32x256xf32>
    %94 = tpu.matmul %93, %91, %cst_54 {dimension_numbers = #tpu.dot_dimension_numbers<[1], [0], [0], [1], [0, 0, 1, 1], [], []>} : vector<32x4xf32>, vector<4x256xf32>, vector<32x256xf32> -> vector<32x256xf32>
    %95 = arith.addf %86, %94 : vector<32x256xf32>
    %c0_55 = arith.constant 0 : index
    %c0_56 = arith.constant 0 : index
    %96 = vector.load %arg3[%c0_55, %c0_56] : memref<32x1xf32, #tpu.memory_space<vmem>>, vector<32x1xf32>
    %97 = vector.broadcast %96 : vector<32x1xf32> to vector<32x256xf32>
    %98 = arith.addf %95, %97 : vector<32x256xf32>
    %99 = vector.extract_strided_slice %98 {offsets = [0, 0], sizes = [16, 256], strides = [1, 1]} : vector<32x256xf32> to vector<16x256xf32>
    %cst_57 = arith.constant 5.000000e-01 : f32
    %100 = vector.broadcast %cst_57 : f32 to vector<16x256xf32>
    %101 = arith.mulf %100, %99 : vector<16x256xf32>
    %cst_58 = arith.constant 0.707106769 : f32
    %102 = vector.broadcast %cst_58 : f32 to vector<16x256xf32>
    %103 = arith.mulf %99, %102 : vector<16x256xf32>
    %104 = math.erf %103 : vector<16x256xf32>
    %cst_59 = arith.constant 1.000000e+00 : f32
    %105 = vector.broadcast %cst_59 : f32 to vector<16x256xf32>
    %106 = arith.addf %105, %104 : vector<16x256xf32>
    %107 = arith.mulf %101, %106 : vector<16x256xf32>
    %108 = vector.extract_strided_slice %98 {offsets = [16, 0], sizes = [16, 256], strides = [1, 1]} : vector<32x256xf32> to vector<16x256xf32>
    %c0_60 = arith.constant 0 : index
    %c128_61 = arith.constant 128 : index
    %109 = vector.load %arg9[%c0_60, %c128_61] : memref<16x512xf32, #tpu.memory_space<vmem>>, vector<16x256xf32>
    tpu.vector_store %arg9[%c0_60, %c128_61], %107 {strides = array<i32>} : memref<16x512xf32, #tpu.memory_space<vmem>>, vector<16x256xf32>,
    %c0_62 = arith.constant 0 : index
    %c111_63 = arith.constant 111 : index
    %110 = vector.load %arg9[%c0_62, %c111_63] : memref<16x512xf32, #tpu.memory_space<vmem>>, vector<16x256xf32>
    %cst_64 = arith.constant 0.000000e+00 : f32
    %111 = vector.shape_cast %24 : vector<1x256xi1> to vector<1x256xi1>
    %112 = vector.broadcast %111 : vector<1x256xi1> to vector<16x256xi1>
    %113 = vector.broadcast %cst_64 : f32 to vector<16x256xf32>
    %114 = arith.select %112, %110, %113 : vector<16x256xi1>, vector<16x256xf32>
    %c0_65 = arith.constant 0 : index
    %c112_66 = arith.constant 112 : index
    %115 = vector.load %arg9[%c0_65, %c112_66] : memref<16x512xf32, #tpu.memory_space<vmem>>, vector<16x256xf32>
    %c0_67 = arith.constant 0 : index
    %c127_68 = arith.constant 127 : index
    %116 = vector.load %arg9[%c0_67, %c127_68] : memref<16x512xf32, #tpu.memory_space<vmem>>, vector<16x256xf32>
    %cst_69 = arith.constant 0.000000e+00 : f32
    %117 = vector.shape_cast %24 : vector<1x256xi1> to vector<1x256xi1>
    %118 = vector.broadcast %117 : vector<1x256xi1> to vector<16x256xi1>
    %119 = vector.broadcast %cst_69 : f32 to vector<16x256xf32>
    %120 = arith.select %118, %116, %119 : vector<16x256xi1>, vector<16x256xf32>
    %c0_70 = arith.constant 0 : index
    %c128_71 = arith.constant 128 : index
    %121 = vector.load %arg9[%c0_70, %c128_71] : memref<16x512xf32, #tpu.memory_space<vmem>>, vector<16x256xf32>
    %122 = tpu.concatenate %114, %115, %120, %121 in 0 : vector<16x256xf32>, vector<16x256xf32>, vector<16x256xf32>, vector<16x256xf32> -> vector<64x256xf32>
    %c0_72 = arith.constant 0 : index
    %c0_73 = arith.constant 0 : index
    %c0_74 = arith.constant 0 : index
    %123 = vector.load %arg4[%c0_72, %c0_73, %c0_74] : memref<4x4x64xf32, #tpu.memory_space<vmem>>, vector<1x4x64xf32>
    %124 = vector.shape_cast %123 : vector<1x4x64xf32> to vector<4x64xf32>
    %cst_75 = arith.constant dense<0.000000e+00> : vector<4x256xf32>
    %125 = tpu.matmul %124, %122, %cst_75 {dimension_numbers = #tpu.dot_dimension_numbers<[1], [0], [0], [1], [0, 0, 1, 1], [], []>} : vector<4x64xf32>, vector<64x256xf32>, vector<4x256xf32> -> vector<4x256xf32>
    %c0_76 = arith.constant 0 : index
    %c0_77 = arith.constant 0 : index
    %126 = vector.load %arg5[%c0_76, %c0_77] : memref<4x1xf32, #tpu.memory_space<vmem>>, vector<4x1xf32>
    %127 = vector.broadcast %126 : vector<4x1xf32> to vector<4x256xf32>
    %128 = arith.addf %125, %127 : vector<4x256xf32>
    %c0_78 = arith.constant 0 : index
    %c112_79 = arith.constant 112 : index
    %129 = vector.load %arg9[%c0_78, %c112_79] : memref<16x512xf32, #tpu.memory_space<vmem>>, vector<16x256xf32>
    %c0_80 = arith.constant 0 : index
    %c113_81 = arith.constant 113 : index
    %130 = vector.load %arg9[%c0_80, %c113_81] : memref<16x512xf32, #tpu.memory_space<vmem>>, vector<16x256xf32>
    %cst_82 = arith.constant 0.000000e+00 : f32
    %131 = vector.shape_cast %22 : vector<1x256xi1> to vector<1x256xi1>
    %132 = vector.broadcast %131 : vector<1x256xi1> to vector<16x256xi1>
    %133 = vector.broadcast %cst_82 : f32 to vector<16x256xf32>
    %134 = arith.select %132, %130, %133 : vector<16x256xi1>, vector<16x256xf32>
    %c0_83 = arith.constant 0 : index
    %c128_84 = arith.constant 128 : index
    %135 = vector.load %arg9[%c0_83, %c128_84] : memref<16x512xf32, #tpu.memory_space<vmem>>, vector<16x256xf32>
    %c0_85 = arith.constant 0 : index
    %c129_86 = arith.constant 129 : index
    %136 = vector.load %arg9[%c0_85, %c129_86] : memref<16x512xf32, #tpu.memory_space<vmem>>, vector<16x256xf32>
    %cst_87 = arith.constant 0.000000e+00 : f32
    %137 = vector.shape_cast %22 : vector<1x256xi1> to vector<1x256xi1>
    %138 = vector.broadcast %137 : vector<1x256xi1> to vector<16x256xi1>
    %139 = vector.broadcast %cst_87 : f32 to vector<16x256xf32>
    %140 = arith.select %138, %136, %139 : vector<16x256xi1>, vector<16x256xf32>
    %141 = tpu.concatenate %129, %134, %135, %140 in 0 : vector<16x256xf32>, vector<16x256xf32>, vector<16x256xf32>, vector<16x256xf32> -> vector<64x256xf32>
    %c1_88 = arith.constant 1 : index
    %c0_89 = arith.constant 0 : index
    %c0_90 = arith.constant 0 : index
    %142 = vector.load %arg4[%c1_88, %c0_89, %c0_90] : memref<4x4x64xf32, #tpu.memory_space<vmem>>, vector<1x4x64xf32>
    %143 = vector.shape_cast %142 : vector<1x4x64xf32> to vector<4x64xf32>
    %cst_91 = arith.constant dense<0.000000e+00> : vector<4x256xf32>
    %144 = tpu.matmul %143, %141, %cst_91 {dimension_numbers = #tpu.dot_dimension_numbers<[1], [0], [0], [1], [0, 0, 1, 1], [], []>} : vector<4x64xf32>, vector<64x256xf32>, vector<4x256xf32> -> vector<4x256xf32>
    %c0_92 = arith.constant 0 : index
    %c0_93 = arith.constant 0 : index
    %145 = vector.load %arg5[%c0_92, %c0_93] : memref<4x1xf32, #tpu.memory_space<vmem>>, vector<4x1xf32>
    %146 = vector.broadcast %145 : vector<4x1xf32> to vector<4x256xf32>
    %147 = arith.addf %144, %146 : vector<4x256xf32>
    %c0_94 = arith.constant 0 : index
    %c127_95 = arith.constant 127 : index
    %148 = vector.load %arg9[%c0_94, %c127_95] : memref<16x512xf32, #tpu.memory_space<vmem>>, vector<16x256xf32>
    %cst_96 = arith.constant 0.000000e+00 : f32
    %149 = vector.shape_cast %24 : vector<1x256xi1> to vector<1x256xi1>
    %150 = vector.broadcast %149 : vector<1x256xi1> to vector<16x256xi1>
    %151 = vector.broadcast %cst_96 : f32 to vector<16x256xf32>
    %152 = arith.select %150, %148, %151 : vector<16x256xi1>, vector<16x256xf32>
    %c0_97 = arith.constant 0 : index
    %c128_98 = arith.constant 128 : index
    %153 = vector.load %arg9[%c0_97, %c128_98] : memref<16x512xf32, #tpu.memory_space<vmem>>, vector<16x256xf32>
    %c0_99 = arith.constant 0 : index
    %c143_100 = arith.constant 143 : index
    %154 = vector.load %arg9[%c0_99, %c143_100] : memref<16x512xf32, #tpu.memory_space<vmem>>, vector<16x256xf32>
    %cst_101 = arith.constant 0.000000e+00 : f32
    %155 = vector.shape_cast %24 : vector<1x256xi1> to vector<1x256xi1>
    %156 = vector.broadcast %155 : vector<1x256xi1> to vector<16x256xi1>
    %157 = vector.broadcast %cst_101 : f32 to vector<16x256xf32>
    %158 = arith.select %156, %154, %157 : vector<16x256xi1>, vector<16x256xf32>
    %c0_102 = arith.constant 0 : index
    %c144_103 = arith.constant 144 : index
    %159 = vector.load %arg9[%c0_102, %c144_103] : memref<16x512xf32, #tpu.memory_space<vmem>>, vector<16x256xf32>
    %160 = tpu.concatenate %152, %153, %158, %159 in 0 : vector<16x256xf32>, vector<16x256xf32>, vector<16x256xf32>, vector<16x256xf32> -> vector<64x256xf32>
    %c2_104 = arith.constant 2 : index
    %c0_105 = arith.constant 0 : index
    %c0_106 = arith.constant 0 : index
    %161 = vector.load %arg4[%c2_104, %c0_105, %c0_106] : memref<4x4x64xf32, #tpu.memory_space<vmem>>, vector<1x4x64xf32>
    %162 = vector.shape_cast %161 : vector<1x4x64xf32> to vector<4x64xf32>
    %cst_107 = arith.constant dense<0.000000e+00> : vector<4x256xf32>
    %163 = tpu.matmul %162, %160, %cst_107 {dimension_numbers = #tpu.dot_dimension_numbers<[1], [0], [0], [1], [0, 0, 1, 1], [], []>} : vector<4x64xf32>, vector<64x256xf32>, vector<4x256xf32> -> vector<4x256xf32>
    %c0_108 = arith.constant 0 : index
    %c0_109 = arith.constant 0 : index
    %164 = vector.load %arg5[%c0_108, %c0_109] : memref<4x1xf32, #tpu.memory_space<vmem>>, vector<4x1xf32>
    %165 = vector.broadcast %164 : vector<4x1xf32> to vector<4x256xf32>
    %166 = arith.addf %163, %165 : vector<4x256xf32>
    %c0_110 = arith.constant 0 : index
    %c128_111 = arith.constant 128 : index
    %167 = vector.load %arg9[%c0_110, %c128_111] : memref<16x512xf32, #tpu.memory_space<vmem>>, vector<16x256xf32>
    %c0_112 = arith.constant 0 : index
    %c129_113 = arith.constant 129 : index
    %168 = vector.load %arg9[%c0_112, %c129_113] : memref<16x512xf32, #tpu.memory_space<vmem>>, vector<16x256xf32>
    %cst_114 = arith.constant 0.000000e+00 : f32
    %169 = vector.shape_cast %22 : vector<1x256xi1> to vector<1x256xi1>
    %170 = vector.broadcast %169 : vector<1x256xi1> to vector<16x256xi1>
    %171 = vector.broadcast %cst_114 : f32 to vector<16x256xf32>
    %172 = arith.select %170, %168, %171 : vector<16x256xi1>, vector<16x256xf32>
    %c0_115 = arith.constant 0 : index
    %c144_116 = arith.constant 144 : index
    %173 = vector.load %arg9[%c0_115, %c144_116] : memref<16x512xf32, #tpu.memory_space<vmem>>, vector<16x256xf32>
    %c0_117 = arith.constant 0 : index
    %c145_118 = arith.constant 145 : index
    %174 = vector.load %arg9[%c0_117, %c145_118] : memref<16x512xf32, #tpu.memory_space<vmem>>, vector<16x256xf32>
    %cst_119 = arith.constant 0.000000e+00 : f32
    %175 = vector.shape_cast %22 : vector<1x256xi1> to vector<1x256xi1>
    %176 = vector.broadcast %175 : vector<1x256xi1> to vector<16x256xi1>
    %177 = vector.broadcast %cst_119 : f32 to vector<16x256xf32>
    %178 = arith.select %176, %174, %177 : vector<16x256xi1>, vector<16x256xf32>
    %179 = tpu.concatenate %167, %172, %173, %178 in 0 : vector<16x256xf32>, vector<16x256xf32>, vector<16x256xf32>, vector<16x256xf32> -> vector<64x256xf32>
    %c3_120 = arith.constant 3 : index
    %c0_121 = arith.constant 0 : index
    %c0_122 = arith.constant 0 : index
    %180 = vector.load %arg4[%c3_120, %c0_121, %c0_122] : memref<4x4x64xf32, #tpu.memory_space<vmem>>, vector<1x4x64xf32>
    %181 = vector.shape_cast %180 : vector<1x4x64xf32> to vector<4x64xf32>
    %cst_123 = arith.constant dense<0.000000e+00> : vector<4x256xf32>
    %182 = tpu.matmul %181, %179, %cst_123 {dimension_numbers = #tpu.dot_dimension_numbers<[1], [0], [0], [1], [0, 0, 1, 1], [], []>} : vector<4x64xf32>, vector<64x256xf32>, vector<4x256xf32> -> vector<4x256xf32>
    %c0_124 = arith.constant 0 : index
    %c0_125 = arith.constant 0 : index
    %183 = vector.load %arg5[%c0_124, %c0_125] : memref<4x1xf32, #tpu.memory_space<vmem>>, vector<4x1xf32>
    %184 = vector.broadcast %183 : vector<4x1xf32> to vector<4x256xf32>
    %185 = arith.addf %182, %184 : vector<4x256xf32>
    %186 = tpu.concatenate %128, %147, %166, %185 in 1 : vector<4x256xf32>, vector<4x256xf32>, vector<4x256xf32>, vector<4x256xf32> -> vector<4x1024xf32>
    %c0_126 = arith.constant 0 : index
    %c0_127 = arith.constant 0 : index
    %187 = vector.load %arg6[%c0_126, %c0_127] : memref<4x4xf32, #tpu.memory_space<vmem>>, vector<4x4xf32>
    %188 = arith.mulf %186, %186 : vector<4x1024xf32>
    %cst_128 = arith.constant dense<0.000000e+00> : vector<4x1024xf32>
    %189 = tpu.matmul %187, %188, %cst_128 {dimension_numbers = #tpu.dot_dimension_numbers<[1], [0], [0], [1], [0, 0, 1, 1], [], []>} : vector<4x4xf32>, vector<4x1024xf32>, vector<4x1024xf32> -> vector<4x1024xf32>
    %c0_129 = arith.constant 0 : index
    %c0_130 = arith.constant 0 : index
    %190 = vector.load %arg7[%c0_129, %c0_130] : memref<4x1xf32, #tpu.memory_space<vmem>>, vector<4x1xf32>
    %191 = vector.broadcast %190 : vector<4x1xf32> to vector<4x1024xf32>
    %192 = arith.addf %189, %191 : vector<4x1024xf32>
    %193 = math.sqrt %192 : vector<4x1024xf32>
    %194 = arith.mulf %186, %193 : vector<4x1024xf32>
    %195 = vector.extract_strided_slice %194 {offsets = [0, 0], sizes = [4, 256], strides = [1, 1]} : vector<4x1024xf32> to vector<4x256xf32>
    %196 = vector.extract_strided_slice %108 {offsets = [0, 0], sizes = [4, 256], strides = [1, 1]} : vector<16x256xf32> to vector<4x256xf32>
    %197 = arith.addf %195, %196 : vector<4x256xf32>
    %c0_131 = arith.constant 0 : index
    %c0_132 = arith.constant 0 : index
    %c0_133 = arith.constant 0 : index
    %c0_134 = arith.constant 0 : index
    %198 = vector.load %arg8[%c0_131, %c0_132, %c0_133, %c0_134] : memref<1x4x4x256xf32, #tpu.memory_space<vmem>>, vector<1x1x4x256xf32>
    %199 = vector.shape_cast %198 : vector<1x1x4x256xf32> to vector<4x256xf32>
    %200 = vector.shape_cast %197 : vector<4x256xf32> to vector<1x1x4x256xf32>
    tpu.vector_store %arg8[%c0_131, %c0_132, %c0_133, %c0_134], %200 {strides = array<i32>} : memref<1x4x4x256xf32, #tpu.memory_space<vmem>>, vector<1x1x4x256xf32>,
    %201 = vector.extract_strided_slice %194 {offsets = [0, 256], sizes = [4, 256], strides = [1, 1]} : vector<4x1024xf32> to vector<4x256xf32>
    %202 = vector.extract_strided_slice %108 {offsets = [4, 0], sizes = [4, 256], strides = [1, 1]} : vector<16x256xf32> to vector<4x256xf32>
    %203 = arith.addf %201, %202 : vector<4x256xf32>
    %c0_135 = arith.constant 0 : index
    %c1_136 = arith.constant 1 : index
    %c0_137 = arith.constant 0 : index
    %c0_138 = arith.constant 0 : index
    %204 = vector.load %arg8[%c0_135, %c1_136, %c0_137, %c0_138] : memref<1x4x4x256xf32, #tpu.memory_space<vmem>>, vector<1x1x4x256xf32>
    %205 = vector.shape_cast %204 : vector<1x1x4x256xf32> to vector<4x256xf32>
    %206 = vector.shape_cast %203 : vector<4x256xf32> to vector<1x1x4x256xf32>
    tpu.vector_store %arg8[%c0_135, %c1_136, %c0_137, %c0_138], %206 {strides = array<i32>} : memref<1x4x4x256xf32, #tpu.memory_space<vmem>>, vector<1x1x4x256xf32>,
    %207 = vector.extract_strided_slice %194 {offsets = [0, 512], sizes = [4, 256], strides = [1, 1]} : vector<4x1024xf32> to vector<4x256xf32>
    %208 = vector.extract_strided_slice %108 {offsets = [8, 0], sizes = [4, 256], strides = [1, 1]} : vector<16x256xf32> to vector<4x256xf32>
    %209 = arith.addf %207, %208 : vector<4x256xf32>
    %c0_139 = arith.constant 0 : index
    %c2_140 = arith.constant 2 : index
    %c0_141 = arith.constant 0 : index
    %c0_142 = arith.constant 0 : index
    %210 = vector.load %arg8[%c0_139, %c2_140, %c0_141, %c0_142] : memref<1x4x4x256xf32, #tpu.memory_space<vmem>>, vector<1x1x4x256xf32>
    %211 = vector.shape_cast %210 : vector<1x1x4x256xf32> to vector<4x256xf32>
    %212 = vector.shape_cast %209 : vector<4x256xf32> to vector<1x1x4x256xf32>
    tpu.vector_store %arg8[%c0_139, %c2_140, %c0_141, %c0_142], %212 {strides = array<i32>} : memref<1x4x4x256xf32, #tpu.memory_space<vmem>>, vector<1x1x4x256xf32>,
    %213 = vector.extract_strided_slice %194 {offsets = [0, 768], sizes = [4, 256], strides = [1, 1]} : vector<4x1024xf32> to vector<4x256xf32>
    %214 = vector.extract_strided_slice %108 {offsets = [12, 0], sizes = [4, 256], strides = [1, 1]} : vector<16x256xf32> to vector<4x256xf32>
    %215 = arith.addf %213, %214 : vector<4x256xf32>
    %c0_143 = arith.constant 0 : index
    %c3_144 = arith.constant 3 : index
    %c0_145 = arith.constant 0 : index
    %c0_146 = arith.constant 0 : index
    %216 = vector.load %arg8[%c0_143, %c3_144, %c0_145, %c0_146] : memref<1x4x4x256xf32, #tpu.memory_space<vmem>>, vector<1x1x4x256xf32>
    %217 = vector.shape_cast %216 : vector<1x1x4x256xf32> to vector<4x256xf32>
    %218 = vector.shape_cast %215 : vector<4x256xf32> to vector<1x1x4x256xf32>
    tpu.vector_store %arg8[%c0_143, %c3_144, %c0_145, %c0_146], %218 {strides = array<i32>} : memref<1x4x4x256xf32, #tpu.memory_space<vmem>>, vector<1x1x4x256xf32>,
    return
  }
  func.func @transform_0(%arg0: i32) -> (i32, i32, i32) {
    %c0_i32 = arith.constant 0 : i32
    %c0_i32_0 = arith.constant 0 : i32
    %c0_i32_1 = arith.constant 0 : i32
    return %arg0, %c0_i32, %c0_i32_0 : i32, i32, i32
  }
  func.func @transform_1(%arg0: i32) -> (i32, i32, i32) {
    %c0_i32 = arith.constant 0 : i32
    %c0_i32_0 = arith.constant 0 : i32
    %c0_i32_1 = arith.constant 0 : i32
    %c0_i32_2 = arith.constant 0 : i32
    return %c0_i32, %c0_i32_0, %c0_i32_1 : i32, i32, i32
  }
  func.func @transform_2(%arg0: i32) -> (i32, i32) {
    %c0_i32 = arith.constant 0 : i32
    %c0_i32_0 = arith.constant 0 : i32
    %c0_i32_1 = arith.constant 0 : i32
    return %c0_i32, %c0_i32_0 : i32, i32
  }
  func.func @transform_3(%arg0: i32) -> (i32, i32, i32) {
    %c0_i32 = arith.constant 0 : i32
    %c0_i32_0 = arith.constant 0 : i32
    %c0_i32_1 = arith.constant 0 : i32
    %c0_i32_2 = arith.constant 0 : i32
    return %c0_i32, %c0_i32_0, %c0_i32_1 : i32, i32, i32
  }
  func.func @transform_4(%arg0: i32) -> (i32, i32) {
    %c0_i32 = arith.constant 0 : i32
    %c0_i32_0 = arith.constant 0 : i32
    %c0_i32_1 = arith.constant 0 : i32
    return %c0_i32, %c0_i32_0 : i32, i32
  }
  func.func @transform_5(%arg0: i32) -> (i32, i32) {
    %c0_i32 = arith.constant 0 : i32
    %c0_i32_0 = arith.constant 0 : i32
    %c0_i32_1 = arith.constant 0 : i32
    return %c0_i32, %c0_i32_0 : i32, i32
  }
  func.func @transform_6(%arg0: i32) -> (i32, i32) {
    %c0_i32 = arith.constant 0 : i32
    %c0_i32_0 = arith.constant 0 : i32
    %c0_i32_1 = arith.constant 0 : i32
    return %c0_i32, %c0_i32_0 : i32, i32
  }
  func.func @transform_7(%arg0: i32) -> (i32, i32, i32, i32) {
    %c0_i32 = arith.constant 0 : i32
    %c0_i32_0 = arith.constant 0 : i32
    %c0_i32_1 = arith.constant 0 : i32
    %c0_i32_2 = arith.constant 0 : i32
    return %arg0, %c0_i32, %c0_i32_0, %c0_i32_1 : i32, i32, i32, i32
  }
}

module attributes {stable_mosaic.version = 11 : i64} {
  func.func @kernel(%arg0: i32, %arg1: memref<1x4x256xf32, #tpu.memory_space<vmem>>, %arg2: memref<9x32x4xf32, #tpu.memory_space<vmem>>, %arg3: memref<32x1xf32, #tpu.memory_space<vmem>>, %arg4: memref<4x4x64xf32, #tpu.memory_space<vmem>>, %arg5: memref<4x1xf32, #tpu.memory_space<vmem>>, %arg6: memref<4x4xf32, #tpu.memory_space<vmem>>, %arg7: memref<4x1xf32, #tpu.memory_space<vmem>>, %arg8: memref<1x4x4x256xf32, #tpu.memory_space<vmem>>, %arg9: memref<16x512xf32, #tpu.memory_space<vmem>>) attributes {dimension_semantics = [#tpu.dimension_semantics<parallel>], iteration_bounds = array<i64: 2>, scalar_prefetch = 0 : i64, scratch_operands = 1 : i64, tpu.core_type = #tpu.core_type<tc>, window_params = [{transform_indices = @transform_0, window_bounds = array<i64: 1, 4, 256>}, {pipeline_mode = #tpu.pipeline_mode<synchronous>, transform_indices = @transform_1, window_bounds = array<i64: 9, 32, 4>}, {pipeline_mode = #tpu.pipeline_mode<synchronous>, transform_indices = @transform_2, window_bounds = array<i64: 32, 1>}, {pipeline_mode = #tpu.pipeline_mode<synchronous>, transform_indices = @transform_3, window_bounds = array<i64: 4, 4, 64>}, {pipeline_mode = #tpu.pipeline_mode<synchronous>, transform_indices = @transform_4, window_bounds = array<i64: 4, 1>}, {pipeline_mode = #tpu.pipeline_mode<synchronous>, transform_indices = @transform_5, window_bounds = array<i64: 4, 4>}, {pipeline_mode = #tpu.pipeline_mode<synchronous>, transform_indices = @transform_6, window_bounds = array<i64: 4, 1>}, {transform_indices = @transform_7, window_bounds = array<i64: 1, 4, 4, 256>}]} {
    %cst = arith.constant 0.000000e+00 : f32
    %0 = vector.broadcast %cst : f32 to vector<16x128xf32>
    %c0 = arith.constant 0 : index
    %c0_0 = arith.constant 0 : index
    %1 = vector.load %arg9[%c0, %c0_0] : memref<16x512xf32, #tpu.memory_space<vmem>>, vector<16x128xf32>
    tpu.vector_store %arg9[%c0, %c0_0], %0 {strides = array<i32>} : memref<16x512xf32, #tpu.memory_space<vmem>>, vector<16x128xf32>,
    %cst_1 = arith.constant 0.000000e+00 : f32
    %2 = vector.broadcast %cst_1 : f32 to vector<16x128xf32>
    %c0_2 = arith.constant 0 : index
    %c384 = arith.constant 384 : index
    %3 = vector.load %arg9[%c0_2, %c384] : memref<16x512xf32, #tpu.memory_space<vmem>>, vector<16x128xf32>
    tpu.vector_store %arg9[%c0_2, %c384], %2 {strides = array<i32>} : memref<16x512xf32, #tpu.memory_space<vmem>>, vector<16x128xf32>,
    %4 = tpu.iota {dimensions = array<i32: 1>} : vector<1x256xi32>
    %c16_i32 = arith.constant 16 : i32
    %c0_i32 = arith.constant 0 : i32
    %5 = arith.cmpi eq, %c16_i32, %c0_i32 : i32
    %c1_i32 = arith.constant 1 : i32
    %6 = arith.select %5, %c1_i32, %c16_i32 : i32
    %7 = vector.broadcast %6 : i32 to vector<1x256xi32>
    %8 = arith.remsi %4, %7 : vector<1x256xi32>
    %c0_i32_3 = arith.constant 0 : i32
    %9 = vector.broadcast %c0_i32_3 : i32 to vector<1x256xi32>
    %10 = arith.cmpi ne, %8, %9 : vector<1x256xi32>
    %c0_i32_4 = arith.constant 0 : i32
    %11 = vector.broadcast %c0_i32_4 : i32 to vector<1x256xi32>
    %12 = arith.cmpi slt, %8, %11 : vector<1x256xi32>
    %c0_i32_5 = arith.constant 0 : i32
    %13 = arith.cmpi slt, %6, %c0_i32_5 : i32
    %14 = vector.broadcast %13 : i1 to vector<1x256xi1>
    %15 = vector.broadcast %14 : vector<1x256xi1> to vector<1x256xi1>
    %16 = arith.xori %12, %15 : vector<1x256xi1>
    %17 = arith.andi %16, %10 : vector<1x256xi1>
    %18 = vector.broadcast %6 : i32 to vector<1x256xi32>
    %19 = arith.addi %8, %18 : vector<1x256xi32>
    %20 = arith.select %17, %19, %8 : vector<1x256xi1>, vector<1x256xi32>
    %c15_i32 = arith.constant 15 : i32
    %21 = vector.broadcast %c15_i32 : i32 to vector<1x256xi32>
    %22 = arith.cmpi slt, %20, %21 : vector<1x256xi32>
    %c1_i32_6 = arith.constant 1 : i32
    %23 = vector.broadcast %c1_i32_6 : i32 to vector<1x256xi32>
    %24 = arith.cmpi sge, %20, %23 : vector<1x256xi32>
    %c0_7 = arith.constant 0 : index
    %c0_8 = arith.constant 0 : index
    %c0_9 = arith.constant 0 : index
    %25 = vector.load %arg1[%c0_7, %c0_8, %c0_9] : memref<1x4x256xf32, #tpu.memory_space<vmem>>, vector<1x4x256xf32>
    %26 = vector.shape_cast %25 : vector<1x4x256xf32> to vector<4x256xf32>
    %c0_10 = arith.constant 0 : index
    %c128 = arith.constant 128 : index
    %27 = vector.load %arg9[%c0_10, %c128] : memref<16x512xf32, #tpu.memory_space<vmem>>, vector<4x256xf32>
    tpu.vector_store %arg9[%c0_10, %c128], %26 {strides = array<i32>} : memref<16x512xf32, #tpu.memory_space<vmem>>, vector<4x256xf32>,
    %c0_11 = arith.constant 0 : index
    %c111 = arith.constant 111 : index
    %28 = vector.load %arg9[%c0_11, %c111] : memref<16x512xf32, #tpu.memory_space<vmem>>, vector<4x256xf32>
    %cst_12 = arith.constant 0.000000e+00 : f32
    %29 = vector.shape_cast %24 : vector<1x256xi1> to vector<1x256xi1>
    %30 = vector.broadcast %29 : vector<1x256xi1> to vector<4x256xi1>
    %31 = vector.broadcast %cst_12 : f32 to vector<4x256xf32>
    %32 = arith.select %30, %28, %31 : vector<4x256xi1>, vector<4x256xf32>
    %c0_13 = arith.constant 0 : index
    %c0_14 = arith.constant 0 : index
    %c0_15 = arith.constant 0 : index
    %33 = vector.load %arg2[%c0_13, %c0_14, %c0_15] : memref<9x32x4xf32, #tpu.memory_space<vmem>>, vector<1x32x4xf32>
    %34 = vector.shape_cast %33 : vector<1x32x4xf32> to vector<32x4xf32>
    %cst_16 = arith.constant dense<0.000000e+00> : vector<32x256xf32>
    %35 = tpu.matmul %34, %32, %cst_16 {dimension_numbers = #tpu.dot_dimension_numbers<[1], [0], [0], [1], [0, 0, 1, 1], [], []>} : vector<32x4xf32>, vector<4x256xf32>, vector<32x256xf32> -> vector<32x256xf32>
    %c0_17 = arith.constant 0 : index
    %c112 = arith.constant 112 : index
    %36 = vector.load %arg9[%c0_17, %c112] : memref<16x512xf32, #tpu.memory_space<vmem>>, vector<4x256xf32>
    %c1 = arith.constant 1 : index
    %c0_18 = arith.constant 0 : index
    %c0_19 = arith.constant 0 : index
    %37 = vector.load %arg2[%c1, %c0_18, %c0_19] : memref<9x32x4xf32, #tpu.memory_space<vmem>>, vector<1x32x4xf32>
    %38 = vector.shape_cast %37 : vector<1x32x4xf32> to vector<32x4xf32>
    %cst_20 = arith.constant dense<0.000000e+00> : vector<32x256xf32>
    %39 = tpu.matmul %38, %36, %cst_20 {dimension_numbers = #tpu.dot_dimension_numbers<[1], [0], [0], [1], [0, 0, 1, 1], [], []>} : vector<32x4xf32>, vector<4x256xf32>, vector<32x256xf32> -> vector<32x256xf32>
    %40 = arith.addf %35, %39 : vector<32x256xf32>
    %c0_21 = arith.constant 0 : index
    %c113 = arith.constant 113 : index
    %41 = vector.load %arg9[%c0_21, %c113] : memref<16x512xf32, #tpu.memory_space<vmem>>, vector<4x256xf32>
    %cst_22 = arith.constant 0.000000e+00 : f32
    %42 = vector.shape_cast %22 : vector<1x256xi1> to vector<1x256xi1>
    %43 = vector.broadcast %42 : vector<1x256xi1> to vector<4x256xi1>
    %44 = vector.broadcast %cst_22 : f32 to vector<4x256xf32>
    %45 = arith.select %43, %41, %44 : vector<4x256xi1>, vector<4x256xf32>
    %c2 = arith.constant 2 : index
    %c0_23 = arith.constant 0 : index
    %c0_24 = arith.constant 0 : index
    %46 = vector.load %arg2[%c2, %c0_23, %c0_24] : memref<9x32x4xf32, #tpu.memory_space<vmem>>, vector<1x32x4xf32>
    %47 = vector.shape_cast %46 : vector<1x32x4xf32> to vector<32x4xf32>
    %cst_25 = arith.constant dense<0.000000e+00> : vector<32x256xf32>
    %48 = tpu.matmul %47, %45, %cst_25 {dimension_numbers = #tpu.dot_dimension_numbers<[1], [0], [0], [1], [0, 0, 1, 1], [], []>} : vector<32x4xf32>, vector<4x256xf32>, vector<32x256xf32> -> vector<32x256xf32>
    %49 = arith.addf %40, %48 : vector<32x256xf32>
    %c0_26 = arith.constant 0 : index
    %c127 = arith.constant 127 : index
    %50 = vector.load %arg9[%c0_26, %c127] : memref<16x512xf32, #tpu.memory_space<vmem>>, vector<4x256xf32>
    %cst_27 = arith.constant 0.000000e+00 : f32
    %51 = vector.shape_cast %24 : vector<1x256xi1> to vector<1x256xi1>
    %52 = vector.broadcast %51 : vector<1x256xi1> to vector<4x256xi1>
    %53 = vector.broadcast %cst_27 : f32 to vector<4x256xf32>
    %54 = arith.select %52, %50, %53 : vector<4x256xi1>, vector<4x256xf32>
    %c3 = arith.constant 3 : index
    %c0_28 = arith.constant 0 : index
    %c0_29 = arith.constant 0 : index
    %55 = vector.load %arg2[%c3, %c0_28, %c0_29] : memref<9x32x4xf32, #tpu.memory_space<vmem>>, vector<1x32x4xf32>
    %56 = vector.shape_cast %55 : vector<1x32x4xf32> to vector<32x4xf32>
    %cst_30 = arith.constant dense<0.000000e+00> : vector<32x256xf32>
    %57 = tpu.matmul %56, %54, %cst_30 {dimension_numbers = #tpu.dot_dimension_numbers<[1], [0], [0], [1], [0, 0, 1, 1], [], []>} : vector<32x4xf32>, vector<4x256xf32>, vector<32x256xf32> -> vector<32x256xf32>
    %58 = arith.addf %49, %57 : vector<32x256xf32>
    %c0_31 = arith.constant 0 : index
    %c128_32 = arith.constant 128 : index
    %59 = vector.load %arg9[%c0_31, %c128_32] : memref<16x512xf32, #tpu.memory_space<vmem>>, vector<4x256xf32>
    %c4 = arith.constant 4 : index
    %c0_33 = arith.constant 0 : index
    %c0_34 = arith.constant 0 : index
    %60 = vector.load %arg2[%c4, %c0_33, %c0_34] : memref<9x32x4xf32, #tpu.memory_space<vmem>>, vector<1x32x4xf32>
    %61 = vector.shape_cast %60 : vector<1x32x4xf32> to vector<32x4xf32>
    %cst_35 = arith.constant dense<0.000000e+00> : vector<32x256xf32>
    %62 = tpu.matmul %61, %59, %cst_35 {dimension_numbers = #tpu.dot_dimension_numbers<[1], [0], [0], [1], [0, 0, 1, 1], [], []>} : vector<32x4xf32>, vector<4x256xf32>, vector<32x256xf32> -> vector<32x256xf32>
    %63 = arith.addf %58, %62 : vector<32x256xf32>
    %c0_36 = arith.constant 0 : index
    %c129 = arith.constant 129 : index
    %64 = vector.load %arg9[%c0_36, %c129] : memref<16x512xf32, #tpu.memory_space<vmem>>, vector<4x256xf32>
    %cst_37 = arith.constant 0.000000e+00 : f32
    %65 = vector.shape_cast %22 : vector<1x256xi1> to vector<1x256xi1>
    %66 = vector.broadcast %65 : vector<1x256xi1> to vector<4x256xi1>
    %67 = vector.broadcast %cst_37 : f32 to vector<4x256xf32>
    %68 = arith.select %66, %64, %67 : vector<4x256xi1>, vector<4x256xf32>
    %c5 = arith.constant 5 : index
    %c0_38 = arith.constant 0 : index
    %c0_39 = arith.constant 0 : index
    %69 = vector.load %arg2[%c5, %c0_38, %c0_39] : memref<9x32x4xf32, #tpu.memory_space<vmem>>, vector<1x32x4xf32>
    %70 = vector.shape_cast %69 : vector<1x32x4xf32> to vector<32x4xf32>
    %cst_40 = arith.constant dense<0.000000e+00> : vector<32x256xf32>
    %71 = tpu.matmul %70, %68, %cst_40 {dimension_numbers = #tpu.dot_dimension_numbers<[1], [0], [0], [1], [0, 0, 1, 1], [], []>} : vector<32x4xf32>, vector<4x256xf32>, vector<32x256xf32> -> vector<32x256xf32>
    %72 = arith.addf %63, %71 : vector<32x256xf32>
    %c0_41 = arith.constant 0 : index
    %c143 = arith.constant 143 : index
    %73 = vector.load %arg9[%c0_41, %c143] : memref<16x512xf32, #tpu.memory_space<vmem>>, vector<4x256xf32>
    %cst_42 = arith.constant 0.000000e+00 : f32
    %74 = vector.shape_cast %24 : vector<1x256xi1> to vector<1x256xi1>
    %75 = vector.broadcast %74 : vector<1x256xi1> to vector<4x256xi1>
    %76 = vector.broadcast %cst_42 : f32 to vector<4x256xf32>
    %77 = arith.select %75, %73, %76 : vector<4x256xi1>, vector<4x256xf32>
    %c6 = arith.constant 6 : index
    %c0_43 = arith.constant 0 : index
    %c0_44 = arith.constant 0 : index
    %78 = vector.load %arg2[%c6, %c0_43, %c0_44] : memref<9x32x4xf32, #tpu.memory_space<vmem>>, vector<1x32x4xf32>
    %79 = vector.shape_cast %78 : vector<1x32x4xf32> to vector<32x4xf32>
    %cst_45 = arith.constant dense<0.000000e+00> : vector<32x256xf32>
    %80 = tpu.matmul %79, %77, %cst_45 {dimension_numbers = #tpu.dot_dimension_numbers<[1], [0], [0], [1], [0, 0, 1, 1], [], []>} : vector<32x4xf32>, vector<4x256xf32>, vector<32x256xf32> -> vector<32x256xf32>
    %81 = arith.addf %72, %80 : vector<32x256xf32>
    %c0_46 = arith.constant 0 : index
    %c144 = arith.constant 144 : index
    %82 = vector.load %arg9[%c0_46, %c144] : memref<16x512xf32, #tpu.memory_space<vmem>>, vector<4x256xf32>
    %c7 = arith.constant 7 : index
    %c0_47 = arith.constant 0 : index
    %c0_48 = arith.constant 0 : index
    %83 = vector.load %arg2[%c7, %c0_47, %c0_48] : memref<9x32x4xf32, #tpu.memory_space<vmem>>, vector<1x32x4xf32>
    %84 = vector.shape_cast %83 : vector<1x32x4xf32> to vector<32x4xf32>
    %cst_49 = arith.constant dense<0.000000e+00> : vector<32x256xf32>
    %85 = tpu.matmul %84, %82, %cst_49 {dimension_numbers = #tpu.dot_dimension_numbers<[1], [0], [0], [1], [0, 0, 1, 1], [], []>} : vector<32x4xf32>, vector<4x256xf32>, vector<32x256xf32> -> vector<32x256xf32>
    %86 = arith.addf %81, %85 : vector<32x256xf32>
    %c0_50 = arith.constant 0 : index
    %c145 = arith.constant 145 : index
    %87 = vector.load %arg9[%c0_50, %c145] : memref<16x512xf32, #tpu.memory_space<vmem>>, vector<4x256xf32>
    %cst_51 = arith.constant 0.000000e+00 : f32
    %88 = vector.shape_cast %22 : vector<1x256xi1> to vector<1x256xi1>
    %89 = vector.broadcast %88 : vector<1x256xi1> to vector<4x256xi1>
    %90 = vector.broadcast %cst_51 : f32 to vector<4x256xf32>
    %91 = arith.select %89, %87, %90 : vector<4x256xi1>, vector<4x256xf32>
    %c8 = arith.constant 8 : index
    %c0_52 = arith.constant 0 : index
    %c0_53 = arith.constant 0 : index
    %92 = vector.load %arg2[%c8, %c0_52, %c0_53] : memref<9x32x4xf32, #tpu.memory_space<vmem>>, vector<1x32x4xf32>
    %93 = vector.shape_cast %92 : vector<1x32x4xf32> to vector<32x4xf32>
    %cst_54 = arith.constant dense<0.000000e+00> : vector<32x256xf32>
    %94 = tpu.matmul %93, %91, %cst_54 {dimension_numbers = #tpu.dot_dimension_numbers<[1], [0], [0], [1], [0, 0, 1, 1], [], []>} : vector<32x4xf32>, vector<4x256xf32>, vector<32x256xf32> -> vector<32x256xf32>
    %95 = arith.addf %86, %94 : vector<32x256xf32>
    %c0_55 = arith.constant 0 : index
    %c0_56 = arith.constant 0 : index
    %96 = vector.load %arg3[%c0_55, %c0_56] : memref<32x1xf32, #tpu.memory_space<vmem>>, vector<32x1xf32>
    %97 = vector.broadcast %96 : vector<32x1xf32> to vector<32x256xf32>
    %98 = arith.addf %95, %97 : vector<32x256xf32>
    %99 = vector.extract_strided_slice %98 {offsets = [0, 0], sizes = [16, 256], strides = [1, 1]} : vector<32x256xf32> to vector<16x256xf32>
    %cst_57 = arith.constant 5.000000e-01 : f32
    %100 = vector.broadcast %cst_57 : f32 to vector<16x256xf32>
    %101 = arith.mulf %100, %99 : vector<16x256xf32>
    %cst_58 = arith.constant 0.707106769 : f32
    %102 = vector.broadcast %cst_58 : f32 to vector<16x256xf32>
    %103 = arith.mulf %99, %102 : vector<16x256xf32>
    %104 = math.erf %103 : vector<16x256xf32>
    %cst_59 = arith.constant 1.000000e+00 : f32
    %105 = vector.broadcast %cst_59 : f32 to vector<16x256xf32>
    %106 = arith.addf %105, %104 : vector<16x256xf32>
    %107 = arith.mulf %101, %106 : vector<16x256xf32>
    %108 = vector.extract_strided_slice %98 {offsets = [16, 0], sizes = [16, 256], strides = [1, 1]} : vector<32x256xf32> to vector<16x256xf32>
    %c0_60 = arith.constant 0 : index
    %c128_61 = arith.constant 128 : index
    %109 = vector.load %arg9[%c0_60, %c128_61] : memref<16x512xf32, #tpu.memory_space<vmem>>, vector<16x256xf32>
    tpu.vector_store %arg9[%c0_60, %c128_61], %107 {strides = array<i32>} : memref<16x512xf32, #tpu.memory_space<vmem>>, vector<16x256xf32>,
    %c0_62 = arith.constant 0 : index
    %c111_63 = arith.constant 111 : index
    %110 = vector.load %arg9[%c0_62, %c111_63] : memref<16x512xf32, #tpu.memory_space<vmem>>, vector<16x256xf32>
    %cst_64 = arith.constant 0.000000e+00 : f32
    %111 = vector.shape_cast %24 : vector<1x256xi1> to vector<1x256xi1>
    %112 = vector.broadcast %111 : vector<1x256xi1> to vector<16x256xi1>
    %113 = vector.broadcast %cst_64 : f32 to vector<16x256xf32>
    %114 = arith.select %112, %110, %113 : vector<16x256xi1>, vector<16x256xf32>
    %c0_65 = arith.constant 0 : index
    %c112_66 = arith.constant 112 : index
    %115 = vector.load %arg9[%c0_65, %c112_66] : memref<16x512xf32, #tpu.memory_space<vmem>>, vector<16x256xf32>
    %c0_67 = arith.constant 0 : index
    %c127_68 = arith.constant 127 : index
    %116 = vector.load %arg9[%c0_67, %c127_68] : memref<16x512xf32, #tpu.memory_space<vmem>>, vector<16x256xf32>
    %cst_69 = arith.constant 0.000000e+00 : f32
    %117 = vector.shape_cast %24 : vector<1x256xi1> to vector<1x256xi1>
    %118 = vector.broadcast %117 : vector<1x256xi1> to vector<16x256xi1>
    %119 = vector.broadcast %cst_69 : f32 to vector<16x256xf32>
    %120 = arith.select %118, %116, %119 : vector<16x256xi1>, vector<16x256xf32>
    %c0_70 = arith.constant 0 : index
    %c128_71 = arith.constant 128 : index
    %121 = vector.load %arg9[%c0_70, %c128_71] : memref<16x512xf32, #tpu.memory_space<vmem>>, vector<16x256xf32>
    %122 = tpu.concatenate %114, %115, %120, %121 in 0 : vector<16x256xf32>, vector<16x256xf32>, vector<16x256xf32>, vector<16x256xf32> -> vector<64x256xf32>
    %c0_72 = arith.constant 0 : index
    %c0_73 = arith.constant 0 : index
    %c0_74 = arith.constant 0 : index
    %123 = vector.load %arg4[%c0_72, %c0_73, %c0_74] : memref<4x4x64xf32, #tpu.memory_space<vmem>>, vector<1x4x64xf32>
    %124 = vector.shape_cast %123 : vector<1x4x64xf32> to vector<4x64xf32>
    %cst_75 = arith.constant dense<0.000000e+00> : vector<4x256xf32>
    %125 = tpu.matmul %124, %122, %cst_75 {dimension_numbers = #tpu.dot_dimension_numbers<[1], [0], [0], [1], [0, 0, 1, 1], [], []>} : vector<4x64xf32>, vector<64x256xf32>, vector<4x256xf32> -> vector<4x256xf32>
    %c0_76 = arith.constant 0 : index
    %c0_77 = arith.constant 0 : index
    %126 = vector.load %arg5[%c0_76, %c0_77] : memref<4x1xf32, #tpu.memory_space<vmem>>, vector<4x1xf32>
    %127 = vector.broadcast %126 : vector<4x1xf32> to vector<4x256xf32>
    %128 = arith.addf %125, %127 : vector<4x256xf32>
    %c0_78 = arith.constant 0 : index
    %c112_79 = arith.constant 112 : index
    %129 = vector.load %arg9[%c0_78, %c112_79] : memref<16x512xf32, #tpu.memory_space<vmem>>, vector<16x256xf32>
    %c0_80 = arith.constant 0 : index
    %c113_81 = arith.constant 113 : index
    %130 = vector.load %arg9[%c0_80, %c113_81] : memref<16x512xf32, #tpu.memory_space<vmem>>, vector<16x256xf32>
    %cst_82 = arith.constant 0.000000e+00 : f32
    %131 = vector.shape_cast %22 : vector<1x256xi1> to vector<1x256xi1>
    %132 = vector.broadcast %131 : vector<1x256xi1> to vector<16x256xi1>
    %133 = vector.broadcast %cst_82 : f32 to vector<16x256xf32>
    %134 = arith.select %132, %130, %133 : vector<16x256xi1>, vector<16x256xf32>
    %c0_83 = arith.constant 0 : index
    %c128_84 = arith.constant 128 : index
    %135 = vector.load %arg9[%c0_83, %c128_84] : memref<16x512xf32, #tpu.memory_space<vmem>>, vector<16x256xf32>
    %c0_85 = arith.constant 0 : index
    %c129_86 = arith.constant 129 : index
    %136 = vector.load %arg9[%c0_85, %c129_86] : memref<16x512xf32, #tpu.memory_space<vmem>>, vector<16x256xf32>
    %cst_87 = arith.constant 0.000000e+00 : f32
    %137 = vector.shape_cast %22 : vector<1x256xi1> to vector<1x256xi1>
    %138 = vector.broadcast %137 : vector<1x256xi1> to vector<16x256xi1>
    %139 = vector.broadcast %cst_87 : f32 to vector<16x256xf32>
    %140 = arith.select %138, %136, %139 : vector<16x256xi1>, vector<16x256xf32>
    %141 = tpu.concatenate %129, %134, %135, %140 in 0 : vector<16x256xf32>, vector<16x256xf32>, vector<16x256xf32>, vector<16x256xf32> -> vector<64x256xf32>
    %c1_88 = arith.constant 1 : index
    %c0_89 = arith.constant 0 : index
    %c0_90 = arith.constant 0 : index
    %142 = vector.load %arg4[%c1_88, %c0_89, %c0_90] : memref<4x4x64xf32, #tpu.memory_space<vmem>>, vector<1x4x64xf32>
    %143 = vector.shape_cast %142 : vector<1x4x64xf32> to vector<4x64xf32>
    %cst_91 = arith.constant dense<0.000000e+00> : vector<4x256xf32>
    %144 = tpu.matmul %143, %141, %cst_91 {dimension_numbers = #tpu.dot_dimension_numbers<[1], [0], [0], [1], [0, 0, 1, 1], [], []>} : vector<4x64xf32>, vector<64x256xf32>, vector<4x256xf32> -> vector<4x256xf32>
    %c0_92 = arith.constant 0 : index
    %c0_93 = arith.constant 0 : index
    %145 = vector.load %arg5[%c0_92, %c0_93] : memref<4x1xf32, #tpu.memory_space<vmem>>, vector<4x1xf32>
    %146 = vector.broadcast %145 : vector<4x1xf32> to vector<4x256xf32>
    %147 = arith.addf %144, %146 : vector<4x256xf32>
    %c0_94 = arith.constant 0 : index
    %c127_95 = arith.constant 127 : index
    %148 = vector.load %arg9[%c0_94, %c127_95] : memref<16x512xf32, #tpu.memory_space<vmem>>, vector<16x256xf32>
    %cst_96 = arith.constant 0.000000e+00 : f32
    %149 = vector.shape_cast %24 : vector<1x256xi1> to vector<1x256xi1>
    %150 = vector.broadcast %149 : vector<1x256xi1> to vector<16x256xi1>
    %151 = vector.broadcast %cst_96 : f32 to vector<16x256xf32>
    %152 = arith.select %150, %148, %151 : vector<16x256xi1>, vector<16x256xf32>
    %c0_97 = arith.constant 0 : index
    %c128_98 = arith.constant 128 : index
    %153 = vector.load %arg9[%c0_97, %c128_98] : memref<16x512xf32, #tpu.memory_space<vmem>>, vector<16x256xf32>
    %c0_99 = arith.constant 0 : index
    %c143_100 = arith.constant 143 : index
    %154 = vector.load %arg9[%c0_99, %c143_100] : memref<16x512xf32, #tpu.memory_space<vmem>>, vector<16x256xf32>
    %cst_101 = arith.constant 0.000000e+00 : f32
    %155 = vector.shape_cast %24 : vector<1x256xi1> to vector<1x256xi1>
    %156 = vector.broadcast %155 : vector<1x256xi1> to vector<16x256xi1>
    %157 = vector.broadcast %cst_101 : f32 to vector<16x256xf32>
    %158 = arith.select %156, %154, %157 : vector<16x256xi1>, vector<16x256xf32>
    %c0_102 = arith.constant 0 : index
    %c144_103 = arith.constant 144 : index
    %159 = vector.load %arg9[%c0_102, %c144_103] : memref<16x512xf32, #tpu.memory_space<vmem>>, vector<16x256xf32>
    %160 = tpu.concatenate %152, %153, %158, %159 in 0 : vector<16x256xf32>, vector<16x256xf32>, vector<16x256xf32>, vector<16x256xf32> -> vector<64x256xf32>
    %c2_104 = arith.constant 2 : index
    %c0_105 = arith.constant 0 : index
    %c0_106 = arith.constant 0 : index
    %161 = vector.load %arg4[%c2_104, %c0_105, %c0_106] : memref<4x4x64xf32, #tpu.memory_space<vmem>>, vector<1x4x64xf32>
    %162 = vector.shape_cast %161 : vector<1x4x64xf32> to vector<4x64xf32>
    %cst_107 = arith.constant dense<0.000000e+00> : vector<4x256xf32>
    %163 = tpu.matmul %162, %160, %cst_107 {dimension_numbers = #tpu.dot_dimension_numbers<[1], [0], [0], [1], [0, 0, 1, 1], [], []>} : vector<4x64xf32>, vector<64x256xf32>, vector<4x256xf32> -> vector<4x256xf32>
    %c0_108 = arith.constant 0 : index
    %c0_109 = arith.constant 0 : index
    %164 = vector.load %arg5[%c0_108, %c0_109] : memref<4x1xf32, #tpu.memory_space<vmem>>, vector<4x1xf32>
    %165 = vector.broadcast %164 : vector<4x1xf32> to vector<4x256xf32>
    %166 = arith.addf %163, %165 : vector<4x256xf32>
    %c0_110 = arith.constant 0 : index
    %c128_111 = arith.constant 128 : index
    %167 = vector.load %arg9[%c0_110, %c128_111] : memref<16x512xf32, #tpu.memory_space<vmem>>, vector<16x256xf32>
    %c0_112 = arith.constant 0 : index
    %c129_113 = arith.constant 129 : index
    %168 = vector.load %arg9[%c0_112, %c129_113] : memref<16x512xf32, #tpu.memory_space<vmem>>, vector<16x256xf32>
    %cst_114 = arith.constant 0.000000e+00 : f32
    %169 = vector.shape_cast %22 : vector<1x256xi1> to vector<1x256xi1>
    %170 = vector.broadcast %169 : vector<1x256xi1> to vector<16x256xi1>
    %171 = vector.broadcast %cst_114 : f32 to vector<16x256xf32>
    %172 = arith.select %170, %168, %171 : vector<16x256xi1>, vector<16x256xf32>
    %c0_115 = arith.constant 0 : index
    %c144_116 = arith.constant 144 : index
    %173 = vector.load %arg9[%c0_115, %c144_116] : memref<16x512xf32, #tpu.memory_space<vmem>>, vector<16x256xf32>
    %c0_117 = arith.constant 0 : index
    %c145_118 = arith.constant 145 : index
    %174 = vector.load %arg9[%c0_117, %c145_118] : memref<16x512xf32, #tpu.memory_space<vmem>>, vector<16x256xf32>
    %cst_119 = arith.constant 0.000000e+00 : f32
    %175 = vector.shape_cast %22 : vector<1x256xi1> to vector<1x256xi1>
    %176 = vector.broadcast %175 : vector<1x256xi1> to vector<16x256xi1>
    %177 = vector.broadcast %cst_119 : f32 to vector<16x256xf32>
    %178 = arith.select %176, %174, %177 : vector<16x256xi1>, vector<16x256xf32>
    %179 = tpu.concatenate %167, %172, %173, %178 in 0 : vector<16x256xf32>, vector<16x256xf32>, vector<16x256xf32>, vector<16x256xf32> -> vector<64x256xf32>
    %c3_120 = arith.constant 3 : index
    %c0_121 = arith.constant 0 : index
    %c0_122 = arith.constant 0 : index
    %180 = vector.load %arg4[%c3_120, %c0_121, %c0_122] : memref<4x4x64xf32, #tpu.memory_space<vmem>>, vector<1x4x64xf32>
    %181 = vector.shape_cast %180 : vector<1x4x64xf32> to vector<4x64xf32>
    %cst_123 = arith.constant dense<0.000000e+00> : vector<4x256xf32>
    %182 = tpu.matmul %181, %179, %cst_123 {dimension_numbers = #tpu.dot_dimension_numbers<[1], [0], [0], [1], [0, 0, 1, 1], [], []>} : vector<4x64xf32>, vector<64x256xf32>, vector<4x256xf32> -> vector<4x256xf32>
    %c0_124 = arith.constant 0 : index
    %c0_125 = arith.constant 0 : index
    %183 = vector.load %arg5[%c0_124, %c0_125] : memref<4x1xf32, #tpu.memory_space<vmem>>, vector<4x1xf32>
    %184 = vector.broadcast %183 : vector<4x1xf32> to vector<4x256xf32>
    %185 = arith.addf %182, %184 : vector<4x256xf32>
    %186 = tpu.concatenate %128, %147, %166, %185 in 1 : vector<4x256xf32>, vector<4x256xf32>, vector<4x256xf32>, vector<4x256xf32> -> vector<4x1024xf32>
    %c0_126 = arith.constant 0 : index
    %c0_127 = arith.constant 0 : index
    %187 = vector.load %arg6[%c0_126, %c0_127] : memref<4x4xf32, #tpu.memory_space<vmem>>, vector<4x4xf32>
    %188 = arith.mulf %186, %186 : vector<4x1024xf32>
    %cst_128 = arith.constant dense<0.000000e+00> : vector<4x1024xf32>
    %189 = tpu.matmul %187, %188, %cst_128 {dimension_numbers = #tpu.dot_dimension_numbers<[1], [0], [0], [1], [0, 0, 1, 1], [], []>} : vector<4x4xf32>, vector<4x1024xf32>, vector<4x1024xf32> -> vector<4x1024xf32>
    %c0_129 = arith.constant 0 : index
    %c0_130 = arith.constant 0 : index
    %190 = vector.load %arg7[%c0_129, %c0_130] : memref<4x1xf32, #tpu.memory_space<vmem>>, vector<4x1xf32>
    %191 = vector.broadcast %190 : vector<4x1xf32> to vector<4x1024xf32>
    %192 = arith.addf %189, %191 : vector<4x1024xf32>
    %193 = math.sqrt %192 : vector<4x1024xf32>
    %194 = arith.mulf %186, %193 : vector<4x1024xf32>
    %195 = vector.extract_strided_slice %194 {offsets = [0, 0], sizes = [4, 256], strides = [1, 1]} : vector<4x1024xf32> to vector<4x256xf32>
    %196 = vector.extract_strided_slice %108 {offsets = [0, 0], sizes = [4, 256], strides = [1, 1]} : vector<16x256xf32> to vector<4x256xf32>
    %197 = arith.addf %195, %196 : vector<4x256xf32>
    %c0_131 = arith.constant 0 : index
    %c0_132 = arith.constant 0 : index
    %c0_133 = arith.constant 0 : index
    %c0_134 = arith.constant 0 : index
    %198 = vector.load %arg8[%c0_131, %c0_132, %c0_133, %c0_134] : memref<1x4x4x256xf32, #tpu.memory_space<vmem>>, vector<1x1x4x256xf32>
    %199 = vector.shape_cast %198 : vector<1x1x4x256xf32> to vector<4x256xf32>
    %200 = vector.shape_cast %197 : vector<4x256xf32> to vector<1x1x4x256xf32>
    tpu.vector_store %arg8[%c0_131, %c0_132, %c0_133, %c0_134], %200 {strides = array<i32>} : memref<1x4x4x256xf32, #tpu.memory_space<vmem>>, vector<1x1x4x256xf32>,
    %201 = vector.extract_strided_slice %194 {offsets = [0, 256], sizes = [4, 256], strides = [1, 1]} : vector<4x1024xf32> to vector<4x256xf32>
    %202 = vector.extract_strided_slice %108 {offsets = [4, 0], sizes = [4, 256], strides = [1, 1]} : vector<16x256xf32> to vector<4x256xf32>
    %203 = arith.addf %201, %202 : vector<4x256xf32>
    %c0_135 = arith.constant 0 : index
    %c1_136 = arith.constant 1 : index
    %c0_137 = arith.constant 0 : index
    %c0_138 = arith.constant 0 : index
    %204 = vector.load %arg8[%c0_135, %c1_136, %c0_137, %c0_138] : memref<1x4x4x256xf32, #tpu.memory_space<vmem>>, vector<1x1x4x256xf32>
    %205 = vector.shape_cast %204 : vector<1x1x4x256xf32> to vector<4x256xf32>
    %206 = vector.shape_cast %203 : vector<4x256xf32> to vector<1x1x4x256xf32>
    tpu.vector_store %arg8[%c0_135, %c1_136, %c0_137, %c0_138], %206 {strides = array<i32>} : memref<1x4x4x256xf32, #tpu.memory_space<vmem>>, vector<1x1x4x256xf32>,
    %207 = vector.extract_strided_slice %194 {offsets = [0, 512], sizes = [4, 256], strides = [1, 1]} : vector<4x1024xf32> to vector<4x256xf32>
    %208 = vector.extract_strided_slice %108 {offsets = [8, 0], sizes = [4, 256], strides = [1, 1]} : vector<16x256xf32> to vector<4x256xf32>
    %209 = arith.addf %207, %208 : vector<4x256xf32>
    %c0_139 = arith.constant 0 : index
    %c2_140 = arith.constant 2 : index
    %c0_141 = arith.constant 0 : index
    %c0_142 = arith.constant 0 : index
    %210 = vector.load %arg8[%c0_139, %c2_140, %c0_141, %c0_142] : memref<1x4x4x256xf32, #tpu.memory_space<vmem>>, vector<1x1x4x256xf32>
    %211 = vector.shape_cast %210 : vector<1x1x4x256xf32> to vector<4x256xf32>
    %212 = vector.shape_cast %209 : vector<4x256xf32> to vector<1x1x4x256xf32>
    tpu.vector_store %arg8[%c0_139, %c2_140, %c0_141, %c0_142], %212 {strides = array<i32>} : memref<1x4x4x256xf32, #tpu.memory_space<vmem>>, vector<1x1x4x256xf32>,
    %213 = vector.extract_strided_slice %194 {offsets = [0, 768], sizes = [4, 256], strides = [1, 1]} : vector<4x1024xf32> to vector<4x256xf32>
    %214 = vector.extract_strided_slice %108 {offsets = [12, 0], sizes = [4, 256], strides = [1, 1]} : vector<16x256xf32> to vector<4x256xf32>
    %215 = arith.addf %213, %214 : vector<4x256xf32>
    %c0_143 = arith.constant 0 : index
    %c3_144 = arith.constant 3 : index
    %c0_145 = arith.constant 0 : index
    %c0_146 = arith.constant 0 : index
    %216 = vector.load %arg8[%c0_143, %c3_144, %c0_145, %c0_146] : memref<1x4x4x256xf32, #tpu.memory_space<vmem>>, vector<1x1x4x256xf32>
    %217 = vector.shape_cast %216 : vector<1x1x4x256xf32> to vector<4x256xf32>
    %218 = vector.shape_cast %215 : vector<4x256xf32> to vector<1x1x4x256xf32>
    tpu.vector_store %arg8[%c0_143, %c3_144, %c0_145, %c0_146], %218 {strides = array<i32>} : memref<1x4x4x256xf32, #tpu.memory_space<vmem>>, vector<1x1x4x256xf32>,
    return
  }
  func.func @transform_0(%arg0: i32) -> (i32, i32, i32) {
    %c0_i32 = arith.constant 0 : i32
    %c0_i32_0 = arith.constant 0 : i32
    %c0_i32_1 = arith.constant 0 : i32
    return %arg0, %c0_i32, %c0_i32_0 : i32, i32, i32
  }
  func.func @transform_1(%arg0: i32) -> (i32, i32, i32) {
    %c0_i32 = arith.constant 0 : i32
    %c0_i32_0 = arith.constant 0 : i32
    %c0_i32_1 = arith.constant 0 : i32
    %c0_i32_2 = arith.constant 0 : i32
    return %c0_i32, %c0_i32_0, %c0_i32_1 : i32, i32, i32
  }
  func.func @transform_2(%arg0: i32) -> (i32, i32) {
    %c0_i32 = arith.constant 0 : i32
    %c0_i32_0 = arith.constant 0 : i32
    %c0_i32_1 = arith.constant 0 : i32
    return %c0_i32, %c0_i32_0 : i32, i32
  }
  func.func @transform_3(%arg0: i32) -> (i32, i32, i32) {
    %c0_i32 = arith.constant 0 : i32
    %c0_i32_0 = arith.constant 0 : i32
    %c0_i32_1 = arith.constant 0 : i32
    %c0_i32_2 = arith.constant 0 : i32
    return %c0_i32, %c0_i32_0, %c0_i32_1 : i32, i32, i32
  }
  func.func @transform_4(%arg0: i32) -> (i32, i32) {
    %c0_i32 = arith.constant 0 : i32
    %c0_i32_0 = arith.constant 0 : i32
    %c0_i32_1 = arith.constant 0 : i32
    return %c0_i32, %c0_i32_0 : i32, i32
  }
  func.func @transform_5(%arg0: i32) -> (i32, i32) {
    %c0_i32 = arith.constant 0 : i32
    %c0_i32_0 = arith.constant 0 : i32
    %c0_i32_1 = arith.constant 0 : i32
    return %c0_i32, %c0_i32_0 : i32, i32
  }
  func.func @transform_6(%arg0: i32) -> (i32, i32) {
    %c0_i32 = arith.constant 0 : i32
    %c0_i32_0 = arith.constant 0 : i32
    %c0_i32_1 = arith.constant 0 : i32
    return %c0_i32, %c0_i32_0 : i32, i32
  }
  func.func @transform_7(%arg0: i32) -> (i32, i32, i32, i32) {
    %c0_i32 = arith.constant 0 : i32
    %c0_i32_0 = arith.constant 0 : i32
    %c0_i32_1 = arith.constant 0 : i32
    %c0_i32_2 = arith.constant 0 : i32
    return %arg0, %c0_i32, %c0_i32_0, %c0_i32_1 : i32, i32, i32, i32
  }
}

</mosaic_0001>

<bundles_post_ra>
// kernel: tpu_custom_call.1
= control target key start
LH: loop header
LB: loop body
LE: loop exit
PB: predicated region body
PF: predicated region fallthrough
CT: control target
= control target key end

     0   :  { %12 = vsyncpa [#allocation4], 0  ;;  %s4132_s0 = inlined_call_operand.vmem [shape: f32[2,4,256], index: 0, kind: input, shape index: {}]   ;;  %s4133_s1 = inlined_call_operand.vmem [shape: f32[9,32,4], index: 1, kind: input, shape index: {}]   ;;  %s4134_s2 = inlined_call_operand.vmem [shape: f32[32,1], index: 2, kind: input, shape index: {}]   ;;  %s4135_s3 = inlined_call_operand.vmem [shape: f32[4,4,64], index: 3, kind: input, shape index: {}]   ;;  %s4136_s4 = inlined_call_operand.vmem [shape: f32[4,1], index: 4, kind: input, shape index: {}]   ;;  %s4137_s5 = inlined_call_operand.vmem [shape: f32[4,4], index: 5, kind: input, shape index: {}]   ;;  %s4138_s6 = inlined_call_operand.vmem [shape: f32[4,1], index: 6, kind: input, shape index: {}]   ;;  %s4139_s7 = inlined_call_operand.hbm [shape: f32[2,4,4,256], index: 7, kind: output, shape index: {}]  }
   0x1   :  { %14 = vsyncpa [#allocation4 + $0x1], 0  ;;  %s3351_s24 = smov 0   ;;  %s3353_s25 = smov 0  }
   0x2   :  { %s3355_s26 = smov 0   ;;  %s3357_s27 = smov 0  }
   0x3 LB: > { %s3372_s28 = sadd.s32 4294967295, %s3296_s27   ;;  %s2674_s29 = sadd.s32 4294967294, %s3296_s27   ;;  %s3296_s27 = sphi %s3357_s27, %s4157_s27   ;;  %s3292_s26 = sphi %s3355_s26, %s4156_s26   ;;  %s3288_s25 = sphi %s3353_s25, %s4155_s25   ;;  %s3284_s24 = sphi %s3351_s24, %s4154_s24  }
   0x4   : > { %s3376_s30 = sadd.s32 1, %s3296_s27   ;;  %s179_s8 = sadd.s32 1, %s3292_s26 }
   0x5   : > { %s176_s9 = ssub.s32 %s3296_s27, %s3376_s30  ;;  %p189_p0 = scmp.ne.s32.totalorder %s3292_s26, %s3288_s25 }
   0x6   : > { %p177_p1 = scmp.eq.s32.totalorder %s176_s9, 0  ;;  %p190_p2 = scmp.eq.s32.totalorder %s3372_s28, 1 }
   0x7   : > { %p195_p3 = scmp.ne.s32.totalorder %s3288_s25, %s3284_s24  ;;  %p196_p4 = scmp.eq.s32.totalorder %s2674_s29, 1 }
   0x8   : > { %s3387_s10 = scalar_select %p177_p1, %s3292_s26, %s179_s8  }
   0x9   : > { %p3389_p5 = por %p190_p2, %p189_p0  ;;  %p3393_p6 = por %p196_p4, %p195_p3 }
   0xa   : > { %p2677_p7 = scmp.ge.s32.totalorder %s3296_s27, 1  ;;  %p240_p8 = scmp.lt.s32.totalorder %s3296_s27, 3 }
   0xc   : > { %p241_p9 = pnand %p2677_p7, %p240_p8 }
   0xd   : > { %p272_p10 = scmp.lt.s32.totalorder (!%p241_p9), %s3372_s28, 1  ;;  %v3298_v0 = vmov (!%p241_p9), 0.0   ;;  %s3299_s18 = smov (!%p241_p9), 15   ;;  %v281_v9 = vlaneseq (!%p241_p9)  ;;  %v1493_v10 = vld [vmem:[%s4134_s2] sm:$0xff] (!%p241_p9)  ;;  %v1494_v11 = vld [vmem:[%s4134_s2 + $0x8] sm:$0xff] (!%p241_p9)  ;;  %v3307_v12 = vmov (!%p241_p9), 0  }
   0xe   : > { %244 = sbr.rel (%p241_p9) target bundleno = 1381 (0x565), region = 48  ;;  %277 = vst [vmem:[#allocation2] sm:$0xff] (!%p241_p9), %v3298_v0  ;;  %279 = vst [vmem:[#allocation2 + $0x18] sm:$0xff] (!%p241_p9), %v3298_v0  ;;  %677 = vmatprep.mubr.f32.mxu0 (!%p241_p9), %v3298_v0  ;;  %441 = vmatprep.mubr.f32.mxu1 (!%p241_p9), %v3298_v0  ;;  %s3300_s19 = smov (!%p241_p9), 1   ;;  %vm583_vm0 = vcmask (!%p241_p9), 121856   ;;  %vm716_vm2 = vcmask (!%p241_p9), 7168  }
   0xf   : > { %s3301_s20 = smov (!%p241_p9), 127   ;;  %s3302_s21 = smov (!%p241_p9), 113   ;;  %3011 = vset.pattern.permute.xlu0 (!%p241_p9), %v3307_v12  ;;  %3012 = vset.pattern.permute.xlu1 (!%p241_p9), %v3307_v12  ;;  %v282_v13 = vand.u32 (!%p241_p9), 127, %v281_v9  ;;  %vm372_vm4 = vcmask (!%p241_p9), 1043456   ;;  %vm359_vm6 = vcmask (!%p241_p9), 31744   ;;  %v2697_v29 = vld [vmem:[%s4133_s1 + $0x40] sm:$0xff] (!%p241_p9) }
  0x10   : > { %s3303_s22 = smov (!%p241_p9), 16   ;;  %s3304_s23 = smov (!%p241_p9), 112   ;;  %v2698_v37 = vld [vmem:[%s4133_s1 + $0x48] sm:$0xff] (!%p241_p9)  ;;  %v2699_v40 = vld [vmem:[%s4133_s1 + $0x50] sm:$0xff] (!%p241_p9)  ;;  %v2700_v43 = vld [vmem:[%s4133_s1 + $0x58] sm:$0xff] (!%p241_p9)  ;;  %vm973_vm8 = vcmask (!%p241_p9), 1039360  }
  0x11   : > { %s3305_s29 = smov (!%p241_p9), 17   ;;  %s3306_s8 = smov (!%p241_p9), 111   ;;  %v283_v14 = vadd.s32 (!%p241_p9), 128, %v282_v13  ;;  %v288_v19 = vand.u32 (!%p241_p9), 15, %v282_v13  ;;  %v2707_v47 = vld [vmem:[%s4133_s1 + $0x60] sm:$0xff] (!%p241_p9)  ;;  %vm356_vm9 = vcmask (!%p241_p9), 130048  }
  0x12   : > { %v2708_v52 = vld [vmem:[%s4133_s1 + $0x68] sm:$0xff] (!%p241_p9)  ;;  %v2709_v55 = vld [vmem:[%s4133_s1 + $0x70] sm:$0xff] (!%p241_p9)  ;;  %v2681_v57 = vld [vmem:[%s4133_s1 + $0x20] sm:$0xff] (!%p241_p9)  ;;  %vm1106_vm10 = vcmask (!%p241_p9), 924672   ;;  %vm334_vm11 = vcmask (!%p241_p9), 138240   ;;  %vm1244_vm12 = vcmask (!%p241_p9), 916480  }
  0x13   : > { %v295_v16 = vand.u32 (!%p241_p9), 15, %v283_v14  ;;  %vm3455_vm3 = vcmp.lt.s32.totalorder (!%p241_p9), %v288_v19, 15  ;;  %vm3460_vm5 = vcmp.ge.s32.totalorder (!%p241_p9), %v288_v19, 1  ;;  %v2710_v59 = vld [vmem:[%s4133_s1 + $0x78] sm:$0xff] (!%p241_p9)  ;;  %v2682_v63 = vld [vmem:[%s4133_s1 + $0x28] sm:$0xff] (!%p241_p9)  ;;  %v2719_v13 = vld [vmem:[%s4133_s1 + $0x90] sm:$0xff] (!%p241_p9) }
  0x14   : > { %v2718_v9 = vld [vmem:[%s4133_s1 + $0x88] sm:$0xff] (!%p241_p9)  ;;  %v2727_v19 = vld [vmem:[%s4133_s1 + $0xa0] sm:$0xff] (!%p241_p9)  ;;  %vm1366_vm13 = vcmask (!%p241_p9), 908288   ;;  %vm3849_vm15 = vmpackc.low (!%p241_p9), %vm3460_vm5, %vm3460_vm5 }
  0x15   : > { %s273_s13 = scalar_select %p272_p10, %s3372_s28, 1  ;;  %v318_v3 = vld [vmem:[#allocation2] sm:$0xf]  ;;  %v963_v6 = vld [vmem:[#allocation2 + $0x18] sm:$0xf]  ;;  %vm3450_vm1 = vcmp.lt.s32.totalorder %v295_v16, 15 }
  0x16   : > { %577 = vrot.lane.b32.xlu1 %v318_v3, %s3299_s18  ;;  %vm3473_vm7 = vcmp.ge.s32.totalorder %v295_v16, 1  ;;  %v2720_v16 = vld [vmem:[%s4133_s1 + $0x98] sm:$0xff] }
  0x17   : > { %s2818_s14 = sshll.u32 %s273_s13, 3  ;;  %vm3842_vm14 = vmpackc.low %vm3473_vm7, %vm3473_vm7 }
  0x18   : > { %s276_s17 = scalar_lea.vmem %s4132_s0, %s2818_s14 }
  0x19   : > { %v312_v1 = vld [vmem:[%s276_s17] sm:$0xff]  ;;  %s2819_s17 = sshll.u32 %s3372_s28, 9  ;;  %s3308_s28 = smov [#allocation3]  }
  0x1a   : > { %316 = vst [vmem:[#allocation2 + $0x8] sm:$0xf] %v312_v1  ;;  %v314_v2 = vcombine.high %v312_v1, %v312_v1  ;;  %s4084_s13 = scalar_lea.hbm %s4139_s7, %s2819_s17 }
  0x1c   : > { %317 = vst [vmem:[#allocation2 + $0x10] sm:$0xf] %v314_v2 }
  0x21   : > { %v3409_v4 = vld [vmem:[#allocation2 + $0x8] sm:$0xf] }
  0x22   : > { %579 = vrot.lane.b32.xlu0 %v3409_v4, %s3299_s18  ;;  %712 = vrot.lane.b32.xlu1 %v3409_v4, %s3300_s19  ;;  %v961_v8 = vld [vmem:[#allocation2 + $0x8] sm:$0xf] }
  0x23   : > { %v3415_v5 = vld [vmem:[#allocation2 + $0x10] sm:$0xf] }
  0x24   : > { %v962_v7 = vld [vmem:[#allocation2 + $0x10] sm:$0xf] }
  0x26   : > { %581 = vrot.lane.b32.xlu0 %v3415_v5, %s3299_s18  ;;  %710 = vrot.lane.b32.xlu1 %v318_v3, %s3300_s19 }
  0x2a   : > { %714 = vrot.lane.b32.xlu0 %v3415_v5, %s3300_s19  ;;  %971 = vrot.lane.b32.xlu1 %v963_v6, %s3301_s20 }
  0x2e   : > { %969 = vrot.lane.b32.xlu0 %v962_v7, %s3301_s20  ;;  %1102 = vrot.lane.b32.xlu1 %v962_v7, %s3302_s21 }
  0x32   : > { %967 = vrot.lane.b32.xlu0 %v961_v8, %s3301_s20  ;;  %1100 = vrot.lane.b32.xlu1 %v961_v8, %s3302_s21 }
  0x36   : > { %1104 = vrot.lane.b32.xlu0 %v963_v6, %s3302_s21  ;;  %354 = vrot.lane.b32.xlu1 %v3415_v5, %s3303_s22 }
  0x3a   : > { %352 = vrot.lane.b32.xlu0 %v3409_v4, %s3303_s22  ;;  %1242 = vrot.lane.b32.xlu1 %v963_v6, %s3304_s23 }
  0x3e   : > { %1240 = vrot.lane.b32.xlu0 %v962_v7, %s3304_s23  ;;  %1238 = vrot.lane.b32.xlu1 %v961_v8, %s3304_s23 }
  0x42   : > { %350 = vrot.lane.b32.xlu0 %v318_v3, %s3303_s22  ;;  %332 = vrot.lane.b32.xlu1 %v3415_v5, %s3305_s29 }
  0x46   : > { %330 = vrot.lane.b32.xlu0 %v3409_v4, %s3305_s29  ;;  %1364 = vrot.lane.b32.xlu1 %v963_v6, %s3306_s8 }
  0x4a   : > { %1362 = vrot.lane.b32.xlu0 %v962_v7, %s3306_s8  ;;  %1360 = vrot.lane.b32.xlu1 %v961_v8, %s3306_s8  ;;  %v2683_v8 = vld [vmem:[%s4133_s1 + $0x30] sm:$0xff] }
  0x4e   : > { %328 = vrot.lane.b32.xlu0 %v318_v3, %s3305_s29  ;;  %1504 = vperm.xlu1 %3012, %v1494_v11   ;;  %v2717_v3 = vld [vmem:[%s4133_s1 + $0x80] sm:$0xff]  ;;  %v2684_v11 = vld [vmem:[%s4133_s1 + $0x38] sm:$0xff] }
  0x52   : > { %1499 = vperm.xlu0 %3011, %v1493_v10  }
  0x88   : > { %v578_v15 = vpop.permute.xlu1 %577 }
  0x94   : > { %v580_v17 = vpop.permute.xlu0 %579  ;;  %v713_v18 = vpop.permute.xlu1 %712 }
  0x95   : > { %v584_v21 = vsel %vm583_vm0, %v578_v15, %v580_v17  ;;  %v341_v15 = vld [vmem:[%s4133_s1] sm:$0xff] }
  0x96   : > { %v588_v30 = vsel %vm3455_vm3, %v584_v21, 0.0 }
  0x98   : > { %v582_v22 = vpop.permute.xlu0 %581  ;;  %v711_v24 = vpop.permute.xlu1 %710 }
  0x99   : > { %v585_v25 = vsel %vm583_vm0, %v580_v17, %v582_v22  ;;  %v717_v27 = vsel %vm716_vm2, %v711_v24, %v713_v18  ;;  %v343_v24 = vld [vmem:[%s4133_s1 + $0x10] sm:$0xff] }
  0x9a   : > { %v589_v28 = vsel %vm3450_vm1, %v585_v25, 0.0  ;;  %v721_v34 = vsel %vm3460_vm5, %v717_v27, 0.0  ;;  %v2728_v25 = vld [vmem:[%s4133_s1 + $0xa8] sm:$0xff]  ;;  %v344_v27 = vld [vmem:[%s4133_s1 + $0x18] sm:$0xff] }
  0x9b   : > { %2701 = vmatprep.subr.msk.mxu0 %vm372_vm4, %v589_v28  ;;  %v2729_v28 = vld [vmem:[%s4133_s1 + $0xb0] sm:$0xff] }
  0x9c   : > { %2702 = vmatpush1.msk.msra.mxu0 %vm372_vm4, %v588_v30  ;;  %v715_v32 = vpop.permute.xlu0 %714  ;;  %v972_v33 = vpop.permute.xlu1 %971 }
  0x9d   : > { %v718_v35 = vsel %vm716_vm2, %v713_v18, %v715_v32  ;;  %2703 = vmatmul.mubr.msk.f32.vlgmr.msra.gmra.mrb[0].mxu0 %vm359_vm6, %v2697_v29  ;;  %v342_v18 = vld [vmem:[%s4133_s1 + $0x8] sm:$0xff]  ;;  %v2730_v29 = vld [vmem:[%s4133_s1 + $0xb8] sm:$0xff] }
  0x9e   : > { %v722_v36 = vsel %vm3473_vm7, %v718_v35, 0.0  ;;  %683 = vmatprep.mubr.f32.mxu0 %v3298_v0 }
  0x9f   : > { %2711 = vmatprep.subr.msk.mxu0 %vm372_vm4, %v722_v36  ;;  %v2738_v36 = vld [vmem:[%s4133_s1 + $0xc8] sm:$0xff] }
  0xa0   : > { %2712 = vmatpush1.msk.msra.mxu0 %vm372_vm4, %v721_v34  ;;  %v970_v38 = vpop.permute.xlu0 %969  ;;  %v3490_v39 = vpop.permute.xlu1 %1102 }
  0xa1   : > { %2704 = vmatmul.mubr.msk.f32.gmra.mrb[2].mxu0 %vm359_vm6, %v2698_v37  ;;  %2721 = vmatprep.subr.msk.mxu0 %vm372_vm4, %v3415_v5  ;;  %v975_v46 = vsel %vm973_vm8, %v970_v38, %v972_v33  ;;  %v2737_v33 = vld [vmem:[%s4133_s1 + $0xc0] sm:$0xff]  ;;  %v2739_v37 = vld [vmem:[%s4133_s1 + $0xd0] sm:$0xff] }
  0xa2   : > { %689 = vmatprep.mubr.f32.mxu0 %v3298_v0  ;;  %v979_v48 = vsel %vm3450_vm1, %v975_v46, 0.0  ;;  %v2757_v46 = vld [vmem:[%s4133_s1 + $0x100] sm:$0xff] }
  0xa4   : > { %v968_v41 = vpop.permute.xlu0 %967  ;;  %v3499_v42 = vpop.permute.xlu1 %1100 }
  0xa5   : > { %2705 = vmatmul.mubr.msk.f32.gmra.mrb[4].mxu0 %vm359_vm6, %v2699_v40  ;;  %v974_v61 = vsel %vm973_vm8, %v968_v41, %v970_v38  ;;  %v1107_v17 = vsel %vm1106_vm10, %v3499_v42, %v3490_v39  ;;  %v2747_v41 = vld [vmem:[%s4133_s1 + $0xe0] sm:$0xff] }
  0xa6   : > { %695 = vmatprep.mubr.f32.mxu0 %v3298_v0  ;;  %v978_v5 = vsel %vm3455_vm3, %v974_v61, 0.0  ;;  %v1111_v21 = vsel %vm3460_vm5, %v1107_v17, 0.0 }
  0xa8   : > { %v1105_v44 = vpop.permute.xlu0 %1104  ;;  %v355_v45 = vpop.permute.xlu1 %354 }
  0xa9   : > { %2706 = vmatmul.mubr.msk.f32.gmra.mrb[6].mxu0 %vm359_vm6, %v2700_v43  ;;  %v1108_v1 = vsel %vm1106_vm10, %v3490_v39, %v1105_v44  ;;  %v2740_v39 = vld [vmem:[%s4133_s1 + $0xd8] sm:$0xff]  ;;  %v2748_v43 = vld [vmem:[%s4133_s1 + $0xe8] sm:$0xff]  ;;  %v2749_v44 = vld [vmem:[%s4133_s1 + $0xf0] sm:$0xff] }
  0xaa   : > { %810 = vmatprep.mubr.f32.mxu0 %v3298_v0  ;;  %v1112_v6 = vsel %vm3473_vm7, %v1108_v1, 0.0 }
  0xac   : > { %v353_v49 = vpop.permute.xlu0 %352  ;;  %v3514_v50 = vpop.permute.xlu1 %1242 }
  0xad   : > { %2713 = vmatmul.mubr.msk.f32.vlgmr.msra.gmra.mrb[0].mxu0 %vm359_vm6, %v2707_v47  ;;  %v358_v51 = vsel %vm356_vm9, %v353_v49, %v355_v45  ;;  %v2750_v45 = vld [vmem:[%s4133_s1 + $0xf8] sm:$0xff]  ;;  %v2758_v47 = vld [vmem:[%s4133_s1 + $0x108] sm:$0xff] }
  0xae   : > { %816 = vmatprep.mubr.f32.mxu0 %v3298_v0  ;;  %2722 = vmatpush1.msk.msra.mxu0 %vm372_vm4, %v3409_v4 }
  0xaf   : > { %2731 = vmatprep.subr.msk.mxu0 %vm372_vm4, %v979_v48  ;;  %2685 = vmatprep.subr.msk.mxu1 %vm372_vm4, %v358_v51  ;;  %v2759_v48 = vld [vmem:[%s4133_s1 + $0x110] sm:$0xff] }
  0xb0   : > { %v3526_v53 = vpop.permute.xlu0 %1240  ;;  %v3528_v54 = vpop.permute.xlu1 %1238 }
  0xb1   : > { %2714 = vmatmul.mubr.msk.f32.gmra.mrb[2].mxu0 %vm359_vm6, %v2708_v52  ;;  %v1246_v22 = vsel %vm1244_vm12, %v3526_v53, %v3514_v50  ;;  %v1245_v34 = vsel %vm1244_vm12, %v3528_v54, %v3526_v53 }
  0xb2   : > { %822 = vmatprep.mubr.f32.mxu0 %v3298_v0 }
  0xb4   : > { %v351_v56 = vpop.permute.xlu0 %350  ;;  %v333_v60 = vpop.permute.xlu1 %332 }
  0xb5   : > { %2715 = vmatmul.mubr.msk.f32.gmra.mrb[4].mxu0 %vm359_vm6, %v2709_v55  ;;  %v357_v58 = vsel %vm356_vm9, %v351_v56, %v353_v49  ;;  %v2760_v49 = vld [vmem:[%s4133_s1 + $0x118] sm:$0xff] }
  0xb6   : > { %828 = vmatprep.mubr.f32.mxu0 %v3298_v0  ;;  %2686 = vmatpush1.msk.msra.mxu1 %vm372_vm4, %v357_v58 }
  0xb7   : > { %2687 = vmatmul.mubr.msk.f32.vlgmr.msra.gmra.mrb[0].mxu1 %vm359_vm6, %v2681_v57 }
  0xb8   : > { %v331_v62 = vpop.permute.xlu0 %330  ;;  %447 = vmatprep.mubr.f32.mxu1 %v3298_v0  ;;  %v1365_v30 = vpop.permute.xlu1 %1364 }
  0xb9   : > { %2716 = vmatmul.mubr.msk.f32.gmra.mrb[6].mxu0 %vm359_vm6, %v2710_v59  ;;  %v336_v2 = vsel %vm334_vm11, %v331_v62, %v333_v60 }
  0xba   : > { %928 = vmatprep.mubr.f32.mxu0 %v3298_v0  ;;  %v340_v4 = vsel %vm3473_vm7, %v336_v2, 0.0 }
  0xbb   : > { %2688 = vmatmul.mubr.msk.f32.gmra.mrb[2].mxu1 %vm359_vm6, %v2682_v63  ;;  %2691 = vmatprep.subr.msk.mxu1 %vm372_vm4, %v340_v4 }
  0xbc   : > { %v3567_v7 = vpop.permute.xlu0 %1362  ;;  %453 = vmatprep.mubr.f32.mxu1 %v3298_v0  ;;  %v1361_v38 = vpop.permute.xlu1 %1360 }
  0xbd   : > { %2723 = vmatmul.mubr.msk.f32.vlgmr.msra.gmra.mrb[0].mxu0 %vm359_vm6, %v2717_v3  ;;  %v1368_v32 = vsel %vm1366_vm13, %v3567_v7, %v1365_v30  ;;  %v1367_v40 = vsel %vm1366_vm13, %v1361_v38, %v3567_v7 }
  0xbe   : > { %2732 = vmatpush1.msk.msra.mxu0 %vm372_vm4, %v978_v5  ;;  %934 = vmatprep.mubr.f32.mxu0 %v3298_v0  ;;  %v1372_v35 = vsel %vm3450_vm1, %v1368_v32, 0.0  ;;  %v1371_v42 = vsel %vm3455_vm3, %v1367_v40, 0.0 }
  0xbf   : > { %2741 = vmatprep.subr.msk.mxu0 %vm372_vm4, %v1112_v6  ;;  %2689 = vmatmul.mubr.msk.f32.gmra.mrb[4].mxu1 %vm359_vm6, %v2683_v8 }
  0xc0   : > { %v329_v10 = vpop.permute.xlu0 %328  ;;  %459 = vmatprep.mubr.f32.mxu1 %v3298_v0 }
  0xc1   : > { %2724 = vmatmul.mubr.msk.f32.gmra.mrb[2].mxu0 %vm359_vm6, %v2718_v9  ;;  %v335_v12 = vsel %vm334_vm11, %v329_v10, %v331_v62 }
  0xc2   : > { %940 = vmatprep.mubr.f32.mxu0 %v3298_v0  ;;  %v339_v14 = vsel %vm3460_vm5, %v335_v12, 0.0  ;;  %vm2884_vm5 = vmpackc.low %vm3455_vm3, %vm3455_vm3 }
  0xc3   : > { %2690 = vmatmul.mubr.msk.f32.gmra.mrb[6].mxu1 %vm359_vm6, %v2684_v11 }
  0xc4   : > { %2692 = vmatpush1.msk.msra.mxu1 %vm372_vm4, %v339_v14  ;;  %548 = vmatprep.mubr.f32.mxu1 %v3298_v0 }
  0xc5   : > { %2725 = vmatmul.mubr.msk.f32.gmra.mrb[4].mxu0 %vm359_vm6, %v2719_v13 }
  0xc6   : > { %946 = vmatprep.mubr.f32.mxu0 %v3298_v0 }
  0xc7   : > { %2693 = vmatmul.mubr.msk.f32.vlgmr.msra.gmra.mrb[0].mxu1 %vm359_vm6, %v341_v15 }
  0xc8   : > { %554 = vmatprep.mubr.f32.mxu1 %v3298_v0 }
  0xc9   : > { %2726 = vmatmul.mubr.msk.f32.gmra.mrb[6].mxu0 %vm359_vm6, %v2720_v16 }
  0xca   : > { %1067 = vmatprep.mubr.f32.mxu0 %v3298_v0 }
  0xcb   : > { %2694 = vmatmul.mubr.msk.f32.gmra.mrb[2].mxu1 %vm359_vm6, %v342_v18 }
  0xcc   : > { %560 = vmatprep.mubr.f32.mxu1 %v3298_v0 }
  0xcd   : > { %2733 = vmatmul.mubr.msk.f32.vlgmr.msra.gmra.mrb[0].mxu0 %vm359_vm6, %v2727_v19  ;;  %v1505_v3 = vpop.permute.xlu1 %1504 }
  0xce   : > { %2742 = vmatpush1.msk.msra.mxu0 %vm372_vm4, %v1111_v21  ;;  %1073 = vmatprep.mubr.f32.mxu0 %v3298_v0 }
  0xcf   : > { %2751 = vmatprep.subr.msk.mxu0 %vm372_vm4, %v1246_v22  ;;  %2695 = vmatmul.mubr.msk.f32.gmra.mrb[4].mxu1 %vm359_vm6, %v343_v24 }
  0xd0   : > { %566 = vmatprep.mubr.f32.mxu1 %v3298_v0 }
  0xd1   : > { %2734 = vmatmul.mubr.msk.f32.gmra.mrb[2].mxu0 %vm359_vm6, %v2728_v25  ;;  %v1500_v59 = vpop.permute.xlu0 %1499 }
  0xd2   : > { %1079 = vmatprep.mubr.f32.mxu0 %v3298_v0 }
  0xd3   : > { %2696 = vmatmul.mubr.msk.f32.gmra.mrb[6].mxu1 %vm359_vm6, %v344_v27 }
  0xd4   : > { %1704 = vmatprep.mubr.f32.mxu1 %v3298_v0 }
  0xd5   : > { %2735 = vmatmul.mubr.msk.f32.gmra.mrb[4].mxu0 %vm359_vm6, %v2729_v28 }
  0xd6   : > { %1085 = vmatprep.mubr.f32.mxu0 %v3298_v0 }
  0xd9   : > { %2736 = vmatmul.mubr.msk.f32.gmra.mrb[6].mxu0 %vm359_vm6, %v2730_v29 }
  0xda   : > { %1200 = vmatprep.mubr.f32.mxu0 %v3298_v0 }
  0xdd   : > { %2743 = vmatmul.mubr.msk.f32.vlgmr.msra.gmra.mrb[0].mxu0 %vm359_vm6, %v2737_v33 }
  0xde   : > { %2752 = vmatpush1.msk.msra.mxu0 %vm372_vm4, %v1245_v34  ;;  %1206 = vmatprep.mubr.f32.mxu0 %v3298_v0 }
  0xdf   : > { %2761 = vmatprep.subr.msk.mxu0 %vm372_vm4, %v1372_v35 }
  0xe1   : > { %2744 = vmatmul.mubr.msk.f32.gmra.mrb[2].mxu0 %vm359_vm6, %v2738_v36 }
  0xe2   : > { %1212 = vmatprep.mubr.f32.mxu0 %v3298_v0 }
  0xe5   : > { %2745 = vmatmul.mubr.msk.f32.gmra.mrb[4].mxu0 %vm359_vm6, %v2739_v37 }
  0xe6   : > { %1218 = vmatprep.mubr.f32.mxu0 %v3298_v0 }
  0xe9   : > { %2746 = vmatmul.mubr.msk.f32.gmra.mrb[6].mxu0 %vm359_vm6, %v2740_v39 }
  0xea   : > { %1327 = vmatprep.mubr.f32.mxu0 %v3298_v0 }
  0xed   : > { %2753 = vmatmul.mubr.msk.f32.vlgmr.msra.gmra.mrb[0].mxu0 %vm359_vm6, %v2747_v41 }
  0xee   : > { %2762 = vmatpush1.msk.msra.mxu0 %vm372_vm4, %v1371_v42  ;;  %1333 = vmatprep.mubr.f32.mxu0 %v3298_v0 }
  0xf1   : > { %2754 = vmatmul.mubr.msk.f32.gmra.mrb[2].mxu0 %vm359_vm6, %v2748_v43 }
  0xf2   : > { %1339 = vmatprep.mubr.f32.mxu0 %v3298_v0 }
  0xf5   : > { %2755 = vmatmul.mubr.msk.f32.gmra.mrb[4].mxu0 %vm359_vm6, %v2749_v44 }
  0xf6   : > { %1345 = vmatprep.mubr.f32.mxu0 %v3298_v0 }
  0xf9   : > { %2756 = vmatmul.mubr.msk.f32.gmra.mrb[6].mxu0 %vm359_vm6, %v2750_v45 }
  0xfa   : > { %1460 = vmatprep.mubr.f32.mxu0 %v3298_v0 }
  0xfd   : > { %2763 = vmatmul.mubr.msk.f32.vlgmr.msra.gmra.mrb[0].mxu0 %vm359_vm6, %v2757_v46 }
  0xfe   : > { %1466 = vmatprep.mubr.f32.mxu0 %v3298_v0 }
 0x101   : > { %2764 = vmatmul.mubr.msk.f32.gmra.mrb[2].mxu0 %vm359_vm6, %v2758_v47 }
 0x102   : > { %1472 = vmatprep.mubr.f32.mxu0 %v3298_v0 }
 0x105   : > { %2765 = vmatmul.mubr.msk.f32.gmra.mrb[4].mxu0 %vm359_vm6, %v2759_v48 }
 0x106   : > { %1478 = vmatprep.mubr.f32.mxu0 %v3298_v0 }
 0x109   : > { %2766 = vmatmul.mubr.msk.f32.gmra.mrb[6].mxu0 %vm359_vm6, %v2760_v49 }
 0x19a   : > { %v550_v50 = vpop.f32.mrb[0].mxu1 }
 0x19b   : > { %v552_v51 = vpop.f32.mrb[1].mxu1 }
 0x19e   : > { %v556_v52 = vpop.f32.mrb[2].mxu1 }
 0x19f   : > { %v558_v53 = vpop.f32.mrb[3].mxu1 }
 0x1a2   : > { %v562_v54 = vpop.f32.mrb[4].mxu1 }
 0x1a3   : > { %v564_v55 = vpop.f32.mrb[5].mxu1 }
 0x1a6   : > { %v568_v56 = vpop.f32.mrb[6].mxu1 }
 0x1a7   : > { %v570_v57 = vpop.f32.mrb[7].mxu1 }
 0x1d0   : > { %v1462_v58 = vpop.f32.mrb[0].mxu0 }
 0x1d1   : > { %v2896_v60 = vadd.f32 %v1462_v58, %v550_v50  ;;  %v1464_v61 = vpop.f32.mrb[1].mxu0 }
 0x1d2   : > { %v2897_v62 = vadd.f32 %v1464_v61, %v552_v51 }
 0x1d3   : > { %v1517_v63 = vadd.f32 %v2896_v60, %v1500_v59 }
 0x1d4   : > { %v1518_v1 = vadd.f32 %v2897_v62, %v1500_v59  ;;  %v1468_v2 = vpop.f32.mrb[2].mxu0 }
 0x1d5   : > { %v1529_v4 = vmul.f32 0.70710677, %v1517_v63  ;;  %v2898_v5 = vadd.f32 %v1468_v2, %v556_v52  ;;  %v1470_v6 = vpop.f32.mrb[3].mxu0  ;;  %v1525_v25 = vmul.f32 0.5, %v1517_v63 }
 0x1d6   : > { %v1530_v7 = vmul.f32 0.70710677, %v1518_v1  ;;  %v2899_v8 = vadd.f32 %v1470_v6, %v558_v53  ;;  %v1526_v28 = vmul.f32 0.5, %v1518_v1 }
 0x1d7   : > { %3209 = verf.f32 %v1529_v4  ;;  %v1519_v9 = vadd.f32 %v2898_v5, %v1505_v3 }
 0x1d8   : > { %3211 = verf.f32 %v1530_v7  ;;  %v1520_v10 = vadd.f32 %v2899_v8, %v1505_v3  ;;  %v1474_v11 = vpop.f32.mrb[4].mxu0 }
 0x1d9   : > { %v1531_v12 = vmul.f32 0.70710677, %v1519_v9  ;;  %v3726_v13 = vadd.f32 %v1474_v11, %v562_v54  ;;  %v1476_v14 = vpop.f32.mrb[5].mxu0  ;;  %v1527_v35 = vmul.f32 0.5, %v1519_v9 }
 0x1da   : > { %v1532_v15 = vmul.f32 0.70710677, %v1520_v10  ;;  %v3728_v16 = vadd.f32 %v1476_v14, %v564_v55  ;;  %v1528_v38 = vmul.f32 0.5, %v1520_v10 }
 0x1db   : > { %3213 = verf.f32 %v1531_v12 }
 0x1dc   : > { %3215 = verf.f32 %v1532_v15  ;;  %v1480_v17 = vpop.f32.mrb[6].mxu0 }
 0x1dd   : > { %v3730_v18 = vadd.f32 %v1480_v17, %v568_v56  ;;  %v1482_v19 = vpop.f32.mrb[7].mxu0 }
 0x1de   : > { %v3732_v21 = vadd.f32 %v1482_v19, %v570_v57 }
 0x1e1   : > { %v3210_v22 = vpop.eup %3209 }
 0x1e2   : > { %v3212_v24 = vpop.eup %3211  ;;  %v1537_v27 = vadd.f32 1.0, %v3210_v22 }
 0x1e3   : > { %v1538_v29 = vadd.f32 1.0, %v3212_v24 }
 0x1e4   : > { %v1541_v30 = vmul.f32 %v1537_v27, %v1525_v25 }
 0x1e5   : > { %v3214_v32 = vpop.eup %3213  ;;  %v1542_v33 = vmul.f32 %v1538_v29, %v1526_v28 }
 0x1e6   : > { %v3216_v34 = vpop.eup %3215  ;;  %1545 = vst [vmem:[#allocation2 + $0x8] sm:$0xff] %v1541_v30  ;;  %v1539_v36 = vadd.f32 1.0, %v3214_v32  ;;  %v3013_v37 = vpack.i.bf16 %v1541_v30, %v3298_v0 }
 0x1e7   : > { %1546 = vst [vmem:[#allocation2 + $0x10] sm:$0xff] %v1542_v33  ;;  %v1540_v39 = vadd.f32 1.0, %v3216_v34  ;;  %v3736_v40 = vpack.i.bf16 %v3298_v0, %v1542_v33  ;;  %v3738_v41 = vpack.i.bf16 %v1542_v33, %v1541_v30 }
 0x1e8   : > { %v1543_v42 = vmul.f32 %v1539_v36, %v1527_v35  ;;  %3014 = vrot.lane.b32.xlu1 %v3013_v37, %s3299_s18 }
 0x1e9   : > { %v1544_v43 = vmul.f32 %v1540_v39, %v1528_v38  ;;  %3019 = vrot.lane.b32.xlu0 %v3736_v40, %s3299_s18 }
 0x1ea   : > { %v3743_v44 = vpack.i.bf16 %v1543_v42, %v1541_v30  ;;  %v3745_v45 = vpack.c.bf16 %v1543_v42, %v1541_v30  ;;  %v3033_v49 = vpack.i.bf16 %v1543_v42, %v3298_v0 }
 0x1eb   : > { %v3023_v46 = vpack.i.bf16 %v1544_v43, %v1543_v42  ;;  %v3747_v47 = vpack.c.bf16 %v1544_v43, %v1542_v33  ;;  %v3753_v48 = vpack.i.bf16 %v3298_v0, %v1544_v43 }
 0x1ed   : > { %3029 = vrot.lane.b32.xlu0 %v3738_v41, %s3301_s20  ;;  %3024 = vrot.lane.b32.xlu1 %v3023_v46, %s3299_s18  ;;  %s3238_s18 = sshll.u32 %s3308_s28, 4  ;;  %s3239_s18 = int_to_ptr.vmem [resolvable:$false] %s3238_s18 }
 0x1f1   : > { %3039 = vrot.lane.b32.xlu0 %v3753_v48, %s3301_s20  ;;  %3034 = vrot.lane.b32.xlu1 %v3033_v49, %s3301_s20 }
 0x25a   : > { %v3015_v50 = vpop.permute.xlu1 %3014 }
 0x25b   : > { %v3017_v51 = vunpack.i.h.bf16 %v3015_v50  ;;  %v3016_v52 = vunpack.i.l.bf16 %v3015_v50  ;;  %v3020_v53 = vpop.permute.xlu0 %3019 }
 0x25c   : > { %v3021_v54 = vunpack.i.l.bf16 %v3020_v53  ;;  %v3022_v58 = vunpack.i.h.bf16 %v3020_v53 }
 0x25d   : > { %v1723_v55 = vsel %vm583_vm0, %v3016_v52, %v3017_v51 }
 0x25e   : > { %v1724_v56 = vsel %vm583_vm0, %v3017_v51, %v3021_v54  ;;  %v1731_v57 = vsel %vm3455_vm3, %v1723_v55, 0.0 }
 0x25f   : > { %v3030_v59 = vpop.permute.xlu0 %3029  ;;  %v3025_v60 = vpop.permute.xlu1 %3024  ;;  %v1732_v61 = vsel %vm3450_vm1, %v1724_v56, 0.0 }
 0x260   : > { %v3032_v62 = vunpack.i.h.bf16 %v3030_v59  ;;  %v3031_v63 = vunpack.i.l.bf16 %v3030_v59  ;;  %v3027_v1 = vunpack.i.h.bf16 %v3025_v60  ;;  %v3026_v2 = vunpack.i.l.bf16 %v3025_v60 }
 0x261   : > { %v3043_v3 = vpack.i.bf16 %v1732_v61, %v1731_v57 }
 0x262   : > { %v1725_v4 = vsel %vm583_vm0, %v3022_v58, %v3026_v2  ;;  %v1726_v5 = vsel %vm583_vm0, %v3026_v2, %v3027_v1  ;;  %v3773_v10 = vsel %vm973_vm8, %v3031_v63, %v3032_v62  ;;  %vm1636_vm0 = vcmask 523264  }
 0x263   : > { %3044 = vrot.lane.b32.xlu1 %v3043_v3, %s3304_s23  ;;  %v3040_v6 = vpop.permute.xlu0 %3039  ;;  %v3035_v7 = vpop.permute.xlu1 %3034  ;;  %v1733_v8 = vsel %vm3455_vm3, %v1725_v4, 0.0  ;;  %v1734_v9 = vsel %vm3450_vm1, %v1726_v5, 0.0  ;;  %v1767_v25 = vsel %vm3455_vm3, %v3773_v10, 0.0 }
 0x264   : > { %v3042_v11 = vunpack.i.h.bf16 %v3040_v6  ;;  %v3041_v12 = vunpack.i.l.bf16 %v3040_v6  ;;  %v3037_v14 = vunpack.i.h.bf16 %v3035_v7  ;;  %v3036_v15 = vunpack.i.l.bf16 %v3035_v7 }
 0x265   : > { %v3053_v17 = vpack.i.bf16 %v1734_v9, %v1733_v8 }
 0x266   : > { %v3776_v19 = vsel %vm973_vm8, %v3032_v62, %v3036_v15  ;;  %v3779_v22 = vsel %vm973_vm8, %v3037_v14, %v3041_v12  ;;  %v3782_v24 = vsel %vm973_vm8, %v3041_v12, %v3042_v11 }
 0x267   : > { %3054 = vrot.lane.b32.xlu0 %v3053_v17, %s3304_s23  ;;  %3049 = vrot.lane.b32.xlu1 %v3738_v41, %s3304_s23  ;;  %v1768_v27 = vsel %vm3450_vm1, %v3776_v19, 0.0  ;;  %v2883_v28 = vpack.c.bf16 %v3779_v22, %v3773_v10  ;;  %v2880_v30 = vpack.c.bf16 %v3782_v24, %v3776_v19  ;;  %v1769_v32 = vsel %vm3455_vm3, %v3779_v22, 0.0  ;;  %v2788_v22 = vld [vmem:[%s4135_s3 + $0xc] sm:$0xf] }
 0x268   : > { %v3063_v29 = vpack.i.bf16 %v1768_v27, %v1767_v25  ;;  %v1770_v33 = vsel %vm3450_vm1, %v3782_v24, 0.0 }
 0x269   : > { %v3068_v34 = vpack.i.bf16 %v1770_v33, %v1769_v32  ;;  %v2778_v32 = vld [vmem:[%s4135_s3 + $0x8] sm:$0xf] }
 0x26b   : > { %3059 = vrot.lane.b32.xlu0 %v3023_v46, %s3304_s23  ;;  %3064 = vrot.lane.b32.xlu1 %v3063_v29, %s3304_s23 }
 0x26f   : > { %3069 = vrot.lane.b32.xlu0 %v3068_v34, %s3304_s23  ;;  %3074 = vrot.lane.b32.xlu1 %v3738_v41, %s3305_s29 }
 0x273   : > { %3079 = vrot.lane.b32.xlu0 %v3023_v46, %s3305_s29  ;;  %3084 = vrot.lane.b32.xlu1 %v3298_v0, %s3305_s29 }
 0x277   : > { %3089 = vrot.lane.b32.xlu0 %v3738_v41, %s3303_s22  ;;  %3094 = vrot.lane.b32.xlu1 %v3023_v46, %s3303_s22 }
 0x27b   : > { %3099 = vrot.lane.b32.xlu0 %v3298_v0, %s3303_s22  ;;  %3104 = vrot.lane.b32.xlu1 %v3738_v41, %s3300_s19 }
 0x27f   : > { %3109 = vrot.lane.b32.xlu0 %v3023_v46, %s3300_s19  ;;  %3114 = vrot.lane.b32.xlu1 %v3298_v0, %s3300_s19  ;;  %s3240_s19 = scalar_lea.vmem %s3239_s18, 1024 }
 0x2d5   : > { %v3045_v35 = vpop.permute.xlu1 %3044 }
 0x2d6   : > { %v3047_v50 = vunpack.i.h.bf16 %v3045_v35  ;;  %v3046_v41 = vunpack.i.l.bf16 %v3045_v35 }
 0x2d8   : > { %v1783_v61 = vsel %vm1244_vm12, %v3046_v41, %v3047_v50 }
 0x2d9   : > { %v3055_v36 = vpop.permute.xlu0 %3054  ;;  %v3050_v37 = vpop.permute.xlu1 %3049  ;;  %v3128_v3 = vpack.i.bf16 %v3047_v50, %v1783_v61 }
 0x2da   : > { %v3057_v38 = vunpack.i.h.bf16 %v3055_v36  ;;  %v3056_v39 = vunpack.i.l.bf16 %v3055_v36  ;;  %v3052_v42 = vunpack.i.h.bf16 %v3050_v37  ;;  %v3051_v43 = vunpack.i.l.bf16 %v3050_v37 }
 0x2dc   : > { %v1793_v49 = vsel %vm1244_vm12, %v3051_v43, %v3052_v42  ;;  %v1784_v46 = vsel %vm1244_vm12, %v3056_v39, %v3057_v38  ;;  %v3133_v33 = vpack.i.bf16 %v3056_v39, %v3046_v41 }
 0x2dd   : > { %v3118_v51 = vpack.i.bf16 %v3052_v42, %v1793_v49  ;;  %v3060_v52 = vpop.permute.xlu0 %3059  ;;  %v3822_v53 = vpop.permute.xlu1 %3064  ;;  %v3138_v57 = vpack.i.bf16 %v3057_v38, %v1784_v46 }
 0x2de   : > { %v3062_v54 = vunpack.i.h.bf16 %v3060_v52  ;;  %v3061_v55 = vunpack.i.l.bf16 %v3060_v52  ;;  %v3067_v14 = vunpack.i.h.bf16 %v3822_v53  ;;  %v3066_v15 = vunpack.i.l.bf16 %v3822_v53 }
 0x2df   : > { %3119 = vrot.lane.b32.xlu1 %v3118_v51, %s3303_s22 }
 0x2e0   : > { %v1794_v56 = vsel %vm1244_vm12, %v3061_v55, %v3062_v54  ;;  %v3143_v4 = vpack.i.bf16 %v3061_v55, %v3051_v43  ;;  %v1807_v51 = vsel %vm1244_vm12, %v3066_v15, %v3067_v14 }
 0x2e1   : > { %v3123_v58 = vpack.i.bf16 %v3062_v54, %v1794_v56  ;;  %v3070_v59 = vpop.permute.xlu0 %3069  ;;  %v3075_v60 = vpop.permute.xlu1 %3074  ;;  %v3148_v46 = vpack.i.bf16 %v3067_v14, %v1807_v51  ;;  %v1496_v14 = vld [vmem:[%s4134_s2 + $0x18] sm:$0xff] }
 0x2e2   : > { %v3072_v62 = vunpack.i.h.bf16 %v3070_v59  ;;  %v3071_v63 = vunpack.i.l.bf16 %v3070_v59  ;;  %v3077_v1 = vunpack.i.h.bf16 %v3075_v60  ;;  %v3076_v2 = vunpack.i.l.bf16 %v3075_v60 }
 0x2e3   : > { %3124 = vrot.lane.b32.xlu0 %v3123_v58, %s3303_s22  ;;  %3139 = vrot.lane.b32.xlu1 %v3138_v57, %s3303_s22 }
 0x2e4   : > { %v1808_v5 = vsel %vm1244_vm12, %v3071_v63, %v3072_v62  ;;  %v1574_v17 = vsel %vm334_vm11, %v3076_v2, %v3077_v1  ;;  %v3158_v60 = vpack.i.bf16 %v3071_v63, %v3066_v15  ;;  %v1630_v15 = vld [vmem:[%s4136_s4] sm:$0xf] }
 0x2e5   : > { %v3080_v6 = vpop.permute.xlu0 %3079  ;;  %v3085_v7 = vpop.permute.xlu1 %3084  ;;  %v3153_v34 = vpack.i.bf16 %v3072_v62, %v1808_v5 }
 0x2e6   : > { %v3082_v8 = vunpack.i.h.bf16 %v3080_v6  ;;  %v3081_v9 = vunpack.i.l.bf16 %v3080_v6  ;;  %v3087_v11 = vunpack.i.h.bf16 %v3085_v7  ;;  %v3086_v12 = vunpack.i.l.bf16 %v3085_v7 }
 0x2e7   : > { %3144 = vrot.lane.b32.xlu1 %v3143_v4, %s3303_s22  ;;  %3129 = vrot.lane.b32.xlu0 %v3128_v3, %s3303_s22 }
 0x2e8   : > { %v1576_v25 = vsel %vm334_vm11, %v3081_v9, %v3082_v8  ;;  %v1575_v27 = vsel %vm334_vm11, %v3087_v11, %v3081_v9  ;;  %v1573_v29 = vsel %vm334_vm11, %v3086_v12, %v3076_v2  ;;  %v1629_v12 = vld [vmem:[%s4135_s3] sm:$0xf] }
 0x2e9   : > { %v2820_v35 = vpack.c.bf16 %v1576_v25, %v1574_v17  ;;  %v2823_v36 = vpack.c.bf16 %v1575_v27, %v1573_v29  ;;  %v3090_v37 = vpop.permute.xlu0 %3089  ;;  %v3095_v38 = vpop.permute.xlu1 %3094 }
 0x2ea   : > { %v3092_v43 = vunpack.i.h.bf16 %v3090_v37  ;;  %v3091_v31 = vunpack.i.l.bf16 %v3090_v37  ;;  %v3097_v49 = vunpack.i.h.bf16 %v3095_v38  ;;  %v3096_v50 = vunpack.i.l.bf16 %v3095_v38 }
 0x2eb   : > { %2822 = vmatprep.subr.msk.bf16.mxu1 %vm3842_vm14, %v2820_v35  ;;  %3154 = vrot.lane.b32.xlu1 %v3153_v34, %s3303_s22 }
 0x2ec   : > { %3134 = vrot.lane.b32.xlu0 %v3133_v33, %s3303_s22  ;;  %2825 = vmatpush1.bf16.msk.msra.mxu1 %vm3849_vm15, %v2823_v36  ;;  %v1622_v26 = vsel %vm356_vm9, %v3091_v31, %v3092_v43  ;;  %v1624_v39 = vsel %vm356_vm9, %v3096_v50, %v3097_v49 }
 0x2ed   : > { %v3100_v52 = vpop.permute.xlu0 %3099  ;;  %v3105_v53 = vpop.permute.xlu1 %3104  ;;  %v2826_v41 = vpack.c.bf16 %v1624_v39, %v1622_v26 }
 0x2ee   : > { %v3102_v54 = vunpack.i.h.bf16 %v3100_v52  ;;  %v3101_v55 = vunpack.i.l.bf16 %v3100_v52  ;;  %v3107_v58 = vunpack.i.h.bf16 %v3105_v53  ;;  %v3106_v59 = vunpack.i.l.bf16 %v3105_v53 }
 0x2ef   : > { %2827 = vmatprep.subr.bf16.mxu1 %v2826_v41  ;;  %3164 = vrot.lane.b32.xlu1 %v3736_v40, %s3302_s21 }
 0x2f0   : > { %v1621_v56 = vsel %vm356_vm9, %v3101_v55, %v3091_v31  ;;  %v1623_v57 = vsel %vm356_vm9, %v3102_v54, %v3096_v50  ;;  %3149 = vrot.lane.b32.xlu0 %v3148_v46, %s3303_s22  ;;  %v1598_v6 = vsel %vm716_vm2, %v3106_v59, %v3107_v58 }
 0x2f1   : > { %v2828_v61 = vpack.c.bf16 %v1623_v57, %v1621_v56  ;;  %v3110_v62 = vpop.permute.xlu0 %3109  ;;  %v3115_v1 = vpop.permute.xlu1 %3114 }
 0x2f2   : > { %v3112_v2 = vunpack.i.h.bf16 %v3110_v62  ;;  %v3111_v3 = vunpack.i.l.bf16 %v3110_v62  ;;  %v3117_v4 = vunpack.i.h.bf16 %v3115_v1  ;;  %v3116_v5 = vunpack.i.l.bf16 %v3115_v1 }
 0x2f3   : > { %2829 = vmatpush1.bf16.msra.mxu1 %v2828_v61  ;;  %3174 = vrot.lane.b32.xlu1 %v3743_v44, %s3302_s21 }
 0x2f4   : > { %v1600_v7 = vsel %vm716_vm2, %v3111_v3, %v3112_v2  ;;  %v1599_v8 = vsel %vm716_vm2, %v3117_v4, %v3111_v3  ;;  %v1597_v9 = vsel %vm716_vm2, %v3116_v5, %v3106_v59  ;;  %3159 = vrot.lane.b32.xlu0 %v3158_v60, %s3303_s22  ;;  %vm2881_vm2 = vmpackc.low %vm3450_vm1, %vm3450_vm1  ;;  %s269_s22 = sand.u32 1, %s3288_s25  }
 0x2f5   : > { %v3874_v63 = vpack.c.bf16 %v1600_v7, %v1598_v6  ;;  %v3876_v11 = vpack.c.bf16 %v1599_v8, %v1597_v9  ;;  %s2678_s29 = sshll.u32 %s269_s22, 5  ;;  %s4091_s14 = scalar_lea.sflag [#allocation4], %s269_s22 }
 0x2f6   : > { %s4060_s16 = scalar_lea.vmem [#allocation3], %s2678_s29 }
 0x2f7   : > { %2832 = vmatprep.subr.msk.bf16.mxu1 %vm3842_vm14, %v3874_v63  ;;  %3184 = vrot.lane.b32.xlu1 %v3753_v48, %s3304_s23 }
 0x2f8   : > { %3169 = vrot.lane.b32.xlu0 %v3753_v48, %s3302_s21  ;;  %2835 = vmatpush1.bf16.msk.msra.mxu1 %vm3849_vm15, %v3876_v11 }
 0x2f9   : > { %2837 = vmatprep.subr.bf16.mxu1 %v3747_v47 }
 0x2fb   : > { %3194 = vrot.lane.b32.xlu1 %v3736_v40, %s3306_s8 }
 0x2fc   : > { %3179 = vrot.lane.b32.xlu0 %v3736_v40, %s3304_s23  ;;  %2839 = vmatpush1.bf16.msra.mxu1 %v3745_v45  ;;  %v2174_v40 = vld [vmem:[%s4138_s6] sm:$0xf] }
 0x2fd   : > { %2841 = vmatprep.subr.bf16.mxu1 %v2826_v41 }
 0x2ff   : > { %3204 = vrot.lane.b32.xlu1 %v3743_v44, %s3306_s8  ;;  %2775 = vmatmul.mubr.msk.f32.vlgmr.msra.gmra.mrb[8].mxu1 %vm1636_vm0, %v1629_v12 }
 0x300   : > { %3189 = vrot.lane.b32.xlu0 %v3743_v44, %s3304_s23  ;;  %2843 = vmatpush1.bf16.msra.mxu1 %v2828_v61  ;;  %v1495_v44 = vld [vmem:[%s4134_s2 + $0x10] sm:$0xff]  ;;  %s2612_s23 = sshll.u32 %s4060_s16, 4  ;;  %s4086_s23 = int_to_ptr.vmem [resolvable:$true] %s2612_s23 }
 0x301   : > { %1938 = vmatprep.mubr.f32.mxu1 %v3298_v0  ;;  %s3234_s15 = scalar_lea.vmem %s4086_s23, 512  ;;  %p3241_p0 = scmp.lt.s32.totalorder %s4086_s23, %s3239_s18 }
 0x302   : > { %p3235_p11 = scmp.ne.s32.totalorder %s4086_s23, %s3234_s15  ;;  %p3242_p1 = scmp.lt.s32.totalorder %s3240_s19, %s3234_s15 }
 0x303   : > { %2177 = vperm.xlu1 %3012, %v2174_v40  }
 0x304   : > { %3199 = vrot.lane.b32.xlu0 %v3753_v48, %s3306_s8  ;;  %p3236_p12 = pnand %p3235_p11, %p3389_p5  ;;  %p3243_p2 = por %p3242_p1, %p3241_p0 }
 0x306   : > { %p3237_p13 = pneg %p3236_p12 }
 0x307   : > { %1514 = vperm.xlu1 %3012, %v1496_v14  }
 0x308   : > { %1633 = vperm.xlu0 %3011, %v1630_v15   ;;  %p3244_p3 = pnand %p3243_p2, %p3237_p13 }
 0x30c   : > { %1509 = vperm.xlu0 %3011, %v1495_v44  }
 0x351   : > { %v3120_v0 = vpop.permute.xlu1 %3119 }
 0x352   : > { %v3122_v38 = vunpack.i.h.bf16 %v3120_v0  ;;  %v3121_v43 = vunpack.i.l.bf16 %v3120_v0 }
 0x354   : > { %v1852_v54 = vsel %vm356_vm9, %v3121_v43, %v3122_v38 }
 0x355   : > { %v3125_v17 = vpop.permute.xlu0 %3124  ;;  %v3140_v25 = vpop.permute.xlu1 %3139 }
 0x356   : > { %v3142_v27 = vunpack.i.h.bf16 %v3140_v25  ;;  %v3141_v48 = vunpack.i.l.bf16 %v3140_v25  ;;  %v3127_v34 = vunpack.i.h.bf16 %v3125_v17  ;;  %v3126_v35 = vunpack.i.l.bf16 %v3125_v17 }
 0x358   : > { %v1850_v49 = vsel %vm356_vm9, %v3141_v48, %v3142_v27  ;;  %v1854_v39 = vsel %vm356_vm9, %v3126_v35, %v3127_v34 }
 0x359   : > { %v3145_v29 = vpop.permute.xlu1 %3144  ;;  %v3130_v33 = vpop.permute.xlu0 %3129  ;;  %v2848_v61 = vpack.c.bf16 %v1854_v39, %v1852_v54 }
 0x35a   : > { %v3132_v36 = vunpack.i.h.bf16 %v3130_v33  ;;  %v3131_v37 = vunpack.i.l.bf16 %v3130_v33  ;;  %v3147_v52 = vunpack.i.h.bf16 %v3145_v29  ;;  %v3146_v53 = vunpack.i.l.bf16 %v3145_v29 }
 0x35c   : > { %v1848_v31 = vsel %vm356_vm9, %v3131_v37, %v3132_v36  ;;  %v1853_v62 = vsel %vm356_vm9, %v3147_v52, %v3126_v35  ;;  %v1851_v1 = vsel %vm356_vm9, %v3146_v53, %v3121_v43  ;;  %v3940_v43 = vld [vmem:[#allocation2] sm:$0xff] }
 0x35d   : > { %v3155_v50 = vpop.permute.xlu1 %3154  ;;  %v2844_v51 = vpack.c.bf16 %v1850_v49, %v1848_v31  ;;  %v2850_v7 = vpack.c.bf16 %v1853_v62, %v1851_v1 }
 0x35e   : > { %v3135_v26 = vpop.permute.xlu0 %3134  ;;  %v3157_v55 = vunpack.i.h.bf16 %v3155_v50  ;;  %v3156_v56 = vunpack.i.l.bf16 %v3155_v50 }
 0x35f   : > { %v3137_v41 = vunpack.i.h.bf16 %v3135_v26  ;;  %v3136_v46 = vunpack.i.l.bf16 %v3135_v26  ;;  %2845 = vmatprep.subr.bf16.mxu1 %v2844_v51 }
 0x360   : > { %v1858_v6 = vsel %vm356_vm9, %v3156_v56, %v3157_v55 }
 0x361   : > { %v1849_v57 = vsel %vm356_vm9, %v3137_v41, %v3141_v48  ;;  %v1847_v58 = vsel %vm356_vm9, %v3136_v46, %v3131_v37  ;;  %v3165_v2 = vpop.permute.xlu1 %3164  ;;  %v2776_v48 = vld [vmem:[%s4135_s3 + $0x4] sm:$0xf] }
 0x362   : > { %v2846_v59 = vpack.c.bf16 %v1849_v57, %v1847_v58  ;;  %v3150_v60 = vpop.permute.xlu0 %3149  ;;  %v3167_v29 = vunpack.i.h.bf16 %v3165_v2  ;;  %v3166_v33 = vunpack.i.l.bf16 %v3165_v2 }
 0x363   : > { %v3152_v3 = vunpack.i.h.bf16 %v3150_v60  ;;  %v3151_v4 = vunpack.i.l.bf16 %v3150_v60 }
 0x364   : > { %2847 = vmatpush1.bf16.msra.mxu1 %v2846_v59  ;;  %v1958_v49 = vsel %vm1106_vm10, %v3166_v33, %v3167_v29 }
 0x365   : > { %2849 = vmatprep.subr.bf16.mxu1 %v2848_v61  ;;  %v1856_v5 = vsel %vm356_vm9, %v3151_v4, %v3152_v3  ;;  %v3175_v14 = vpop.permute.xlu1 %3174 }
 0x366   : > { %v3160_v8 = vpop.permute.xlu0 %3159  ;;  %v2852_v9 = vpack.c.bf16 %v1858_v6, %v1856_v5  ;;  %v3177_v31 = vunpack.i.h.bf16 %v3175_v14 }
 0x367   : > { %v3162_v12 = vunpack.i.h.bf16 %v3160_v8  ;;  %v3161_v40 = vunpack.i.l.bf16 %v3160_v8 }
 0x368   : > { %2851 = vmatpush1.bf16.msra.mxu1 %v2850_v7 }
 0x369   : > { %v1857_v15 = vsel %vm356_vm9, %v3162_v12, %v3156_v56  ;;  %v1855_v44 = vsel %vm356_vm9, %v3161_v40, %v3151_v4  ;;  %2853 = vmatprep.subr.bf16.mxu1 %v2852_v9  ;;  %v3185_v35 = vpop.permute.xlu1 %3184  ;;  %v2165_v12 = vld [vmem:[%s4137_s5] sm:$0xf] }
 0x36a   : > { %v2854_v0 = vpack.c.bf16 %v1857_v15, %v1855_v44  ;;  %v3170_v17 = vpop.permute.xlu0 %3169  ;;  %v3187_v50 = vunpack.i.h.bf16 %v3185_v35  ;;  %v3186_v51 = vunpack.i.l.bf16 %v3185_v35 }
 0x36b   : > { %v3172_v25 = vunpack.i.h.bf16 %v3170_v17  ;;  %v3171_v27 = vunpack.i.l.bf16 %v3170_v17 }
 0x36c   : > { %2855 = vmatpush1.bf16.msra.mxu1 %v2854_v0  ;;  %v1984_v55 = vsel %vm1244_vm12, %v3186_v51, %v3187_v50 }
 0x36d   : > { %2858 = vmatprep.subr.msk.bf16.mxu1 %vm3842_vm14, %v3874_v63  ;;  %v1960_v36 = vsel %vm1106_vm10, %v3171_v27, %v3172_v25  ;;  %v3176_v63 = vunpack.i.l.bf16 %v3175_v14  ;;  %v1959_v39 = vsel %vm1106_vm10, %v3177_v31, %v3171_v27  ;;  %v3195_v60 = vpop.permute.xlu1 %3194 }
 0x36e   : > { %v3180_v34 = vpop.permute.xlu0 %3179  ;;  %v2866_v52 = vpack.c.bf16 %v1960_v36, %v1958_v49  ;;  %v3196_v1 = vunpack.i.l.bf16 %v3195_v60 }
 0x36f   : > { %2777 = vmatmul.mubr.msk.f32.vlgmr.msra.gmra.mrb[10].mxu1 %vm1636_vm0, %v2776_v48  ;;  %v3182_v37 = vunpack.i.h.bf16 %v3180_v34  ;;  %v3181_v38 = vunpack.i.l.bf16 %v3180_v34  ;;  %v1957_v46 = vsel %vm1106_vm10, %v3176_v63, %v3166_v33 }
 0x370   : > { %2861 = vmatpush1.bf16.msk.msra.mxu1 %vm3849_vm15, %v3876_v11  ;;  %2058 = vmatprep.mubr.f32.mxu1 %v3940_v43  ;;  %v2869_v54 = vpack.c.bf16 %v1959_v39, %v1957_v46 }
 0x371   : > { %2863 = vmatprep.subr.bf16.mxu1 %v3747_v47  ;;  %v1982_v11 = vsel %vm1244_vm12, %v3181_v38, %v3182_v37  ;;  %v3205_v2 = vpop.permute.xlu1 %3204 }
 0x372   : > { %v3190_v26 = vpop.permute.xlu0 %3189  ;;  %v2872_v58 = vpack.c.bf16 %v1984_v55, %v1982_v11  ;;  %v3207_v19 = vunpack.i.h.bf16 %v3205_v2  ;;  %v3206_v24 = vunpack.i.l.bf16 %v3205_v2 }
 0x373   : > { %v3192_v53 = vunpack.i.h.bf16 %v3190_v26  ;;  %v3191_v41 = vunpack.i.l.bf16 %v3190_v26 }
 0x374   : > { %2865 = vmatpush1.bf16.msra.mxu1 %v3745_v45  ;;  %v2077_v5 = vsel %vm1366_vm13, %v3206_v24, %v3196_v1 }
 0x375   : > { %2868 = vmatprep.subr.msk.bf16.mxu1 %vm3842_vm14, %v2866_v52  ;;  %v1983_v56 = vsel %vm1244_vm12, %v3192_v53, %v3186_v51  ;;  %v1981_v57 = vsel %vm1244_vm12, %v3191_v41, %v3181_v38 }
 0x376   : > { %v2874_v59 = vpack.c.bf16 %v1983_v56, %v1981_v57  ;;  %v3200_v61 = vpop.permute.xlu0 %3199 }
 0x377   : > { %v3202_v62 = vunpack.i.h.bf16 %v3200_v61  ;;  %v3201_v42 = vunpack.i.l.bf16 %v3200_v61 }
 0x378   : > { %2871 = vmatpush1.bf16.msk.msra.mxu1 %vm3849_vm15, %v2869_v54 }
 0x379   : > { %2873 = vmatprep.subr.bf16.mxu1 %v2872_v58  ;;  %v2079_v3 = vsel %vm1366_vm13, %v3207_v19, %v3201_v42 }
 0x37a   : > { %v2893_v10 = vpack.c.bf16 %v2079_v3, %v2077_v5 }
 0x37c   : > { %2875 = vmatpush1.bf16.msra.mxu1 %v2874_v59 }
 0x37d   : > { %2877 = vmatprep.subr.bf16.mxu1 %v3747_v47  ;;  %v3197_v47 = vunpack.i.h.bf16 %v3195_v60 }
 0x37f   : > { %2787 = vmatmul.mubr.msk.f32.vlgmr.msra.gmra.mrb[12].mxu1 %vm1636_vm0, %v2778_v32 }
 0x380   : > { %2879 = vmatpush1.bf16.msra.mxu1 %v3745_v45  ;;  %2158 = vmatprep.mubr.f32.mxu1 %v3940_v43  ;;  %v2080_v45 = vsel %vm1366_vm13, %v3201_v42, %v3202_v62 }
 0x381   : > { %2882 = vmatprep.subr.msk.bf16.mxu1 %vm2881_vm2, %v2880_v30  ;;  %v2078_v30 = vsel %vm1366_vm13, %v3196_v1, %v3197_v47 }
 0x382   : > { %v2890_v4 = vpack.c.bf16 %v2080_v45, %v2078_v30  ;;  %v4050_v49 = vpop.permute.xlu1 %2177 }
 0x384   : > { %2885 = vmatpush1.bf16.msk.msra.mxu1 %vm2884_vm5, %v2883_v28 }
 0x385   : > { %2887 = vmatprep.subr.bf16.mxu1 %v2872_v58 }
 0x387   : > { %v1634_v28 = vpop.permute.xlu0 %1633 }
 0x388   : > { %2889 = vmatpush1.bf16.msra.mxu1 %v2874_v59 }
 0x389   : > { %2892 = vmatprep.subr.msk.bf16.mxu1 %vm2881_vm2, %v2890_v4 }
 0x38b   : > { %v1510_v41 = vpop.permute.xlu0 %1509 }
 0x38c   : > { %2895 = vmatpush1.bf16.msk.msra.mxu1 %vm2884_vm5, %v2893_v10  ;;  %v1521_v58 = vadd.f32 %v3726_v13, %v1510_v41  ;;  %v1522_v32 = vadd.f32 %v3728_v16, %v1510_v41 }
 0x38f   : > { %2797 = vmatmul.mubr.msk.f32.vlgmr.msra.gmra.mrb[14].mxu1 %vm1636_vm0, %v2788_v22 }
 0x390   : > { %2271 = vmatprep.mubr.f32.mxu1 %v3940_v43 }
 0x3d2   : > { %v1706_v6 = vpop.f32.mrb[8].mxu1 }
 0x3d3   : > { %v1707_v20 = vadd.f32 %v1706_v6, %v1634_v28  ;;  %v1708_v7 = vpop.f32.mrb[9].mxu1 }
 0x3d4   : > { %v4004_v8 = vadd.f32 %v1708_v7, %v1634_v28 }
 0x3d5   : > { %v2166_v23 = vmul.f32 %v1707_v20, %v1707_v20 }
 0x3d6   : > { %v2167_v9 = vmul.f32 %v4004_v8, %v4004_v8 }
 0x3d8   : > { %2798 = vmatprep.subr.msk.mxu1 %vm372_vm4, %v2167_v9 }
 0x3d9   : > { %2799 = vmatpush1.msk.msra.mxu1 %vm372_vm4, %v2166_v23  ;;  %v2564_v23 = vrot.slane %v1521_v58, 4 }
 0x3da   : > { %2800 = vmatmul.mubr.msk.f32.vlgmr.msra.gmra.mrb[16].mxu1 %vm359_vm6, %v2165_v12 }
 0x3db   : > { %2342 = vmatprep.mubr.f32.mxu1 %v3940_v43 }
 0x442   : > { %v1940_v40 = vpop.f32.mrb[10].mxu1 }
 0x443   : > { %v4015_v14 = vadd.f32 %v1940_v40, %v1634_v28  ;;  %v1942_v15 = vpop.f32.mrb[11].mxu1 }
 0x444   : > { %v4017_v44 = vadd.f32 %v1942_v15, %v1634_v28 }
 0x445   : > { %v2168_v17 = vmul.f32 %v4015_v14, %v4015_v14 }
 0x446   : > { %v2169_v0 = vmul.f32 %v4017_v44, %v4017_v44 }
 0x448   : > { %2801 = vmatprep.subr.msk.mxu1 %vm372_vm4, %v2169_v0 }
 0x449   : > { %2802 = vmatpush1.msk.msra.mxu1 %vm372_vm4, %v2168_v17 }
 0x44a   : > { %2803 = vmatmul.mubr.msk.f32.vlgmr.msra.gmra.mrb[18].mxu1 %vm359_vm6, %v2165_v12 }
 0x44b   : > { %2413 = vmatprep.mubr.f32.mxu1 %v3940_v43 }
 0x452   : > { %v2060_v25 = vpop.f32.mrb[12].mxu1 }
 0x453   : > { %v4027_v27 = vadd.f32 %v2060_v25, %v1634_v28  ;;  %v2062_v48 = vpop.f32.mrb[13].mxu1 }
 0x454   : > { %v4029_v29 = vadd.f32 %v2062_v48, %v1634_v28 }
 0x455   : > { %v2170_v34 = vmul.f32 %v4027_v27, %v4027_v27 }
 0x456   : > { %v2171_v33 = vmul.f32 %v4029_v29, %v4029_v29 }
 0x458   : > { %2804 = vmatprep.subr.msk.mxu1 %vm372_vm4, %v2171_v33 }
 0x459   : > { %2805 = vmatpush1.msk.msra.mxu1 %vm372_vm4, %v2170_v34 }
 0x45a   : > { %2806 = vmatmul.mubr.msk.f32.vlgmr.msra.gmra.mrb[20].mxu1 %vm359_vm6, %v2165_v12 }
 0x45b   : > { %2484 = vmatprep.mubr.f32.mxu1 %v3940_v43 }
 0x462   : > { %v2160_v35 = vpop.f32.mrb[14].mxu1 }
 0x463   : > { %v4039_v36 = vadd.f32 %v2160_v35, %v1634_v28  ;;  %v2162_v37 = vpop.f32.mrb[15].mxu1 }
 0x464   : > { %v4041_v38 = vadd.f32 %v2162_v37, %v1634_v28 }
 0x465   : > { %v2172_v63 = vmul.f32 %v4039_v36, %v4039_v36 }
 0x466   : > { %v2173_v31 = vmul.f32 %v4041_v38, %v4041_v38 }
 0x468   : > { %2807 = vmatprep.subr.msk.mxu1 %vm372_vm4, %v2173_v31 }
 0x469   : > { %2808 = vmatpush1.msk.msra.mxu1 %vm372_vm4, %v2172_v63 }
 0x46a   : > { %2809 = vmatmul.mubr.msk.f32.vlgmr.msra.gmra.mrb[22].mxu1 %vm359_vm6, %v2165_v12  ;;  %v2565_v12 = vrot.slane %v1522_v32, 4 }
 0x4ad   : > { %v2273_v43 = vpop.f32.mrb[16].mxu1 }
 0x4ae   : > { %v2274_v50 = vadd.f32 %v2273_v43, %v4050_v49  ;;  %v2275_v51 = vpop.f32.mrb[17].mxu1 }
 0x4af   : > { %v2276_v26 = vadd.f32 %v2275_v51, %v4050_v49 }
 0x4b0   : > { %3217 = vrsqrt.f32 %v2274_v50  ;;  %vm2493_vm1 = vcmp.eq.f32.partialorder %v2274_v50, inf  ;;  %v2496_v11 = vand.u32 2147483648, %v2274_v50  ;;  %vm2495_vm3 = vcmp.eq.f32.partialorder %v2274_v50, 0.0 }
 0x4b1   : > { %3219 = vrsqrt.f32 %v2276_v26  ;;  %vm2500_vm4 = vcmp.eq.f32.partialorder %v2276_v26, inf  ;;  %v2503_v55 = vand.u32 2147483648, %v2276_v26  ;;  %vm2502_vm6 = vcmp.eq.f32.partialorder %v2276_v26, 0.0 }
 0x4ba   : > { %v3218_v39 = vpop.eup %3217 }
 0x4bb   : > { %v3220_v52 = vpop.eup %3219  ;;  %v2492_v53 = vmul.f32 %v3218_v39, %v2274_v50 }
 0x4bc   : > { %v2499_v46 = vmul.f32 %v3220_v52, %v2276_v26 }
 0x4bd   : > { %v2494_v54 = vsel %vm2493_vm1, %v2274_v50, %v2492_v53 }
 0x4be   : > { %v2497_v56 = vsel %vm2495_vm3, %v2496_v11, %v2494_v54  ;;  %v2501_v57 = vsel %vm2500_vm4, %v2276_v26, %v2499_v46 }
 0x4bf   : > { %v2547_v59 = vmul.f32 %v2497_v56, %v1707_v20  ;;  %v2504_v60 = vsel %vm2502_vm6, %v2503_v55, %v2501_v57 }
 0x4c0   : > { %v2548_v61 = vmul.f32 %v2504_v60, %v4004_v8 }
 0x4c1   : > { %v2555_v62 = vadd.f32 %v2547_v59, %v1521_v58 }
 0x4c2   : > { %v2556_v42 = vadd.f32 %v2548_v61, %v1522_v32 }
 0x4c4   : > { %v2559_v47 = vcombine.low %v2555_v62, %v2556_v42 }
 0x4c6   : > { %2561 = vst [vmem:[%s4060_s16] sm:$0xff] %v2559_v47 }
 0x51d   : > { %v2344_v1 = vpop.f32.mrb[18].mxu1 }
 0x51e   : > { %v2345_v2 = vadd.f32 %v2344_v1, %v4050_v49  ;;  %v2346_v45 = vpop.f32.mrb[19].mxu1 }
 0x51f   : > { %v2347_v13 = vadd.f32 %v2346_v45, %v4050_v49 }
 0x520   : > { %3221 = vrsqrt.f32 %v2345_v2  ;;  %vm2507_vm7 = vcmp.eq.f32.partialorder %v2345_v2, inf  ;;  %v2510_v30 = vand.u32 2147483648, %v2345_v2  ;;  %vm2509_vm8 = vcmp.eq.f32.partialorder %v2345_v2, 0.0 }
 0x521   : > { %3223 = vrsqrt.f32 %v2347_v13  ;;  %vm2514_vm9 = vcmp.eq.f32.partialorder %v2347_v13, inf  ;;  %v2517_v5 = vand.u32 2147483648, %v2347_v13  ;;  %vm2516_vm10 = vcmp.eq.f32.partialorder %v2347_v13, 0.0 }
 0x52a   : > { %v3222_v16 = vpop.eup %3221 }
 0x52b   : > { %v3224_v19 = vpop.eup %3223  ;;  %v2506_v24 = vmul.f32 %v3222_v16, %v2345_v2 }
 0x52c   : > { %v2513_v3 = vmul.f32 %v3224_v19, %v2347_v13 }
 0x52d   : > { %v2508_v4 = vsel %vm2507_vm7, %v2345_v2, %v2506_v24  ;;  %v2415_v10 = vpop.f32.mrb[20].mxu1 }
 0x52e   : > { %v2511_v22 = vsel %vm2509_vm8, %v2510_v30, %v2508_v4  ;;  %v2515_v28 = vsel %vm2514_vm9, %v2347_v13, %v2513_v3  ;;  %v2416_v6 = vadd.f32 %v2415_v10, %v4050_v49  ;;  %v2417_v20 = vpop.f32.mrb[21].mxu1 }
 0x52f   : > { %v2549_v7 = vmul.f32 %v2511_v22, %v4015_v14  ;;  %v2518_v8 = vsel %vm2516_vm10, %v2517_v5, %v2515_v28  ;;  %v2418_v9 = vadd.f32 %v2417_v20, %v4050_v49  ;;  %v1515_v14 = vpop.permute.xlu1 %1514 }
 0x530   : > { %v2550_v40 = vmul.f32 %v2518_v8, %v4017_v44  ;;  %3225 = vrsqrt.f32 %v2416_v6  ;;  %vm2521_vm11 = vcmp.eq.f32.partialorder %v2416_v6, inf  ;;  %v2524_v34 = vand.u32 2147483648, %v2416_v6 }
 0x531   : > { %3227 = vrsqrt.f32 %v2418_v9  ;;  %v2568_v15 = vadd.f32 %v2564_v23, %v2549_v7  ;;  %vm2523_vm12 = vcmp.eq.f32.partialorder %v2416_v6, 0.0  ;;  %vm2528_vm13 = vcmp.eq.f32.partialorder %v2418_v9, inf }
 0x532   : > { %v2569_v0 = vadd.f32 %v2565_v12, %v2550_v40  ;;  %v2531_v31 = vand.u32 2147483648, %v2418_v9  ;;  %vm2530_vm14 = vcmp.eq.f32.partialorder %v2418_v9, 0.0  ;;  %v1523_v53 = vadd.f32 %v3730_v18, %v1515_v14 }
 0x533   : > { %v1524_v41 = vadd.f32 %v3732_v21, %v1515_v14 }
 0x534   : > { %v2572_v17 = vcombine.low %v2568_v15, %v2569_v0  ;;  %v2586_v60 = vrot.slane %v1523_v53, 4 }
 0x535   : > { %v2587_v62 = vrot.slane %v1524_v41, 4 }
 0x536   : > { %2810 = vst [vmem:[%s4060_s16 + $0x8] sm:$0xff] %v2572_v17 }
 0x53a   : > { %v3226_v25 = vpop.eup %3225 }
 0x53b   : > { %v3228_v48 = vpop.eup %3227  ;;  %v2520_v33 = vmul.f32 %v3226_v25, %v2416_v6 }
 0x53c   : > { %v2527_v35 = vmul.f32 %v3228_v48, %v2418_v9 }
 0x53d   : > { %v2522_v37 = vsel %vm2521_vm11, %v2416_v6, %v2520_v33  ;;  %v2486_v63 = vpop.f32.mrb[22].mxu1 }
 0x53e   : > { %v2525_v43 = vsel %vm2523_vm12, %v2524_v34, %v2522_v37  ;;  %v2529_v44 = vsel %vm2528_vm13, %v2418_v9, %v2527_v35  ;;  %v2487_v50 = vadd.f32 %v2486_v63, %v4050_v49  ;;  %v2488_v51 = vpop.f32.mrb[23].mxu1 }
 0x53f   : > { %v2551_v26 = vmul.f32 %v2525_v43, %v4027_v27  ;;  %v2532_v39 = vsel %vm2530_vm14, %v2531_v31, %v2529_v44  ;;  %v2489_v52 = vadd.f32 %v2488_v51, %v4050_v49 }
 0x540   : > { %v2552_v11 = vmul.f32 %v2532_v39, %v4029_v29  ;;  %3229 = vrsqrt.f32 %v2487_v50  ;;  %vm2535_vm15 = vcmp.eq.f32.partialorder %v2487_v50, inf  ;;  %v2538_v27 = vand.u32 2147483648, %v2487_v50 }
 0x541   : > { %3231 = vrsqrt.f32 %v2489_v52  ;;  %v2576_v46 = vadd.f32 %v2551_v26, %v1523_v53  ;;  %vm2537_vm0 = vcmp.eq.f32.partialorder %v2487_v50, 0.0  ;;  %vm2542_vm2 = vcmp.eq.f32.partialorder %v2489_v52, inf }
 0x542   : > { %v2577_v54 = vadd.f32 %v2552_v11, %v1524_v41  ;;  %v2545_v18 = vand.u32 2147483648, %v2489_v52  ;;  %vm2544_vm5 = vcmp.eq.f32.partialorder %v2489_v52, 0.0 }
 0x544   : > { %v2580_v55 = vcombine.low %v2576_v46, %v2577_v54 }
 0x546   : > { %2811 = vst [vmem:[%s4060_s16 + $0x10] sm:$0xff] %v2580_v55 }
 0x54a   : > { %v3230_v56 = vpop.eup %3229 }
 0x54b   : > { %v3232_v57 = vpop.eup %3231  ;;  %v2534_v58 = vmul.f32 %v3230_v56, %v2487_v50 }
 0x54c   : > { %v2541_v49 = vmul.f32 %v3232_v57, %v2489_v52 }
 0x54d   : > { %v2536_v59 = vsel %vm2535_vm15, %v2487_v50, %v2534_v58 }
 0x54e   : > { %v2539_v21 = vsel %vm2537_vm0, %v2538_v27, %v2536_v59  ;;  %v2543_v29 = vsel %vm2542_vm2, %v2489_v52, %v2541_v49 }
 0x54f   : > { %v2553_v32 = vmul.f32 %v2539_v21, %v4039_v36  ;;  %v2546_v61 = vsel %vm2544_vm5, %v2545_v18, %v2543_v29 }
 0x550   : > { %v2554_v42 = vmul.f32 %v2546_v61, %v4041_v38 }
 0x551   : > { %v2590_v47 = vadd.f32 %v2586_v60, %v2553_v32 }
 0x552   : > { %v2591_v1 = vadd.f32 %v2587_v62, %v2554_v42 }
 0x554   : > { %v2594_v2 = vcombine.low %v2590_v47, %v2591_v1 }
 0x556   : > { %2812 = vst [vmem:[%s4060_s16 + $0x18] sm:$0xff] %v2594_v2 }
 0x557   : > { %3247 = shalt.err (!%p3244_p3)
}
 0x558   : > { %s3248_s20 = scalar_lea.hbm %s4084_s13, 512  ;;  %s3252_s29 = scalar_lea.hbm %s4139_s7, 1024 }
 0x559   : > { %p3249_p4 = scmp.ne.s32.totalorder %s4084_s13, %s3248_s20  ;;  %p3253_p9 = scmp.lt.u32.totalorder %s4084_s13, %s4139_s7 }
 0x55a   : > { %p3254_p10 = scmp.lt.u32.totalorder %s3252_s29, %s3248_s20  ;;  %p3256_p12 = scmp.lt.u32.totalorder %s3248_s20, %s4084_s13 }
 0x55b   : > { %p3250_p7 = pnand %p3249_p4, %p3389_p5 }
 0x55c   : > { %p3255_p11 = por %p3254_p10, %p3253_p9 }
 0x55d   : > { %p3251_p8 = pneg %p3250_p7 }
 0x55e   : > { %p3257_p13 = por %p3256_p12, %p3255_p11 }
 0x560   : > { %p3258_p0 = pnand %p3257_p13, %p3251_p8 }
 0x562   : > { %3261 = shalt.err (!%p3258_p0)
}
 0x563   : > { %s3309_s9 = smov 128   ;;  %s3310_s8 = smov 8  }
 0x564   : > { %2960 = dma.vmem_to_hbm [thread:$0]  (%p3389_p5), %s4086_s23, 512, %s4084_s13, %s4091_s14, %s3309_s9, %s3309_s9, %s3310_s8  }
 0x565 PF: > { %p2966_p1 = scmp.ge.s32.totalorder %s3296_s27, 2  ;;  %s2627_s15 = sand.u32 1, %s3284_s24  }
 0x566   : > { %s2628_s28 = scalar_lea.sflag [#allocation4], %s2627_s15 }
 0x567   : > { %p2963_p2 = pnand %p2966_p1, %p3393_p6 }
 0x569   : > { %3279 = dma.done.wait (!%p2963_p2), %s2628_s28, 512  }
 0x56a   : > { %3281 = vsyncadd (!%p2963_p2), %s2628_s28, 4294966784  ;;  %p17_p3 = scmp.ge.s32.totalorder %s3376_s30, 4   ;;  %s4154_s24 = smov %s3288_s25 }
 0x56b   : > { %s4155_s25 = smov %s3292_s26  ;;  %s4156_s26 = smov %s3387_s10 }
 0x56c   : > { %s4157_s27 = smov %s3376_s30  ;;  %19 = sbr.rel (!%p17_p3) target bundleno = 3 (0x3), region = 97 }
 0x573   :  { %2633 = vsyncpa [#allocation4], 1 }
 0x574   :  { %2635 = vsyncpa [#allocation4 + $0x1], 1 }

// kernel: tpu_custom_call.1
= control target key start
LH: loop header
LB: loop body
LE: loop exit
PB: predicated region body
PF: predicated region fallthrough
CT: control target
= control target key end

     0   :  { %12 = vsyncpa [#allocation4], 0  ;;  %s4132_s0 = inlined_call_operand.vmem [shape: f32[2,4,256], index: 0, kind: input, shape index: {}]   ;;  %s4133_s1 = inlined_call_operand.vmem [shape: f32[9,32,4], index: 1, kind: input, shape index: {}]   ;;  %s4134_s2 = inlined_call_operand.vmem [shape: f32[32,1], index: 2, kind: input, shape index: {}]   ;;  %s4135_s3 = inlined_call_operand.vmem [shape: f32[4,4,64], index: 3, kind: input, shape index: {}]   ;;  %s4136_s4 = inlined_call_operand.vmem [shape: f32[4,1], index: 4, kind: input, shape index: {}]   ;;  %s4137_s5 = inlined_call_operand.vmem [shape: f32[4,4], index: 5, kind: input, shape index: {}]   ;;  %s4138_s6 = inlined_call_operand.vmem [shape: f32[4,1], index: 6, kind: input, shape index: {}]   ;;  %s4139_s7 = inlined_call_operand.hbm [shape: f32[2,4,4,256], index: 7, kind: output, shape index: {}]  }
   0x1   :  { %14 = vsyncpa [#allocation4 + $0x1], 0  ;;  %s3351_s24 = smov 0   ;;  %s3353_s25 = smov 0  }
   0x2   :  { %s3355_s26 = smov 0   ;;  %s3357_s27 = smov 0  }
   0x3 LB: > { %s3372_s28 = sadd.s32 4294967295, %s3296_s27   ;;  %s2674_s29 = sadd.s32 4294967294, %s3296_s27   ;;  %s3296_s27 = sphi %s3357_s27, %s4157_s27   ;;  %s3292_s26 = sphi %s3355_s26, %s4156_s26   ;;  %s3288_s25 = sphi %s3353_s25, %s4155_s25   ;;  %s3284_s24 = sphi %s3351_s24, %s4154_s24  }
   0x4   : > { %s3376_s30 = sadd.s32 1, %s3296_s27   ;;  %s179_s8 = sadd.s32 1, %s3292_s26 }
   0x5   : > { %s176_s9 = ssub.s32 %s3296_s27, %s3376_s30  ;;  %p189_p0 = scmp.ne.s32.totalorder %s3292_s26, %s3288_s25 }
   0x6   : > { %p177_p1 = scmp.eq.s32.totalorder %s176_s9, 0  ;;  %p190_p2 = scmp.eq.s32.totalorder %s3372_s28, 1 }
   0x7   : > { %p195_p3 = scmp.ne.s32.totalorder %s3288_s25, %s3284_s24  ;;  %p196_p4 = scmp.eq.s32.totalorder %s2674_s29, 1 }
   0x8   : > { %s3387_s10 = scalar_select %p177_p1, %s3292_s26, %s179_s8  }
   0x9   : > { %p3389_p5 = por %p190_p2, %p189_p0  ;;  %p3393_p6 = por %p196_p4, %p195_p3 }
   0xa   : > { %p2677_p7 = scmp.ge.s32.totalorder %s3296_s27, 1  ;;  %p240_p8 = scmp.lt.s32.totalorder %s3296_s27, 3 }
   0xc   : > { %p241_p9 = pnand %p2677_p7, %p240_p8 }
   0xd   : > { %p272_p10 = scmp.lt.s32.totalorder (!%p241_p9), %s3372_s28, 1  ;;  %v3298_v0 = vmov (!%p241_p9), 0.0   ;;  %s3299_s18 = smov (!%p241_p9), 15   ;;  %v281_v9 = vlaneseq (!%p241_p9)  ;;  %v1493_v10 = vld [vmem:[%s4134_s2] sm:$0xff] (!%p241_p9)  ;;  %v1494_v11 = vld [vmem:[%s4134_s2 + $0x8] sm:$0xff] (!%p241_p9)  ;;  %v3307_v12 = vmov (!%p241_p9), 0  }
   0xe   : > { %244 = sbr.rel (%p241_p9) target bundleno = 1381 (0x565), region = 48  ;;  %277 = vst [vmem:[#allocation2] sm:$0xff] (!%p241_p9), %v3298_v0  ;;  %279 = vst [vmem:[#allocation2 + $0x18] sm:$0xff] (!%p241_p9), %v3298_v0  ;;  %677 = vmatprep.mubr.f32.mxu0 (!%p241_p9), %v3298_v0  ;;  %441 = vmatprep.mubr.f32.mxu1 (!%p241_p9), %v3298_v0  ;;  %s3300_s19 = smov (!%p241_p9), 1   ;;  %vm583_vm0 = vcmask (!%p241_p9), 121856   ;;  %vm716_vm2 = vcmask (!%p241_p9), 7168  }
   0xf   : > { %s3301_s20 = smov (!%p241_p9), 127   ;;  %s3302_s21 = smov (!%p241_p9), 113   ;;  %3011 = vset.pattern.permute.xlu0 (!%p241_p9), %v3307_v12  ;;  %3012 = vset.pattern.permute.xlu1 (!%p241_p9), %v3307_v12  ;;  %v282_v13 = vand.u32 (!%p241_p9), 127, %v281_v9  ;;  %vm372_vm4 = vcmask (!%p241_p9), 1043456   ;;  %vm359_vm6 = vcmask (!%p241_p9), 31744   ;;  %v2697_v29 = vld [vmem:[%s4133_s1 + $0x40] sm:$0xff] (!%p241_p9) }
  0x10   : > { %s3303_s22 = smov (!%p241_p9), 16   ;;  %s3304_s23 = smov (!%p241_p9), 112   ;;  %v2698_v37 = vld [vmem:[%s4133_s1 + $0x48] sm:$0xff] (!%p241_p9)  ;;  %v2699_v40 = vld [vmem:[%s4133_s1 + $0x50] sm:$0xff] (!%p241_p9)  ;;  %v2700_v43 = vld [vmem:[%s4133_s1 + $0x58] sm:$0xff] (!%p241_p9)  ;;  %vm973_vm8 = vcmask (!%p241_p9), 1039360  }
  0x11   : > { %s3305_s29 = smov (!%p241_p9), 17   ;;  %s3306_s8 = smov (!%p241_p9), 111   ;;  %v283_v14 = vadd.s32 (!%p241_p9), 128, %v282_v13  ;;  %v288_v19 = vand.u32 (!%p241_p9), 15, %v282_v13  ;;  %v2707_v47 = vld [vmem:[%s4133_s1 + $0x60] sm:$0xff] (!%p241_p9)  ;;  %vm356_vm9 = vcmask (!%p241_p9), 130048  }
  0x12   : > { %v2708_v52 = vld [vmem:[%s4133_s1 + $0x68] sm:$0xff] (!%p241_p9)  ;;  %v2709_v55 = vld [vmem:[%s4133_s1 + $0x70] sm:$0xff] (!%p241_p9)  ;;  %v2681_v57 = vld [vmem:[%s4133_s1 + $0x20] sm:$0xff] (!%p241_p9)  ;;  %vm1106_vm10 = vcmask (!%p241_p9), 924672   ;;  %vm334_vm11 = vcmask (!%p241_p9), 138240   ;;  %vm1244_vm12 = vcmask (!%p241_p9), 916480  }
  0x13   : > { %v295_v16 = vand.u32 (!%p241_p9), 15, %v283_v14  ;;  %vm3455_vm3 = vcmp.lt.s32.totalorder (!%p241_p9), %v288_v19, 15  ;;  %vm3460_vm5 = vcmp.ge.s32.totalorder (!%p241_p9), %v288_v19, 1  ;;  %v2710_v59 = vld [vmem:[%s4133_s1 + $0x78] sm:$0xff] (!%p241_p9)  ;;  %v2682_v63 = vld [vmem:[%s4133_s1 + $0x28] sm:$0xff] (!%p241_p9)  ;;  %v2719_v13 = vld [vmem:[%s4133_s1 + $0x90] sm:$0xff] (!%p241_p9) }
  0x14   : > { %v2718_v9 = vld [vmem:[%s4133_s1 + $0x88] sm:$0xff] (!%p241_p9)  ;;  %v2727_v19 = vld [vmem:[%s4133_s1 + $0xa0] sm:$0xff] (!%p241_p9)  ;;  %vm1366_vm13 = vcmask (!%p241_p9), 908288   ;;  %vm3849_vm15 = vmpackc.low (!%p241_p9), %vm3460_vm5, %vm3460_vm5 }
  0x15   : > { %s273_s13 = scalar_select %p272_p10, %s3372_s28, 1  ;;  %v318_v3 = vld [vmem:[#allocation2] sm:$0xf]  ;;  %v963_v6 = vld [vmem:[#allocation2 + $0x18] sm:$0xf]  ;;  %vm3450_vm1 = vcmp.lt.s32.totalorder %v295_v16, 15 }
  0x16   : > { %577 = vrot.lane.b32.xlu1 %v318_v3, %s3299_s18  ;;  %vm3473_vm7 = vcmp.ge.s32.totalorder %v295_v16, 1  ;;  %v2720_v16 = vld [vmem:[%s4133_s1 + $0x98] sm:$0xff] }
  0x17   : > { %s2818_s14 = sshll.u32 %s273_s13, 3  ;;  %vm3842_vm14 = vmpackc.low %vm3473_vm7, %vm3473_vm7 }
  0x18   : > { %s276_s17 = scalar_lea.vmem %s4132_s0, %s2818_s14 }
  0x19   : > { %v312_v1 = vld [vmem:[%s276_s17] sm:$0xff]  ;;  %s2819_s17 = sshll.u32 %s3372_s28, 9  ;;  %s3308_s28 = smov [#allocation3]  }
  0x1a   : > { %316 = vst [vmem:[#allocation2 + $0x8] sm:$0xf] %v312_v1  ;;  %v314_v2 = vcombine.high %v312_v1, %v312_v1  ;;  %s4084_s13 = scalar_lea.hbm %s4139_s7, %s2819_s17 }
  0x1c   : > { %317 = vst [vmem:[#allocation2 + $0x10] sm:$0xf] %v314_v2 }
  0x21   : > { %v3409_v4 = vld [vmem:[#allocation2 + $0x8] sm:$0xf] }
  0x22   : > { %579 = vrot.lane.b32.xlu0 %v3409_v4, %s3299_s18  ;;  %712 = vrot.lane.b32.xlu1 %v3409_v4, %s3300_s19  ;;  %v961_v8 = vld [vmem:[#allocation2 + $0x8] sm:$0xf] }
  0x23   : > { %v3415_v5 = vld [vmem:[#allocation2 + $0x10] sm:$0xf] }
  0x24   : > { %v962_v7 = vld [vmem:[#allocation2 + $0x10] sm:$0xf] }
  0x26   : > { %581 = vrot.lane.b32.xlu0 %v3415_v5, %s3299_s18  ;;  %710 = vrot.lane.b32.xlu1 %v318_v3, %s3300_s19 }
  0x2a   : > { %714 = vrot.lane.b32.xlu0 %v3415_v5, %s3300_s19  ;;  %971 = vrot.lane.b32.xlu1 %v963_v6, %s3301_s20 }
  0x2e   : > { %969 = vrot.lane.b32.xlu0 %v962_v7, %s3301_s20  ;;  %1102 = vrot.lane.b32.xlu1 %v962_v7, %s3302_s21 }
  0x32   : > { %967 = vrot.lane.b32.xlu0 %v961_v8, %s3301_s20  ;;  %1100 = vrot.lane.b32.xlu1 %v961_v8, %s3302_s21 }
  0x36   : > { %1104 = vrot.lane.b32.xlu0 %v963_v6, %s3302_s21  ;;  %354 = vrot.lane.b32.xlu1 %v3415_v5, %s3303_s22 }
  0x3a   : > { %352 = vrot.lane.b32.xlu0 %v3409_v4, %s3303_s22  ;;  %1242 = vrot.lane.b32.xlu1 %v963_v6, %s3304_s23 }
  0x3e   : > { %1240 = vrot.lane.b32.xlu0 %v962_v7, %s3304_s23  ;;  %1238 = vrot.lane.b32.xlu1 %v961_v8, %s3304_s23 }
  0x42   : > { %350 = vrot.lane.b32.xlu0 %v318_v3, %s3303_s22  ;;  %332 = vrot.lane.b32.xlu1 %v3415_v5, %s3305_s29 }
  0x46   : > { %330 = vrot.lane.b32.xlu0 %v3409_v4, %s3305_s29  ;;  %1364 = vrot.lane.b32.xlu1 %v963_v6, %s3306_s8 }
  0x4a   : > { %1362 = vrot.lane.b32.xlu0 %v962_v7, %s3306_s8  ;;  %1360 = vrot.lane.b32.xlu1 %v961_v8, %s3306_s8  ;;  %v2683_v8 = vld [vmem:[%s4133_s1 + $0x30] sm:$0xff] }
  0x4e   : > { %328 = vrot.lane.b32.xlu0 %v318_v3, %s3305_s29  ;;  %1504 = vperm.xlu1 %3012, %v1494_v11   ;;  %v2717_v3 = vld [vmem:[%s4133_s1 + $0x80] sm:$0xff]  ;;  %v2684_v11 = vld [vmem:[%s4133_s1 + $0x38] sm:$0xff] }
  0x52   : > { %1499 = vperm.xlu0 %3011, %v1493_v10  }
  0x88   : > { %v578_v15 = vpop.permute.xlu1 %577 }
  0x94   : > { %v580_v17 = vpop.permute.xlu0 %579  ;;  %v713_v18 = vpop.permute.xlu1 %712 }
  0x95   : > { %v584_v21 = vsel %vm583_vm0, %v578_v15, %v580_v17  ;;  %v341_v15 = vld [vmem:[%s4133_s1] sm:$0xff] }
  0x96   : > { %v588_v30 = vsel %vm3455_vm3, %v584_v21, 0.0 }
  0x98   : > { %v582_v22 = vpop.permute.xlu0 %581  ;;  %v711_v24 = vpop.permute.xlu1 %710 }
  0x99   : > { %v585_v25 = vsel %vm583_vm0, %v580_v17, %v582_v22  ;;  %v717_v27 = vsel %vm716_vm2, %v711_v24, %v713_v18  ;;  %v343_v24 = vld [vmem:[%s4133_s1 + $0x10] sm:$0xff] }
  0x9a   : > { %v589_v28 = vsel %vm3450_vm1, %v585_v25, 0.0  ;;  %v721_v34 = vsel %vm3460_vm5, %v717_v27, 0.0  ;;  %v2728_v25 = vld [vmem:[%s4133_s1 + $0xa8] sm:$0xff]  ;;  %v344_v27 = vld [vmem:[%s4133_s1 + $0x18] sm:$0xff] }
  0x9b   : > { %2701 = vmatprep.subr.msk.mxu0 %vm372_vm4, %v589_v28  ;;  %v2729_v28 = vld [vmem:[%s4133_s1 + $0xb0] sm:$0xff] }
  0x9c   : > { %2702 = vmatpush1.msk.msra.mxu0 %vm372_vm4, %v588_v30  ;;  %v715_v32 = vpop.permute.xlu0 %714  ;;  %v972_v33 = vpop.permute.xlu1 %971 }
  0x9d   : > { %v718_v35 = vsel %vm716_vm2, %v713_v18, %v715_v32  ;;  %2703 = vmatmul.mubr.msk.f32.vlgmr.msra.gmra.mrb[0].mxu0 %vm359_vm6, %v2697_v29  ;;  %v342_v18 = vld [vmem:[%s4133_s1 + $0x8] sm:$0xff]  ;;  %v2730_v29 = vld [vmem:[%s4133_s1 + $0xb8] sm:$0xff] }
  0x9e   : > { %v722_v36 = vsel %vm3473_vm7, %v718_v35, 0.0  ;;  %683 = vmatprep.mubr.f32.mxu0 %v3298_v0 }
  0x9f   : > { %2711 = vmatprep.subr.msk.mxu0 %vm372_vm4, %v722_v36  ;;  %v2738_v36 = vld [vmem:[%s4133_s1 + $0xc8] sm:$0xff] }
  0xa0   : > { %2712 = vmatpush1.msk.msra.mxu0 %vm372_vm4, %v721_v34  ;;  %v970_v38 = vpop.permute.xlu0 %969  ;;  %v3490_v39 = vpop.permute.xlu1 %1102 }
  0xa1   : > { %2704 = vmatmul.mubr.msk.f32.gmra.mrb[2].mxu0 %vm359_vm6, %v2698_v37  ;;  %2721 = vmatprep.subr.msk.mxu0 %vm372_vm4, %v3415_v5  ;;  %v975_v46 = vsel %vm973_vm8, %v970_v38, %v972_v33  ;;  %v2737_v33 = vld [vmem:[%s4133_s1 + $0xc0] sm:$0xff]  ;;  %v2739_v37 = vld [vmem:[%s4133_s1 + $0xd0] sm:$0xff] }
  0xa2   : > { %689 = vmatprep.mubr.f32.mxu0 %v3298_v0  ;;  %v979_v48 = vsel %vm3450_vm1, %v975_v46, 0.0  ;;  %v2757_v46 = vld [vmem:[%s4133_s1 + $0x100] sm:$0xff] }
  0xa4   : > { %v968_v41 = vpop.permute.xlu0 %967  ;;  %v3499_v42 = vpop.permute.xlu1 %1100 }
  0xa5   : > { %2705 = vmatmul.mubr.msk.f32.gmra.mrb[4].mxu0 %vm359_vm6, %v2699_v40  ;;  %v974_v61 = vsel %vm973_vm8, %v968_v41, %v970_v38  ;;  %v1107_v17 = vsel %vm1106_vm10, %v3499_v42, %v3490_v39  ;;  %v2747_v41 = vld [vmem:[%s4133_s1 + $0xe0] sm:$0xff] }
  0xa6   : > { %695 = vmatprep.mubr.f32.mxu0 %v3298_v0  ;;  %v978_v5 = vsel %vm3455_vm3, %v974_v61, 0.0  ;;  %v1111_v21 = vsel %vm3460_vm5, %v1107_v17, 0.0 }
  0xa8   : > { %v1105_v44 = vpop.permute.xlu0 %1104  ;;  %v355_v45 = vpop.permute.xlu1 %354 }
  0xa9   : > { %2706 = vmatmul.mubr.msk.f32.gmra.mrb[6].mxu0 %vm359_vm6, %v2700_v43  ;;  %v1108_v1 = vsel %vm1106_vm10, %v3490_v39, %v1105_v44  ;;  %v2740_v39 = vld [vmem:[%s4133_s1 + $0xd8] sm:$0xff]  ;;  %v2748_v43 = vld [vmem:[%s4133_s1 + $0xe8] sm:$0xff]  ;;  %v2749_v44 = vld [vmem:[%s4133_s1 + $0xf0] sm:$0xff] }
  0xaa   : > { %810 = vmatprep.mubr.f32.mxu0 %v3298_v0  ;;  %v1112_v6 = vsel %vm3473_vm7, %v1108_v1, 0.0 }
  0xac   : > { %v353_v49 = vpop.permute.xlu0 %352  ;;  %v3514_v50 = vpop.permute.xlu1 %1242 }
  0xad   : > { %2713 = vmatmul.mubr.msk.f32.vlgmr.msra.gmra.mrb[0].mxu0 %vm359_vm6, %v2707_v47  ;;  %v358_v51 = vsel %vm356_vm9, %v353_v49, %v355_v45  ;;  %v2750_v45 = vld [vmem:[%s4133_s1 + $0xf8] sm:$0xff]  ;;  %v2758_v47 = vld [vmem:[%s4133_s1 + $0x108] sm:$0xff] }
  0xae   : > { %816 = vmatprep.mubr.f32.mxu0 %v3298_v0  ;;  %2722 = vmatpush1.msk.msra.mxu0 %vm372_vm4, %v3409_v4 }
  0xaf   : > { %2731 = vmatprep.subr.msk.mxu0 %vm372_vm4, %v979_v48  ;;  %2685 = vmatprep.subr.msk.mxu1 %vm372_vm4, %v358_v51  ;;  %v2759_v48 = vld [vmem:[%s4133_s1 + $0x110] sm:$0xff] }
  0xb0   : > { %v3526_v53 = vpop.permute.xlu0 %1240  ;;  %v3528_v54 = vpop.permute.xlu1 %1238 }
  0xb1   : > { %2714 = vmatmul.mubr.msk.f32.gmra.mrb[2].mxu0 %vm359_vm6, %v2708_v52  ;;  %v1246_v22 = vsel %vm1244_vm12, %v3526_v53, %v3514_v50  ;;  %v1245_v34 = vsel %vm1244_vm12, %v3528_v54, %v3526_v53 }
  0xb2   : > { %822 = vmatprep.mubr.f32.mxu0 %v3298_v0 }
  0xb4   : > { %v351_v56 = vpop.permute.xlu0 %350  ;;  %v333_v60 = vpop.permute.xlu1 %332 }
  0xb5   : > { %2715 = vmatmul.mubr.msk.f32.gmra.mrb[4].mxu0 %vm359_vm6, %v2709_v55  ;;  %v357_v58 = vsel %vm356_vm9, %v351_v56, %v353_v49  ;;  %v2760_v49 = vld [vmem:[%s4133_s1 + $0x118] sm:$0xff] }
  0xb6   : > { %828 = vmatprep.mubr.f32.mxu0 %v3298_v0  ;;  %2686 = vmatpush1.msk.msra.mxu1 %vm372_vm4, %v357_v58 }
  0xb7   : > { %2687 = vmatmul.mubr.msk.f32.vlgmr.msra.gmra.mrb[0].mxu1 %vm359_vm6, %v2681_v57 }
  0xb8   : > { %v331_v62 = vpop.permute.xlu0 %330  ;;  %447 = vmatprep.mubr.f32.mxu1 %v3298_v0  ;;  %v1365_v30 = vpop.permute.xlu1 %1364 }
  0xb9   : > { %2716 = vmatmul.mubr.msk.f32.gmra.mrb[6].mxu0 %vm359_vm6, %v2710_v59  ;;  %v336_v2 = vsel %vm334_vm11, %v331_v62, %v333_v60 }
  0xba   : > { %928 = vmatprep.mubr.f32.mxu0 %v3298_v0  ;;  %v340_v4 = vsel %vm3473_vm7, %v336_v2, 0.0 }
  0xbb   : > { %2688 = vmatmul.mubr.msk.f32.gmra.mrb[2].mxu1 %vm359_vm6, %v2682_v63  ;;  %2691 = vmatprep.subr.msk.mxu1 %vm372_vm4, %v340_v4 }
  0xbc   : > { %v3567_v7 = vpop.permute.xlu0 %1362  ;;  %453 = vmatprep.mubr.f32.mxu1 %v3298_v0  ;;  %v1361_v38 = vpop.permute.xlu1 %1360 }
  0xbd   : > { %2723 = vmatmul.mubr.msk.f32.vlgmr.msra.gmra.mrb[0].mxu0 %vm359_vm6, %v2717_v3  ;;  %v1368_v32 = vsel %vm1366_vm13, %v3567_v7, %v1365_v30  ;;  %v1367_v40 = vsel %vm1366_vm13, %v1361_v38, %v3567_v7 }
  0xbe   : > { %2732 = vmatpush1.msk.msra.mxu0 %vm372_vm4, %v978_v5  ;;  %934 = vmatprep.mubr.f32.mxu0 %v3298_v0  ;;  %v1372_v35 = vsel %vm3450_vm1, %v1368_v32, 0.0  ;;  %v1371_v42 = vsel %vm3455_vm3, %v1367_v40, 0.0 }
  0xbf   : > { %2741 = vmatprep.subr.msk.mxu0 %vm372_vm4, %v1112_v6  ;;  %2689 = vmatmul.mubr.msk.f32.gmra.mrb[4].mxu1 %vm359_vm6, %v2683_v8 }
  0xc0   : > { %v329_v10 = vpop.permute.xlu0 %328  ;;  %459 = vmatprep.mubr.f32.mxu1 %v3298_v0 }
  0xc1   : > { %2724 = vmatmul.mubr.msk.f32.gmra.mrb[2].mxu0 %vm359_vm6, %v2718_v9  ;;  %v335_v12 = vsel %vm334_vm11, %v329_v10, %v331_v62 }
  0xc2   : > { %940 = vmatprep.mubr.f32.mxu0 %v3298_v0  ;;  %v339_v14 = vsel %vm3460_vm5, %v335_v12, 0.0  ;;  %vm2884_vm5 = vmpackc.low %vm3455_vm3, %vm3455_vm3 }
  0xc3   : > { %2690 = vmatmul.mubr.msk.f32.gmra.mrb[6].mxu1 %vm359_vm6, %v2684_v11 }
  0xc4   : > { %2692 = vmatpush1.msk.msra.mxu1 %vm372_vm4, %v339_v14  ;;  %548 = vmatprep.mubr.f32.mxu1 %v3298_v0 }
  0xc5   : > { %2725 = vmatmul.mubr.msk.f32.gmra.mrb[4].mxu0 %vm359_vm6, %v2719_v13 }
  0xc6   : > { %946 = vmatprep.mubr.f32.mxu0 %v3298_v0 }
  0xc7   : > { %2693 = vmatmul.mubr.msk.f32.vlgmr.msra.gmra.mrb[0].mxu1 %vm359_vm6, %v341_v15 }
  0xc8   : > { %554 = vmatprep.mubr.f32.mxu1 %v3298_v0 }
  0xc9   : > { %2726 = vmatmul.mubr.msk.f32.gmra.mrb[6].mxu0 %vm359_vm6, %v2720_v16 }
  0xca   : > { %1067 = vmatprep.mubr.f32.mxu0 %v3298_v0 }
  0xcb   : > { %2694 = vmatmul.mubr.msk.f32.gmra.mrb[2].mxu1 %vm359_vm6, %v342_v18 }
  0xcc   : > { %560 = vmatprep.mubr.f32.mxu1 %v3298_v0 }
  0xcd   : > { %2733 = vmatmul.mubr.msk.f32.vlgmr.msra.gmra.mrb[0].mxu0 %vm359_vm6, %v2727_v19  ;;  %v1505_v3 = vpop.permute.xlu1 %1504 }
  0xce   : > { %2742 = vmatpush1.msk.msra.mxu0 %vm372_vm4, %v1111_v21  ;;  %1073 = vmatprep.mubr.f32.mxu0 %v3298_v0 }
  0xcf   : > { %2751 = vmatprep.subr.msk.mxu0 %vm372_vm4, %v1246_v22  ;;  %2695 = vmatmul.mubr.msk.f32.gmra.mrb[4].mxu1 %vm359_vm6, %v343_v24 }
  0xd0   : > { %566 = vmatprep.mubr.f32.mxu1 %v3298_v0 }
  0xd1   : > { %2734 = vmatmul.mubr.msk.f32.gmra.mrb[2].mxu0 %vm359_vm6, %v2728_v25  ;;  %v1500_v59 = vpop.permute.xlu0 %1499 }
  0xd2   : > { %1079 = vmatprep.mubr.f32.mxu0 %v3298_v0 }
  0xd3   : > { %2696 = vmatmul.mubr.msk.f32.gmra.mrb[6].mxu1 %vm359_vm6, %v344_v27 }
  0xd4   : > { %1704 = vmatprep.mubr.f32.mxu1 %v3298_v0 }
  0xd5   : > { %2735 = vmatmul.mubr.msk.f32.gmra.mrb[4].mxu0 %vm359_vm6, %v2729_v28 }
  0xd6   : > { %1085 = vmatprep.mubr.f32.mxu0 %v3298_v0 }
  0xd9   : > { %2736 = vmatmul.mubr.msk.f32.gmra.mrb[6].mxu0 %vm359_vm6, %v2730_v29 }
  0xda   : > { %1200 = vmatprep.mubr.f32.mxu0 %v3298_v0 }
  0xdd   : > { %2743 = vmatmul.mubr.msk.f32.vlgmr.msra.gmra.mrb[0].mxu0 %vm359_vm6, %v2737_v33 }
  0xde   : > { %2752 = vmatpush1.msk.msra.mxu0 %vm372_vm4, %v1245_v34  ;;  %1206 = vmatprep.mubr.f32.mxu0 %v3298_v0 }
  0xdf   : > { %2761 = vmatprep.subr.msk.mxu0 %vm372_vm4, %v1372_v35 }
  0xe1   : > { %2744 = vmatmul.mubr.msk.f32.gmra.mrb[2].mxu0 %vm359_vm6, %v2738_v36 }
  0xe2   : > { %1212 = vmatprep.mubr.f32.mxu0 %v3298_v0 }
  0xe5   : > { %2745 = vmatmul.mubr.msk.f32.gmra.mrb[4].mxu0 %vm359_vm6, %v2739_v37 }
  0xe6   : > { %1218 = vmatprep.mubr.f32.mxu0 %v3298_v0 }
  0xe9   : > { %2746 = vmatmul.mubr.msk.f32.gmra.mrb[6].mxu0 %vm359_vm6, %v2740_v39 }
  0xea   : > { %1327 = vmatprep.mubr.f32.mxu0 %v3298_v0 }
  0xed   : > { %2753 = vmatmul.mubr.msk.f32.vlgmr.msra.gmra.mrb[0].mxu0 %vm359_vm6, %v2747_v41 }
  0xee   : > { %2762 = vmatpush1.msk.msra.mxu0 %vm372_vm4, %v1371_v42  ;;  %1333 = vmatprep.mubr.f32.mxu0 %v3298_v0 }
  0xf1   : > { %2754 = vmatmul.mubr.msk.f32.gmra.mrb[2].mxu0 %vm359_vm6, %v2748_v43 }
  0xf2   : > { %1339 = vmatprep.mubr.f32.mxu0 %v3298_v0 }
  0xf5   : > { %2755 = vmatmul.mubr.msk.f32.gmra.mrb[4].mxu0 %vm359_vm6, %v2749_v44 }
  0xf6   : > { %1345 = vmatprep.mubr.f32.mxu0 %v3298_v0 }
  0xf9   : > { %2756 = vmatmul.mubr.msk.f32.gmra.mrb[6].mxu0 %vm359_vm6, %v2750_v45 }
  0xfa   : > { %1460 = vmatprep.mubr.f32.mxu0 %v3298_v0 }
  0xfd   : > { %2763 = vmatmul.mubr.msk.f32.vlgmr.msra.gmra.mrb[0].mxu0 %vm359_vm6, %v2757_v46 }
  0xfe   : > { %1466 = vmatprep.mubr.f32.mxu0 %v3298_v0 }
 0x101   : > { %2764 = vmatmul.mubr.msk.f32.gmra.mrb[2].mxu0 %vm359_vm6, %v2758_v47 }
 0x102   : > { %1472 = vmatprep.mubr.f32.mxu0 %v3298_v0 }
 0x105   : > { %2765 = vmatmul.mubr.msk.f32.gmra.mrb[4].mxu0 %vm359_vm6, %v2759_v48 }
 0x106   : > { %1478 = vmatprep.mubr.f32.mxu0 %v3298_v0 }
 0x109   : > { %2766 = vmatmul.mubr.msk.f32.gmra.mrb[6].mxu0 %vm359_vm6, %v2760_v49 }
 0x19a   : > { %v550_v50 = vpop.f32.mrb[0].mxu1 }
 0x19b   : > { %v552_v51 = vpop.f32.mrb[1].mxu1 }
 0x19e   : > { %v556_v52 = vpop.f32.mrb[2].mxu1 }
 0x19f   : > { %v558_v53 = vpop.f32.mrb[3].mxu1 }
 0x1a2   : > { %v562_v54 = vpop.f32.mrb[4].mxu1 }
 0x1a3   : > { %v564_v55 = vpop.f32.mrb[5].mxu1 }
 0x1a6   : > { %v568_v56 = vpop.f32.mrb[6].mxu1 }
 0x1a7   : > { %v570_v57 = vpop.f32.mrb[7].mxu1 }
 0x1d0   : > { %v1462_v58 = vpop.f32.mrb[0].mxu0 }
 0x1d1   : > { %v2896_v60 = vadd.f32 %v1462_v58, %v550_v50  ;;  %v1464_v61 = vpop.f32.mrb[1].mxu0 }
 0x1d2   : > { %v2897_v62 = vadd.f32 %v1464_v61, %v552_v51 }
 0x1d3   : > { %v1517_v63 = vadd.f32 %v2896_v60, %v1500_v59 }
 0x1d4   : > { %v1518_v1 = vadd.f32 %v2897_v62, %v1500_v59  ;;  %v1468_v2 = vpop.f32.mrb[2].mxu0 }
 0x1d5   : > { %v1529_v4 = vmul.f32 0.70710677, %v1517_v63  ;;  %v2898_v5 = vadd.f32 %v1468_v2, %v556_v52  ;;  %v1470_v6 = vpop.f32.mrb[3].mxu0  ;;  %v1525_v25 = vmul.f32 0.5, %v1517_v63 }
 0x1d6   : > { %v1530_v7 = vmul.f32 0.70710677, %v1518_v1  ;;  %v2899_v8 = vadd.f32 %v1470_v6, %v558_v53  ;;  %v1526_v28 = vmul.f32 0.5, %v1518_v1 }
 0x1d7   : > { %3209 = verf.f32 %v1529_v4  ;;  %v1519_v9 = vadd.f32 %v2898_v5, %v1505_v3 }
 0x1d8   : > { %3211 = verf.f32 %v1530_v7  ;;  %v1520_v10 = vadd.f32 %v2899_v8, %v1505_v3  ;;  %v1474_v11 = vpop.f32.mrb[4].mxu0 }
 0x1d9   : > { %v1531_v12 = vmul.f32 0.70710677, %v1519_v9  ;;  %v3726_v13 = vadd.f32 %v1474_v11, %v562_v54  ;;  %v1476_v14 = vpop.f32.mrb[5].mxu0  ;;  %v1527_v35 = vmul.f32 0.5, %v1519_v9 }
 0x1da   : > { %v1532_v15 = vmul.f32 0.70710677, %v1520_v10  ;;  %v3728_v16 = vadd.f32 %v1476_v14, %v564_v55  ;;  %v1528_v38 = vmul.f32 0.5, %v1520_v10 }
 0x1db   : > { %3213 = verf.f32 %v1531_v12 }
 0x1dc   : > { %3215 = verf.f32 %v1532_v15  ;;  %v1480_v17 = vpop.f32.mrb[6].mxu0 }
 0x1dd   : > { %v3730_v18 = vadd.f32 %v1480_v17, %v568_v56  ;;  %v1482_v19 = vpop.f32.mrb[7].mxu0 }
 0x1de   : > { %v3732_v21 = vadd.f32 %v1482_v19, %v570_v57 }
 0x1e1   : > { %v3210_v22 = vpop.eup %3209 }
 0x1e2   : > { %v3212_v24 = vpop.eup %3211  ;;  %v1537_v27 = vadd.f32 1.0, %v3210_v22 }
 0x1e3   : > { %v1538_v29 = vadd.f32 1.0, %v3212_v24 }
 0x1e4   : > { %v1541_v30 = vmul.f32 %v1537_v27, %v1525_v25 }
 0x1e5   : > { %v3214_v32 = vpop.eup %3213  ;;  %v1542_v33 = vmul.f32 %v1538_v29, %v1526_v28 }
 0x1e6   : > { %v3216_v34 = vpop.eup %3215  ;;  %1545 = vst [vmem:[#allocation2 + $0x8] sm:$0xff] %v1541_v30  ;;  %v1539_v36 = vadd.f32 1.0, %v3214_v32  ;;  %v3013_v37 = vpack.i.bf16 %v1541_v30, %v3298_v0 }
 0x1e7   : > { %1546 = vst [vmem:[#allocation2 + $0x10] sm:$0xff] %v1542_v33  ;;  %v1540_v39 = vadd.f32 1.0, %v3216_v34  ;;  %v3736_v40 = vpack.i.bf16 %v3298_v0, %v1542_v33  ;;  %v3738_v41 = vpack.i.bf16 %v1542_v33, %v1541_v30 }
 0x1e8   : > { %v1543_v42 = vmul.f32 %v1539_v36, %v1527_v35  ;;  %3014 = vrot.lane.b32.xlu1 %v3013_v37, %s3299_s18 }
 0x1e9   : > { %v1544_v43 = vmul.f32 %v1540_v39, %v1528_v38  ;;  %3019 = vrot.lane.b32.xlu0 %v3736_v40, %s3299_s18 }
 0x1ea   : > { %v3743_v44 = vpack.i.bf16 %v1543_v42, %v1541_v30  ;;  %v3745_v45 = vpack.c.bf16 %v1543_v42, %v1541_v30  ;;  %v3033_v49 = vpack.i.bf16 %v1543_v42, %v3298_v0 }
 0x1eb   : > { %v3023_v46 = vpack.i.bf16 %v1544_v43, %v1543_v42  ;;  %v3747_v47 = vpack.c.bf16 %v1544_v43, %v1542_v33  ;;  %v3753_v48 = vpack.i.bf16 %v3298_v0, %v1544_v43 }
 0x1ed   : > { %3029 = vrot.lane.b32.xlu0 %v3738_v41, %s3301_s20  ;;  %3024 = vrot.lane.b32.xlu1 %v3023_v46, %s3299_s18  ;;  %s3238_s18 = sshll.u32 %s3308_s28, 4  ;;  %s3239_s18 = int_to_ptr.vmem [resolvable:$false] %s3238_s18 }
 0x1f1   : > { %3039 = vrot.lane.b32.xlu0 %v3753_v48, %s3301_s20  ;;  %3034 = vrot.lane.b32.xlu1 %v3033_v49, %s3301_s20 }
 0x25a   : > { %v3015_v50 = vpop.permute.xlu1 %3014 }
 0x25b   : > { %v3017_v51 = vunpack.i.h.bf16 %v3015_v50  ;;  %v3016_v52 = vunpack.i.l.bf16 %v3015_v50  ;;  %v3020_v53 = vpop.permute.xlu0 %3019 }
 0x25c   : > { %v3021_v54 = vunpack.i.l.bf16 %v3020_v53  ;;  %v3022_v58 = vunpack.i.h.bf16 %v3020_v53 }
 0x25d   : > { %v1723_v55 = vsel %vm583_vm0, %v3016_v52, %v3017_v51 }
 0x25e   : > { %v1724_v56 = vsel %vm583_vm0, %v3017_v51, %v3021_v54  ;;  %v1731_v57 = vsel %vm3455_vm3, %v1723_v55, 0.0 }
 0x25f   : > { %v3030_v59 = vpop.permute.xlu0 %3029  ;;  %v3025_v60 = vpop.permute.xlu1 %3024  ;;  %v1732_v61 = vsel %vm3450_vm1, %v1724_v56, 0.0 }
 0x260   : > { %v3032_v62 = vunpack.i.h.bf16 %v3030_v59  ;;  %v3031_v63 = vunpack.i.l.bf16 %v3030_v59  ;;  %v3027_v1 = vunpack.i.h.bf16 %v3025_v60  ;;  %v3026_v2 = vunpack.i.l.bf16 %v3025_v60 }
 0x261   : > { %v3043_v3 = vpack.i.bf16 %v1732_v61, %v1731_v57 }
 0x262   : > { %v1725_v4 = vsel %vm583_vm0, %v3022_v58, %v3026_v2  ;;  %v1726_v5 = vsel %vm583_vm0, %v3026_v2, %v3027_v1  ;;  %v3773_v10 = vsel %vm973_vm8, %v3031_v63, %v3032_v62  ;;  %vm1636_vm0 = vcmask 523264  }
 0x263   : > { %3044 = vrot.lane.b32.xlu1 %v3043_v3, %s3304_s23  ;;  %v3040_v6 = vpop.permute.xlu0 %3039  ;;  %v3035_v7 = vpop.permute.xlu1 %3034  ;;  %v1733_v8 = vsel %vm3455_vm3, %v1725_v4, 0.0  ;;  %v1734_v9 = vsel %vm3450_vm1, %v1726_v5, 0.0  ;;  %v1767_v25 = vsel %vm3455_vm3, %v3773_v10, 0.0 }
 0x264   : > { %v3042_v11 = vunpack.i.h.bf16 %v3040_v6  ;;  %v3041_v12 = vunpack.i.l.bf16 %v3040_v6  ;;  %v3037_v14 = vunpack.i.h.bf16 %v3035_v7  ;;  %v3036_v15 = vunpack.i.l.bf16 %v3035_v7 }
 0x265   : > { %v3053_v17 = vpack.i.bf16 %v1734_v9, %v1733_v8 }
 0x266   : > { %v3776_v19 = vsel %vm973_vm8, %v3032_v62, %v3036_v15  ;;  %v3779_v22 = vsel %vm973_vm8, %v3037_v14, %v3041_v12  ;;  %v3782_v24 = vsel %vm973_vm8, %v3041_v12, %v3042_v11 }
 0x267   : > { %3054 = vrot.lane.b32.xlu0 %v3053_v17, %s3304_s23  ;;  %3049 = vrot.lane.b32.xlu1 %v3738_v41, %s3304_s23  ;;  %v1768_v27 = vsel %vm3450_vm1, %v3776_v19, 0.0  ;;  %v2883_v28 = vpack.c.bf16 %v3779_v22, %v3773_v10  ;;  %v2880_v30 = vpack.c.bf16 %v3782_v24, %v3776_v19  ;;  %v1769_v32 = vsel %vm3455_vm3, %v3779_v22, 0.0  ;;  %v2788_v22 = vld [vmem:[%s4135_s3 + $0xc] sm:$0xf] }
 0x268   : > { %v3063_v29 = vpack.i.bf16 %v1768_v27, %v1767_v25  ;;  %v1770_v33 = vsel %vm3450_vm1, %v3782_v24, 0.0 }
 0x269   : > { %v3068_v34 = vpack.i.bf16 %v1770_v33, %v1769_v32  ;;  %v2778_v32 = vld [vmem:[%s4135_s3 + $0x8] sm:$0xf] }
 0x26b   : > { %3059 = vrot.lane.b32.xlu0 %v3023_v46, %s3304_s23  ;;  %3064 = vrot.lane.b32.xlu1 %v3063_v29, %s3304_s23 }
 0x26f   : > { %3069 = vrot.lane.b32.xlu0 %v3068_v34, %s3304_s23  ;;  %3074 = vrot.lane.b32.xlu1 %v3738_v41, %s3305_s29 }
 0x273   : > { %3079 = vrot.lane.b32.xlu0 %v3023_v46, %s3305_s29  ;;  %3084 = vrot.lane.b32.xlu1 %v3298_v0, %s3305_s29 }
 0x277   : > { %3089 = vrot.lane.b32.xlu0 %v3738_v41, %s3303_s22  ;;  %3094 = vrot.lane.b32.xlu1 %v3023_v46, %s3303_s22 }
 0x27b   : > { %3099 = vrot.lane.b32.xlu0 %v3298_v0, %s3303_s22  ;;  %3104 = vrot.lane.b32.xlu1 %v3738_v41, %s3300_s19 }
 0x27f   : > { %3109 = vrot.lane.b32.xlu0 %v3023_v46, %s3300_s19  ;;  %3114 = vrot.lane.b32.xlu1 %v3298_v0, %s3300_s19  ;;  %s3240_s19 = scalar_lea.vmem %s3239_s18, 1024 }
 0x2d5   : > { %v3045_v35 = vpop.permute.xlu1 %3044 }
 0x2d6   : > { %v3047_v50 = vunpack.i.h.bf16 %v3045_v35  ;;  %v3046_v41 = vunpack.i.l.bf16 %v3045_v35 }
 0x2d8   : > { %v1783_v61 = vsel %vm1244_vm12, %v3046_v41, %v3047_v50 }
 0x2d9   : > { %v3055_v36 = vpop.permute.xlu0 %3054  ;;  %v3050_v37 = vpop.permute.xlu1 %3049  ;;  %v3128_v3 = vpack.i.bf16 %v3047_v50, %v1783_v61 }
 0x2da   : > { %v3057_v38 = vunpack.i.h.bf16 %v3055_v36  ;;  %v3056_v39 = vunpack.i.l.bf16 %v3055_v36  ;;  %v3052_v42 = vunpack.i.h.bf16 %v3050_v37  ;;  %v3051_v43 = vunpack.i.l.bf16 %v3050_v37 }
 0x2dc   : > { %v1793_v49 = vsel %vm1244_vm12, %v3051_v43, %v3052_v42  ;;  %v1784_v46 = vsel %vm1244_vm12, %v3056_v39, %v3057_v38  ;;  %v3133_v33 = vpack.i.bf16 %v3056_v39, %v3046_v41 }
 0x2dd   : > { %v3118_v51 = vpack.i.bf16 %v3052_v42, %v1793_v49  ;;  %v3060_v52 = vpop.permute.xlu0 %3059  ;;  %v3822_v53 = vpop.permute.xlu1 %3064  ;;  %v3138_v57 = vpack.i.bf16 %v3057_v38, %v1784_v46 }
 0x2de   : > { %v3062_v54 = vunpack.i.h.bf16 %v3060_v52  ;;  %v3061_v55 = vunpack.i.l.bf16 %v3060_v52  ;;  %v3067_v14 = vunpack.i.h.bf16 %v3822_v53  ;;  %v3066_v15 = vunpack.i.l.bf16 %v3822_v53 }
 0x2df   : > { %3119 = vrot.lane.b32.xlu1 %v3118_v51, %s3303_s22 }
 0x2e0   : > { %v1794_v56 = vsel %vm1244_vm12, %v3061_v55, %v3062_v54  ;;  %v3143_v4 = vpack.i.bf16 %v3061_v55, %v3051_v43  ;;  %v1807_v51 = vsel %vm1244_vm12, %v3066_v15, %v3067_v14 }
 0x2e1   : > { %v3123_v58 = vpack.i.bf16 %v3062_v54, %v1794_v56  ;;  %v3070_v59 = vpop.permute.xlu0 %3069  ;;  %v3075_v60 = vpop.permute.xlu1 %3074  ;;  %v3148_v46 = vpack.i.bf16 %v3067_v14, %v1807_v51  ;;  %v1496_v14 = vld [vmem:[%s4134_s2 + $0x18] sm:$0xff] }
 0x2e2   : > { %v3072_v62 = vunpack.i.h.bf16 %v3070_v59  ;;  %v3071_v63 = vunpack.i.l.bf16 %v3070_v59  ;;  %v3077_v1 = vunpack.i.h.bf16 %v3075_v60  ;;  %v3076_v2 = vunpack.i.l.bf16 %v3075_v60 }
 0x2e3   : > { %3124 = vrot.lane.b32.xlu0 %v3123_v58, %s3303_s22  ;;  %3139 = vrot.lane.b32.xlu1 %v3138_v57, %s3303_s22 }
 0x2e4   : > { %v1808_v5 = vsel %vm1244_vm12, %v3071_v63, %v3072_v62  ;;  %v1574_v17 = vsel %vm334_vm11, %v3076_v2, %v3077_v1  ;;  %v3158_v60 = vpack.i.bf16 %v3071_v63, %v3066_v15  ;;  %v1630_v15 = vld [vmem:[%s4136_s4] sm:$0xf] }
 0x2e5   : > { %v3080_v6 = vpop.permute.xlu0 %3079  ;;  %v3085_v7 = vpop.permute.xlu1 %3084  ;;  %v3153_v34 = vpack.i.bf16 %v3072_v62, %v1808_v5 }
 0x2e6   : > { %v3082_v8 = vunpack.i.h.bf16 %v3080_v6  ;;  %v3081_v9 = vunpack.i.l.bf16 %v3080_v6  ;;  %v3087_v11 = vunpack.i.h.bf16 %v3085_v7  ;;  %v3086_v12 = vunpack.i.l.bf16 %v3085_v7 }
 0x2e7   : > { %3144 = vrot.lane.b32.xlu1 %v3143_v4, %s3303_s22  ;;  %3129 = vrot.lane.b32.xlu0 %v3128_v3, %s3303_s22 }
 0x2e8   : > { %v1576_v25 = vsel %vm334_vm11, %v3081_v9, %v3082_v8  ;;  %v1575_v27 = vsel %vm334_vm11, %v3087_v11, %v3081_v9  ;;  %v1573_v29 = vsel %vm334_vm11, %v3086_v12, %v3076_v2  ;;  %v1629_v12 = vld [vmem:[%s4135_s3] sm:$0xf] }
 0x2e9   : > { %v2820_v35 = vpack.c.bf16 %v1576_v25, %v1574_v17  ;;  %v2823_v36 = vpack.c.bf16 %v1575_v27, %v1573_v29  ;;  %v3090_v37 = vpop.permute.xlu0 %3089  ;;  %v3095_v38 = vpop.permute.xlu1 %3094 }
 0x2ea   : > { %v3092_v43 = vunpack.i.h.bf16 %v3090_v37  ;;  %v3091_v31 = vunpack.i.l.bf16 %v3090_v37  ;;  %v3097_v49 = vunpack.i.h.bf16 %v3095_v38  ;;  %v3096_v50 = vunpack.i.l.bf16 %v3095_v38 }
 0x2eb   : > { %2822 = vmatprep.subr.msk.bf16.mxu1 %vm3842_vm14, %v2820_v35  ;;  %3154 = vrot.lane.b32.xlu1 %v3153_v34, %s3303_s22 }
 0x2ec   : > { %3134 = vrot.lane.b32.xlu0 %v3133_v33, %s3303_s22  ;;  %2825 = vmatpush1.bf16.msk.msra.mxu1 %vm3849_vm15, %v2823_v36  ;;  %v1622_v26 = vsel %vm356_vm9, %v3091_v31, %v3092_v43  ;;  %v1624_v39 = vsel %vm356_vm9, %v3096_v50, %v3097_v49 }
 0x2ed   : > { %v3100_v52 = vpop.permute.xlu0 %3099  ;;  %v3105_v53 = vpop.permute.xlu1 %3104  ;;  %v2826_v41 = vpack.c.bf16 %v1624_v39, %v1622_v26 }
 0x2ee   : > { %v3102_v54 = vunpack.i.h.bf16 %v3100_v52  ;;  %v3101_v55 = vunpack.i.l.bf16 %v3100_v52  ;;  %v3107_v58 = vunpack.i.h.bf16 %v3105_v53  ;;  %v3106_v59 = vunpack.i.l.bf16 %v3105_v53 }
 0x2ef   : > { %2827 = vmatprep.subr.bf16.mxu1 %v2826_v41  ;;  %3164 = vrot.lane.b32.xlu1 %v3736_v40, %s3302_s21 }
 0x2f0   : > { %v1621_v56 = vsel %vm356_vm9, %v3101_v55, %v3091_v31  ;;  %v1623_v57 = vsel %vm356_vm9, %v3102_v54, %v3096_v50  ;;  %3149 = vrot.lane.b32.xlu0 %v3148_v46, %s3303_s22  ;;  %v1598_v6 = vsel %vm716_vm2, %v3106_v59, %v3107_v58 }
 0x2f1   : > { %v2828_v61 = vpack.c.bf16 %v1623_v57, %v1621_v56  ;;  %v3110_v62 = vpop.permute.xlu0 %3109  ;;  %v3115_v1 = vpop.permute.xlu1 %3114 }
 0x2f2   : > { %v3112_v2 = vunpack.i.h.bf16 %v3110_v62  ;;  %v3111_v3 = vunpack.i.l.bf16 %v3110_v62  ;;  %v3117_v4 = vunpack.i.h.bf16 %v3115_v1  ;;  %v3116_v5 = vunpack.i.l.bf16 %v3115_v1 }
 0x2f3   : > { %2829 = vmatpush1.bf16.msra.mxu1 %v2828_v61  ;;  %3174 = vrot.lane.b32.xlu1 %v3743_v44, %s3302_s21 }
 0x2f4   : > { %v1600_v7 = vsel %vm716_vm2, %v3111_v3, %v3112_v2  ;;  %v1599_v8 = vsel %vm716_vm2, %v3117_v4, %v3111_v3  ;;  %v1597_v9 = vsel %vm716_vm2, %v3116_v5, %v3106_v59  ;;  %3159 = vrot.lane.b32.xlu0 %v3158_v60, %s3303_s22  ;;  %vm2881_vm2 = vmpackc.low %vm3450_vm1, %vm3450_vm1  ;;  %s269_s22 = sand.u32 1, %s3288_s25  }
 0x2f5   : > { %v3874_v63 = vpack.c.bf16 %v1600_v7, %v1598_v6  ;;  %v3876_v11 = vpack.c.bf16 %v1599_v8, %v1597_v9  ;;  %s2678_s29 = sshll.u32 %s269_s22, 5  ;;  %s4091_s14 = scalar_lea.sflag [#allocation4], %s269_s22 }
 0x2f6   : > { %s4060_s16 = scalar_lea.vmem [#allocation3], %s2678_s29 }
 0x2f7   : > { %2832 = vmatprep.subr.msk.bf16.mxu1 %vm3842_vm14, %v3874_v63  ;;  %3184 = vrot.lane.b32.xlu1 %v3753_v48, %s3304_s23 }
 0x2f8   : > { %3169 = vrot.lane.b32.xlu0 %v3753_v48, %s3302_s21  ;;  %2835 = vmatpush1.bf16.msk.msra.mxu1 %vm3849_vm15, %v3876_v11 }
 0x2f9   : > { %2837 = vmatprep.subr.bf16.mxu1 %v3747_v47 }
 0x2fb   : > { %3194 = vrot.lane.b32.xlu1 %v3736_v40, %s3306_s8 }
 0x2fc   : > { %3179 = vrot.lane.b32.xlu0 %v3736_v40, %s3304_s23  ;;  %2839 = vmatpush1.bf16.msra.mxu1 %v3745_v45  ;;  %v2174_v40 = vld [vmem:[%s4138_s6] sm:$0xf] }
 0x2fd   : > { %2841 = vmatprep.subr.bf16.mxu1 %v2826_v41 }
 0x2ff   : > { %3204 = vrot.lane.b32.xlu1 %v3743_v44, %s3306_s8  ;;  %2775 = vmatmul.mubr.msk.f32.vlgmr.msra.gmra.mrb[8].mxu1 %vm1636_vm0, %v1629_v12 }
 0x300   : > { %3189 = vrot.lane.b32.xlu0 %v3743_v44, %s3304_s23  ;;  %2843 = vmatpush1.bf16.msra.mxu1 %v2828_v61  ;;  %v1495_v44 = vld [vmem:[%s4134_s2 + $0x10] sm:$0xff]  ;;  %s2612_s23 = sshll.u32 %s4060_s16, 4  ;;  %s4086_s23 = int_to_ptr.vmem [resolvable:$true] %s2612_s23 }
 0x301   : > { %1938 = vmatprep.mubr.f32.mxu1 %v3298_v0  ;;  %s3234_s15 = scalar_lea.vmem %s4086_s23, 512  ;;  %p3241_p0 = scmp.lt.s32.totalorder %s4086_s23, %s3239_s18 }
 0x302   : > { %p3235_p11 = scmp.ne.s32.totalorder %s4086_s23, %s3234_s15  ;;  %p3242_p1 = scmp.lt.s32.totalorder %s3240_s19, %s3234_s15 }
 0x303   : > { %2177 = vperm.xlu1 %3012, %v2174_v40  }
 0x304   : > { %3199 = vrot.lane.b32.xlu0 %v3753_v48, %s3306_s8  ;;  %p3236_p12 = pnand %p3235_p11, %p3389_p5  ;;  %p3243_p2 = por %p3242_p1, %p3241_p0 }
 0x306   : > { %p3237_p13 = pneg %p3236_p12 }
 0x307   : > { %1514 = vperm.xlu1 %3012, %v1496_v14  }
 0x308   : > { %1633 = vperm.xlu0 %3011, %v1630_v15   ;;  %p3244_p3 = pnand %p3243_p2, %p3237_p13 }
 0x30c   : > { %1509 = vperm.xlu0 %3011, %v1495_v44  }
 0x351   : > { %v3120_v0 = vpop.permute.xlu1 %3119 }
 0x352   : > { %v3122_v38 = vunpack.i.h.bf16 %v3120_v0  ;;  %v3121_v43 = vunpack.i.l.bf16 %v3120_v0 }
 0x354   : > { %v1852_v54 = vsel %vm356_vm9, %v3121_v43, %v3122_v38 }
 0x355   : > { %v3125_v17 = vpop.permute.xlu0 %3124  ;;  %v3140_v25 = vpop.permute.xlu1 %3139 }
 0x356   : > { %v3142_v27 = vunpack.i.h.bf16 %v3140_v25  ;;  %v3141_v48 = vunpack.i.l.bf16 %v3140_v25  ;;  %v3127_v34 = vunpack.i.h.bf16 %v3125_v17  ;;  %v3126_v35 = vunpack.i.l.bf16 %v3125_v17 }
 0x358   : > { %v1850_v49 = vsel %vm356_vm9, %v3141_v48, %v3142_v27  ;;  %v1854_v39 = vsel %vm356_vm9, %v3126_v35, %v3127_v34 }
 0x359   : > { %v3145_v29 = vpop.permute.xlu1 %3144  ;;  %v3130_v33 = vpop.permute.xlu0 %3129  ;;  %v2848_v61 = vpack.c.bf16 %v1854_v39, %v1852_v54 }
 0x35a   : > { %v3132_v36 = vunpack.i.h.bf16 %v3130_v33  ;;  %v3131_v37 = vunpack.i.l.bf16 %v3130_v33  ;;  %v3147_v52 = vunpack.i.h.bf16 %v3145_v29  ;;  %v3146_v53 = vunpack.i.l.bf16 %v3145_v29 }
 0x35c   : > { %v1848_v31 = vsel %vm356_vm9, %v3131_v37, %v3132_v36  ;;  %v1853_v62 = vsel %vm356_vm9, %v3147_v52, %v3126_v35  ;;  %v1851_v1 = vsel %vm356_vm9, %v3146_v53, %v3121_v43  ;;  %v3940_v43 = vld [vmem:[#allocation2] sm:$0xff] }
 0x35d   : > { %v3155_v50 = vpop.permute.xlu1 %3154  ;;  %v2844_v51 = vpack.c.bf16 %v1850_v49, %v1848_v31  ;;  %v2850_v7 = vpack.c.bf16 %v1853_v62, %v1851_v1 }
 0x35e   : > { %v3135_v26 = vpop.permute.xlu0 %3134  ;;  %v3157_v55 = vunpack.i.h.bf16 %v3155_v50  ;;  %v3156_v56 = vunpack.i.l.bf16 %v3155_v50 }
 0x35f   : > { %v3137_v41 = vunpack.i.h.bf16 %v3135_v26  ;;  %v3136_v46 = vunpack.i.l.bf16 %v3135_v26  ;;  %2845 = vmatprep.subr.bf16.mxu1 %v2844_v51 }
 0x360   : > { %v1858_v6 = vsel %vm356_vm9, %v3156_v56, %v3157_v55 }
 0x361   : > { %v1849_v57 = vsel %vm356_vm9, %v3137_v41, %v3141_v48  ;;  %v1847_v58 = vsel %vm356_vm9, %v3136_v46, %v3131_v37  ;;  %v3165_v2 = vpop.permute.xlu1 %3164  ;;  %v2776_v48 = vld [vmem:[%s4135_s3 + $0x4] sm:$0xf] }
 0x362   : > { %v2846_v59 = vpack.c.bf16 %v1849_v57, %v1847_v58  ;;  %v3150_v60 = vpop.permute.xlu0 %3149  ;;  %v3167_v29 = vunpack.i.h.bf16 %v3165_v2  ;;  %v3166_v33 = vunpack.i.l.bf16 %v3165_v2 }
 0x363   : > { %v3152_v3 = vunpack.i.h.bf16 %v3150_v60  ;;  %v3151_v4 = vunpack.i.l.bf16 %v3150_v60 }
 0x364   : > { %2847 = vmatpush1.bf16.msra.mxu1 %v2846_v59  ;;  %v1958_v49 = vsel %vm1106_vm10, %v3166_v33, %v3167_v29 }
 0x365   : > { %2849 = vmatprep.subr.bf16.mxu1 %v2848_v61  ;;  %v1856_v5 = vsel %vm356_vm9, %v3151_v4, %v3152_v3  ;;  %v3175_v14 = vpop.permute.xlu1 %3174 }
 0x366   : > { %v3160_v8 = vpop.permute.xlu0 %3159  ;;  %v2852_v9 = vpack.c.bf16 %v1858_v6, %v1856_v5  ;;  %v3177_v31 = vunpack.i.h.bf16 %v3175_v14 }
 0x367   : > { %v3162_v12 = vunpack.i.h.bf16 %v3160_v8  ;;  %v3161_v40 = vunpack.i.l.bf16 %v3160_v8 }
 0x368   : > { %2851 = vmatpush1.bf16.msra.mxu1 %v2850_v7 }
 0x369   : > { %v1857_v15 = vsel %vm356_vm9, %v3162_v12, %v3156_v56  ;;  %v1855_v44 = vsel %vm356_vm9, %v3161_v40, %v3151_v4  ;;  %2853 = vmatprep.subr.bf16.mxu1 %v2852_v9  ;;  %v3185_v35 = vpop.permute.xlu1 %3184  ;;  %v2165_v12 = vld [vmem:[%s4137_s5] sm:$0xf] }
 0x36a   : > { %v2854_v0 = vpack.c.bf16 %v1857_v15, %v1855_v44  ;;  %v3170_v17 = vpop.permute.xlu0 %3169  ;;  %v3187_v50 = vunpack.i.h.bf16 %v3185_v35  ;;  %v3186_v51 = vunpack.i.l.bf16 %v3185_v35 }
 0x36b   : > { %v3172_v25 = vunpack.i.h.bf16 %v3170_v17  ;;  %v3171_v27 = vunpack.i.l.bf16 %v3170_v17 }
 0x36c   : > { %2855 = vmatpush1.bf16.msra.mxu1 %v2854_v0  ;;  %v1984_v55 = vsel %vm1244_vm12, %v3186_v51, %v3187_v50 }
 0x36d   : > { %2858 = vmatprep.subr.msk.bf16.mxu1 %vm3842_vm14, %v3874_v63  ;;  %v1960_v36 = vsel %vm1106_vm10, %v3171_v27, %v3172_v25  ;;  %v3176_v63 = vunpack.i.l.bf16 %v3175_v14  ;;  %v1959_v39 = vsel %vm1106_vm10, %v3177_v31, %v3171_v27  ;;  %v3195_v60 = vpop.permute.xlu1 %3194 }
 0x36e   : > { %v3180_v34 = vpop.permute.xlu0 %3179  ;;  %v2866_v52 = vpack.c.bf16 %v1960_v36, %v1958_v49  ;;  %v3196_v1 = vunpack.i.l.bf16 %v3195_v60 }
 0x36f   : > { %2777 = vmatmul.mubr.msk.f32.vlgmr.msra.gmra.mrb[10].mxu1 %vm1636_vm0, %v2776_v48  ;;  %v3182_v37 = vunpack.i.h.bf16 %v3180_v34  ;;  %v3181_v38 = vunpack.i.l.bf16 %v3180_v34  ;;  %v1957_v46 = vsel %vm1106_vm10, %v3176_v63, %v3166_v33 }
 0x370   : > { %2861 = vmatpush1.bf16.msk.msra.mxu1 %vm3849_vm15, %v3876_v11  ;;  %2058 = vmatprep.mubr.f32.mxu1 %v3940_v43  ;;  %v2869_v54 = vpack.c.bf16 %v1959_v39, %v1957_v46 }
 0x371   : > { %2863 = vmatprep.subr.bf16.mxu1 %v3747_v47  ;;  %v1982_v11 = vsel %vm1244_vm12, %v3181_v38, %v3182_v37  ;;  %v3205_v2 = vpop.permute.xlu1 %3204 }
 0x372   : > { %v3190_v26 = vpop.permute.xlu0 %3189  ;;  %v2872_v58 = vpack.c.bf16 %v1984_v55, %v1982_v11  ;;  %v3207_v19 = vunpack.i.h.bf16 %v3205_v2  ;;  %v3206_v24 = vunpack.i.l.bf16 %v3205_v2 }
 0x373   : > { %v3192_v53 = vunpack.i.h.bf16 %v3190_v26  ;;  %v3191_v41 = vunpack.i.l.bf16 %v3190_v26 }
 0x374   : > { %2865 = vmatpush1.bf16.msra.mxu1 %v3745_v45  ;;  %v2077_v5 = vsel %vm1366_vm13, %v3206_v24, %v3196_v1 }
 0x375   : > { %2868 = vmatprep.subr.msk.bf16.mxu1 %vm3842_vm14, %v2866_v52  ;;  %v1983_v56 = vsel %vm1244_vm12, %v3192_v53, %v3186_v51  ;;  %v1981_v57 = vsel %vm1244_vm12, %v3191_v41, %v3181_v38 }
 0x376   : > { %v2874_v59 = vpack.c.bf16 %v1983_v56, %v1981_v57  ;;  %v3200_v61 = vpop.permute.xlu0 %3199 }
 0x377   : > { %v3202_v62 = vunpack.i.h.bf16 %v3200_v61  ;;  %v3201_v42 = vunpack.i.l.bf16 %v3200_v61 }
 0x378   : > { %2871 = vmatpush1.bf16.msk.msra.mxu1 %vm3849_vm15, %v2869_v54 }
 0x379   : > { %2873 = vmatprep.subr.bf16.mxu1 %v2872_v58  ;;  %v2079_v3 = vsel %vm1366_vm13, %v3207_v19, %v3201_v42 }
 0x37a   : > { %v2893_v10 = vpack.c.bf16 %v2079_v3, %v2077_v5 }
 0x37c   : > { %2875 = vmatpush1.bf16.msra.mxu1 %v2874_v59 }
 0x37d   : > { %2877 = vmatprep.subr.bf16.mxu1 %v3747_v47  ;;  %v3197_v47 = vunpack.i.h.bf16 %v3195_v60 }
 0x37f   : > { %2787 = vmatmul.mubr.msk.f32.vlgmr.msra.gmra.mrb[12].mxu1 %vm1636_vm0, %v2778_v32 }
 0x380   : > { %2879 = vmatpush1.bf16.msra.mxu1 %v3745_v45  ;;  %2158 = vmatprep.mubr.f32.mxu1 %v3940_v43  ;;  %v2080_v45 = vsel %vm1366_vm13, %v3201_v42, %v3202_v62 }
 0x381   : > { %2882 = vmatprep.subr.msk.bf16.mxu1 %vm2881_vm2, %v2880_v30  ;;  %v2078_v30 = vsel %vm1366_vm13, %v3196_v1, %v3197_v47 }
 0x382   : > { %v2890_v4 = vpack.c.bf16 %v2080_v45, %v2078_v30  ;;  %v4050_v49 = vpop.permute.xlu1 %2177 }
 0x384   : > { %2885 = vmatpush1.bf16.msk.msra.mxu1 %vm2884_vm5, %v2883_v28 }
 0x385   : > { %2887 = vmatprep.subr.bf16.mxu1 %v2872_v58 }
 0x387   : > { %v1634_v28 = vpop.permute.xlu0 %1633 }
 0x388   : > { %2889 = vmatpush1.bf16.msra.mxu1 %v2874_v59 }
 0x389   : > { %2892 = vmatprep.subr.msk.bf16.mxu1 %vm2881_vm2, %v2890_v4 }
 0x38b   : > { %v1510_v41 = vpop.permute.xlu0 %1509 }
 0x38c   : > { %2895 = vmatpush1.bf16.msk.msra.mxu1 %vm2884_vm5, %v2893_v10  ;;  %v1521_v58 = vadd.f32 %v3726_v13, %v1510_v41  ;;  %v1522_v32 = vadd.f32 %v3728_v16, %v1510_v41 }
 0x38f   : > { %2797 = vmatmul.mubr.msk.f32.vlgmr.msra.gmra.mrb[14].mxu1 %vm1636_vm0, %v2788_v22 }
 0x390   : > { %2271 = vmatprep.mubr.f32.mxu1 %v3940_v43 }
 0x3d2   : > { %v1706_v6 = vpop.f32.mrb[8].mxu1 }
 0x3d3   : > { %v1707_v20 = vadd.f32 %v1706_v6, %v1634_v28  ;;  %v1708_v7 = vpop.f32.mrb[9].mxu1 }
 0x3d4   : > { %v4004_v8 = vadd.f32 %v1708_v7, %v1634_v28 }
 0x3d5   : > { %v2166_v23 = vmul.f32 %v1707_v20, %v1707_v20 }
 0x3d6   : > { %v2167_v9 = vmul.f32 %v4004_v8, %v4004_v8 }
 0x3d8   : > { %2798 = vmatprep.subr.msk.mxu1 %vm372_vm4, %v2167_v9 }
 0x3d9   : > { %2799 = vmatpush1.msk.msra.mxu1 %vm372_vm4, %v2166_v23  ;;  %v2564_v23 = vrot.slane %v1521_v58, 4 }
 0x3da   : > { %2800 = vmatmul.mubr.msk.f32.vlgmr.msra.gmra.mrb[16].mxu1 %vm359_vm6, %v2165_v12 }
 0x3db   : > { %2342 = vmatprep.mubr.f32.mxu1 %v3940_v43 }
 0x442   : > { %v1940_v40 = vpop.f32.mrb[10].mxu1 }
 0x443   : > { %v4015_v14 = vadd.f32 %v1940_v40, %v1634_v28  ;;  %v1942_v15 = vpop.f32.mrb[11].mxu1 }
 0x444   : > { %v4017_v44 = vadd.f32 %v1942_v15, %v1634_v28 }
 0x445   : > { %v2168_v17 = vmul.f32 %v4015_v14, %v4015_v14 }
 0x446   : > { %v2169_v0 = vmul.f32 %v4017_v44, %v4017_v44 }
 0x448   : > { %2801 = vmatprep.subr.msk.mxu1 %vm372_vm4, %v2169_v0 }
 0x449   : > { %2802 = vmatpush1.msk.msra.mxu1 %vm372_vm4, %v2168_v17 }
 0x44a   : > { %2803 = vmatmul.mubr.msk.f32.vlgmr.msra.gmra.mrb[18].mxu1 %vm359_vm6, %v2165_v12 }
 0x44b   : > { %2413 = vmatprep.mubr.f32.mxu1 %v3940_v43 }
 0x452   : > { %v2060_v25 = vpop.f32.mrb[12].mxu1 }
 0x453   : > { %v4027_v27 = vadd.f32 %v2060_v25, %v1634_v28  ;;  %v2062_v48 = vpop.f32.mrb[13].mxu1 }
 0x454   : > { %v4029_v29 = vadd.f32 %v2062_v48, %v1634_v28 }
 0x455   : > { %v2170_v34 = vmul.f32 %v4027_v27, %v4027_v27 }
 0x456   : > { %v2171_v33 = vmul.f32 %v4029_v29, %v4029_v29 }
 0x458   : > { %2804 = vmatprep.subr.msk.mxu1 %vm372_vm4, %v2171_v33 }
 0x459   : > { %2805 = vmatpush1.msk.msra.mxu1 %vm372_vm4, %v2170_v34 }
 0x45a   : > { %2806 = vmatmul.mubr.msk.f32.vlgmr.msra.gmra.mrb[20].mxu1 %vm359_vm6, %v2165_v12 }
 0x45b   : > { %2484 = vmatprep.mubr.f32.mxu1 %v3940_v43 }
 0x462   : > { %v2160_v35 = vpop.f32.mrb[14].mxu1 }
 0x463   : > { %v4039_v36 = vadd.f32 %v2160_v35, %v1634_v28  ;;  %v2162_v37 = vpop.f32.mrb[15].mxu1 }
 0x464   : > { %v4041_v38 = vadd.f32 %v2162_v37, %v1634_v28 }
 0x465   : > { %v2172_v63 = vmul.f32 %v4039_v36, %v4039_v36 }
 0x466   : > { %v2173_v31 = vmul.f32 %v4041_v38, %v4041_v38 }
 0x468   : > { %2807 = vmatprep.subr.msk.mxu1 %vm372_vm4, %v2173_v31 }
 0x469   : > { %2808 = vmatpush1.msk.msra.mxu1 %vm372_vm4, %v2172_v63 }
 0x46a   : > { %2809 = vmatmul.mubr.msk.f32.vlgmr.msra.gmra.mrb[22].mxu1 %vm359_vm6, %v2165_v12  ;;  %v2565_v12 = vrot.slane %v1522_v32, 4 }
 0x4ad   : > { %v2273_v43 = vpop.f32.mrb[16].mxu1 }
 0x4ae   : > { %v2274_v50 = vadd.f32 %v2273_v43, %v4050_v49  ;;  %v2275_v51 = vpop.f32.mrb[17].mxu1 }
 0x4af   : > { %v2276_v26 = vadd.f32 %v2275_v51, %v4050_v49 }
 0x4b0   : > { %3217 = vrsqrt.f32 %v2274_v50  ;;  %vm2493_vm1 = vcmp.eq.f32.partialorder %v2274_v50, inf  ;;  %v2496_v11 = vand.u32 2147483648, %v2274_v50  ;;  %vm2495_vm3 = vcmp.eq.f32.partialorder %v2274_v50, 0.0 }
 0x4b1   : > { %3219 = vrsqrt.f32 %v2276_v26  ;;  %vm2500_vm4 = vcmp.eq.f32.partialorder %v2276_v26, inf  ;;  %v2503_v55 = vand.u32 2147483648, %v2276_v26  ;;  %vm2502_vm6 = vcmp.eq.f32.partialorder %v2276_v26, 0.0 }
 0x4ba   : > { %v3218_v39 = vpop.eup %3217 }
 0x4bb   : > { %v3220_v52 = vpop.eup %3219  ;;  %v2492_v53 = vmul.f32 %v3218_v39, %v2274_v50 }
 0x4bc   : > { %v2499_v46 = vmul.f32 %v3220_v52, %v2276_v26 }
 0x4bd   : > { %v2494_v54 = vsel %vm2493_vm1, %v2274_v50, %v2492_v53 }
 0x4be   : > { %v2497_v56 = vsel %vm2495_vm3, %v2496_v11, %v2494_v54  ;;  %v2501_v57 = vsel %vm2500_vm4, %v2276_v26, %v2499_v46 }
 0x4bf   : > { %v2547_v59 = vmul.f32 %v2497_v56, %v1707_v20  ;;  %v2504_v60 = vsel %vm2502_vm6, %v2503_v55, %v2501_v57 }
 0x4c0   : > { %v2548_v61 = vmul.f32 %v2504_v60, %v4004_v8 }
 0x4c1   : > { %v2555_v62 = vadd.f32 %v2547_v59, %v1521_v58 }
 0x4c2   : > { %v2556_v42 = vadd.f32 %v2548_v61, %v1522_v32 }
 0x4c4   : > { %v2559_v47 = vcombine.low %v2555_v62, %v2556_v42 }
 0x4c6   : > { %2561 = vst [vmem:[%s4060_s16] sm:$0xff] %v2559_v47 }
 0x51d   : > { %v2344_v1 = vpop.f32.mrb[18].mxu1 }
 0x51e   : > { %v2345_v2 = vadd.f32 %v2344_v1, %v4050_v49  ;;  %v2346_v45 = vpop.f32.mrb[19].mxu1 }
 0x51f   : > { %v2347_v13 = vadd.f32 %v2346_v45, %v4050_v49 }
 0x520   : > { %3221 = vrsqrt.f32 %v2345_v2  ;;  %vm2507_vm7 = vcmp.eq.f32.partialorder %v2345_v2, inf  ;;  %v2510_v30 = vand.u32 2147483648, %v2345_v2  ;;  %vm2509_vm8 = vcmp.eq.f32.partialorder %v2345_v2, 0.0 }
 0x521   : > { %3223 = vrsqrt.f32 %v2347_v13  ;;  %vm2514_vm9 = vcmp.eq.f32.partialorder %v2347_v13, inf  ;;  %v2517_v5 = vand.u32 2147483648, %v2347_v13  ;;  %vm2516_vm10 = vcmp.eq.f32.partialorder %v2347_v13, 0.0 }
 0x52a   : > { %v3222_v16 = vpop.eup %3221 }
 0x52b   : > { %v3224_v19 = vpop.eup %3223  ;;  %v2506_v24 = vmul.f32 %v3222_v16, %v2345_v2 }
 0x52c   : > { %v2513_v3 = vmul.f32 %v3224_v19, %v2347_v13 }
 0x52d   : > { %v2508_v4 = vsel %vm2507_vm7, %v2345_v2, %v2506_v24  ;;  %v2415_v10 = vpop.f32.mrb[20].mxu1 }
 0x52e   : > { %v2511_v22 = vsel %vm2509_vm8, %v2510_v30, %v2508_v4  ;;  %v2515_v28 = vsel %vm2514_vm9, %v2347_v13, %v2513_v3  ;;  %v2416_v6 = vadd.f32 %v2415_v10, %v4050_v49  ;;  %v2417_v20 = vpop.f32.mrb[21].mxu1 }
 0x52f   : > { %v2549_v7 = vmul.f32 %v2511_v22, %v4015_v14  ;;  %v2518_v8 = vsel %vm2516_vm10, %v2517_v5, %v2515_v28  ;;  %v2418_v9 = vadd.f32 %v2417_v20, %v4050_v49  ;;  %v1515_v14 = vpop.permute.xlu1 %1514 }
 0x530   : > { %v2550_v40 = vmul.f32 %v2518_v8, %v4017_v44  ;;  %3225 = vrsqrt.f32 %v2416_v6  ;;  %vm2521_vm11 = vcmp.eq.f32.partialorder %v2416_v6, inf  ;;  %v2524_v34 = vand.u32 2147483648, %v2416_v6 }
 0x531   : > { %3227 = vrsqrt.f32 %v2418_v9  ;;  %v2568_v15 = vadd.f32 %v2564_v23, %v2549_v7  ;;  %vm2523_vm12 = vcmp.eq.f32.partialorder %v2416_v6, 0.0  ;;  %vm2528_vm13 = vcmp.eq.f32.partialorder %v2418_v9, inf }
 0x532   : > { %v2569_v0 = vadd.f32 %v2565_v12, %v2550_v40  ;;  %v2531_v31 = vand.u32 2147483648, %v2418_v9  ;;  %vm2530_vm14 = vcmp.eq.f32.partialorder %v2418_v9, 0.0  ;;  %v1523_v53 = vadd.f32 %v3730_v18, %v1515_v14 }
 0x533   : > { %v1524_v41 = vadd.f32 %v3732_v21, %v1515_v14 }
 0x534   : > { %v2572_v17 = vcombine.low %v2568_v15, %v2569_v0  ;;  %v2586_v60 = vrot.slane %v1523_v53, 4 }
 0x535   : > { %v2587_v62 = vrot.slane %v1524_v41, 4 }
 0x536   : > { %2810 = vst [vmem:[%s4060_s16 + $0x8] sm:$0xff] %v2572_v17 }
 0x53a   : > { %v3226_v25 = vpop.eup %3225 }
 0x53b   : > { %v3228_v48 = vpop.eup %3227  ;;  %v2520_v33 = vmul.f32 %v3226_v25, %v2416_v6 }
 0x53c   : > { %v2527_v35 = vmul.f32 %v3228_v48, %v2418_v9 }
 0x53d   : > { %v2522_v37 = vsel %vm2521_vm11, %v2416_v6, %v2520_v33  ;;  %v2486_v63 = vpop.f32.mrb[22].mxu1 }
 0x53e   : > { %v2525_v43 = vsel %vm2523_vm12, %v2524_v34, %v2522_v37  ;;  %v2529_v44 = vsel %vm2528_vm13, %v2418_v9, %v2527_v35  ;;  %v2487_v50 = vadd.f32 %v2486_v63, %v4050_v49  ;;  %v2488_v51 = vpop.f32.mrb[23].mxu1 }
 0x53f   : > { %v2551_v26 = vmul.f32 %v2525_v43, %v4027_v27  ;;  %v2532_v39 = vsel %vm2530_vm14, %v2531_v31, %v2529_v44  ;;  %v2489_v52 = vadd.f32 %v2488_v51, %v4050_v49 }
 0x540   : > { %v2552_v11 = vmul.f32 %v2532_v39, %v4029_v29  ;;  %3229 = vrsqrt.f32 %v2487_v50  ;;  %vm2535_vm15 = vcmp.eq.f32.partialorder %v2487_v50, inf  ;;  %v2538_v27 = vand.u32 2147483648, %v2487_v50 }
 0x541   : > { %3231 = vrsqrt.f32 %v2489_v52  ;;  %v2576_v46 = vadd.f32 %v2551_v26, %v1523_v53  ;;  %vm2537_vm0 = vcmp.eq.f32.partialorder %v2487_v50, 0.0  ;;  %vm2542_vm2 = vcmp.eq.f32.partialorder %v2489_v52, inf }
 0x542   : > { %v2577_v54 = vadd.f32 %v2552_v11, %v1524_v41  ;;  %v2545_v18 = vand.u32 2147483648, %v2489_v52  ;;  %vm2544_vm5 = vcmp.eq.f32.partialorder %v2489_v52, 0.0 }
 0x544   : > { %v2580_v55 = vcombine.low %v2576_v46, %v2577_v54 }
 0x546   : > { %2811 = vst [vmem:[%s4060_s16 + $0x10] sm:$0xff] %v2580_v55 }
 0x54a   : > { %v3230_v56 = vpop.eup %3229 }
 0x54b   : > { %v3232_v57 = vpop.eup %3231  ;;  %v2534_v58 = vmul.f32 %v3230_v56, %v2487_v50 }
 0x54c   : > { %v2541_v49 = vmul.f32 %v3232_v57, %v2489_v52 }
 0x54d   : > { %v2536_v59 = vsel %vm2535_vm15, %v2487_v50, %v2534_v58 }
 0x54e   : > { %v2539_v21 = vsel %vm2537_vm0, %v2538_v27, %v2536_v59  ;;  %v2543_v29 = vsel %vm2542_vm2, %v2489_v52, %v2541_v49 }
 0x54f   : > { %v2553_v32 = vmul.f32 %v2539_v21, %v4039_v36  ;;  %v2546_v61 = vsel %vm2544_vm5, %v2545_v18, %v2543_v29 }
 0x550   : > { %v2554_v42 = vmul.f32 %v2546_v61, %v4041_v38 }
 0x551   : > { %v2590_v47 = vadd.f32 %v2586_v60, %v2553_v32 }
 0x552   : > { %v2591_v1 = vadd.f32 %v2587_v62, %v2554_v42 }
 0x554   : > { %v2594_v2 = vcombine.low %v2590_v47, %v2591_v1 }
 0x556   : > { %2812 = vst [vmem:[%s4060_s16 + $0x18] sm:$0xff] %v2594_v2 }
 0x557   : > { %3247 = shalt.err (!%p3244_p3)
}
 0x558   : > { %s3248_s20 = scalar_lea.hbm %s4084_s13, 512  ;;  %s3252_s29 = scalar_lea.hbm %s4139_s7, 1024 }
 0x559   : > { %p3249_p4 = scmp.ne.s32.totalorder %s4084_s13, %s3248_s20  ;;  %p3253_p9 = scmp.lt.u32.totalorder %s4084_s13, %s4139_s7 }
 0x55a   : > { %p3254_p10 = scmp.lt.u32.totalorder %s3252_s29, %s3248_s20  ;;  %p3256_p12 = scmp.lt.u32.totalorder %s3248_s20, %s4084_s13 }
 0x55b   : > { %p3250_p7 = pnand %p3249_p4, %p3389_p5 }
 0x55c   : > { %p3255_p11 = por %p3254_p10, %p3253_p9 }
 0x55d   : > { %p3251_p8 = pneg %p3250_p7 }
 0x55e   : > { %p3257_p13 = por %p3256_p12, %p3255_p11 }
 0x560   : > { %p3258_p0 = pnand %p3257_p13, %p3251_p8 }
 0x562   : > { %3261 = shalt.err (!%p3258_p0)
}
 0x563   : > { %s3309_s9 = smov 128   ;;  %s3310_s8 = smov 8  }
 0x564   : > { %2960 = dma.vmem_to_hbm [thread:$0]  (%p3389_p5), %s4086_s23, 512, %s4084_s13, %s4091_s14, %s3309_s9, %s3309_s9, %s3310_s8  }
 0x565 PF: > { %p2966_p1 = scmp.ge.s32.totalorder %s3296_s27, 2  ;;  %s2627_s15 = sand.u32 1, %s3284_s24  }
 0x566   : > { %s2628_s28 = scalar_lea.sflag [#allocation4], %s2627_s15 }
 0x567   : > { %p2963_p2 = pnand %p2966_p1, %p3393_p6 }
 0x569   : > { %3279 = dma.done.wait (!%p2963_p2), %s2628_s28, 512  }
 0x56a   : > { %3281 = vsyncadd (!%p2963_p2), %s2628_s28, 4294966784  ;;  %p17_p3 = scmp.ge.s32.totalorder %s3376_s30, 4   ;;  %s4154_s24 = smov %s3288_s25 }
 0x56b   : > { %s4155_s25 = smov %s3292_s26  ;;  %s4156_s26 = smov %s3387_s10 }
 0x56c   : > { %s4157_s27 = smov %s3376_s30  ;;  %19 = sbr.rel (!%p17_p3) target bundleno = 3 (0x3), region = 97 }
 0x573   :  { %2633 = vsyncpa [#allocation4], 1 }
 0x574   :  { %2635 = vsyncpa [#allocation4 + $0x1], 1 }

</bundles_post_ra>
